<compile_context>
chip_gen: v5e
topology: v5e:2x2
jax: 0.10.0
libtpu: 0.0.40
codegen_flags: <defaults>
</compile_context>

<pallas_src>
import functools
import math

import jax
import jax.numpy as jnp
from jax.experimental import pallas as pl
from jax.experimental.pallas import tpu as pltpu

SUBLANE = 8      # f32 sublane granularity: feature dims padded to this
LANE = 128       # batch rides the 128-lane axis


def _round_up(n, m):
    return ((n + m - 1) // m) * m


def _const_index_map(ndim):
    zeros = (0,) * ndim
    return lambda i: zeros


# ----------------------------- Pallas kernel --------------------------------

def _kan_layer(x, g_ref, ia_ref, nib_ref, w_ref, k):
    """One KANLayer on an (in_pad, TB) activation tile (features x batch).

    g_ref   : (in_pad, G)            grid knots, feature-on-sublane
    ia_ref  : (in_pad, k*G)          1/(g_{i+kk}-g_i)        at column (kk-1)*G+i
    nib_ref : (in_pad, k*G)         -1/(g_{i+kk+1}-g_{i+1})  at column (kk-1)*G+i
    w_ref   : (n_coef+1, out_pad, in_pad)  [0]=mask*scale_base, [c+1]=spline c
    Returns (out_pad, TB).
    """
    G = g_ref.shape[1]

    def col(ref, idx):                       # (in_pad, 1): lane-broadcast column
        return ref[:, idx:idx + 1]

    # Base (SiLU) path: logistic -> EUP slot; folded weight is plane index 0.
    base = x * jax.nn.sigmoid(x)
    acc = jnp.dot(w_ref[0], base, preferred_element_type=jnp.float32)

    # Hoist per-knot differences once; reused by every Cox-de Boor level.
    diffs = [x - col(g_ref, i) for i in range(G)]

    # Degree-0 planes as differences of step functions (one compare per knot).
    steps = [jnp.where(d >= 0.0, 1.0, 0.0) for d in diffs]
    planes = [steps[i] - steps[i + 1] for i in range(G - 1)]

    if k == 0:
        for i in range(G - 1):
            acc = acc + jnp.dot(w_ref[i + 1], planes[i],
                                preferred_element_type=jnp.float32)
        return acc

    # Cox-de Boor recursion; at the last level consume each final plane
    # straight into the output matmul (no concat / V materialization).
    for kk in range(1, k + 1):
        last = kk == k
        new_planes = []
        for i in range(G - kk - 1):
            c = (kk - 1) * G + i
            p = (diffs[i] * col(ia_ref, c)) * planes[i] \
                + (diffs[i + kk + 1] * col(nib_ref, c)) * planes[i + 1]
            if last:
                acc = acc + jnp.dot(w_ref[i + 1], p,
                                    preferred_element_type=jnp.float32)
            else:
                new_planes.append(p)
        planes = new_planes
    return acc


def multkan_kernel(*refs, k, n_layers):
    x_ref, out_ref = refs[0], refs[-1]
    layer_refs = refs[1:-1]
    x = x_ref[...]                                  # (in_pad0, TB) f32
    for l in range(n_layers):
        g_ref, ia_ref, nib_ref, w_ref = layer_refs[4 * l: 4 * l + 4]
        x = _kan_layer(x, g_ref, ia_ref, nib_ref, w_ref, k)
    out_ref[...] = x.astype(out_ref.dtype)


def multkan_forward(x, packed, k, batch_tile=256):
    batch, in_dim = x.shape
    in_pad0 = packed[0]["in_pad"]
    out_pad_last = packed[-1]["out_pad"]
    out_dim_last = packed[-1]["out_dim"]

    TB = int(batch_tile)
    n_tiles = pl.cdiv(batch, TB)
    b_pad = n_tiles * TB

    # Activations carried batch-on-lanes: (features, batch).
    xt = jnp.zeros((in_pad0, b_pad), jnp.float32)
    xt = xt.at[:in_dim, :batch].set(x.astype(jnp.float32).T)

    kernel = functools.partial(multkan_kernel, k=k, n_layers=len(packed))

    inputs = [xt]
    in_specs = [pl.BlockSpec((in_pad0, TB), lambda i: (0, i))]
    weight_bytes = 0
    for p in packed:
        for name in ("grid_t", "invA_t", "negInvB_t", "w_all"):
            arr = p[name]
            inputs.append(arr)
            # Full-array block with a constant index -> fetched once, resident
            # in VMEM for all grid steps.
            in_specs.append(pl.BlockSpec(arr.shape, _const_index_map(arr.ndim)))
            weight_bytes += int(arr.size) * arr.dtype.itemsize

    # Advisory scheduler hint (matmul flops + per-layer sigmoid count).
    flops = 0
    transcendentals = 0
    for p in packed:
        flops += 2 * b_pad * (p["n_coef"] + 1) * p["in_pad"] * p["out_pad"]
        transcendentals += b_pad * p["in_pad"]
    bytes_accessed = (in_pad0 + out_pad_last) * b_pad * 4 + weight_bytes

    tile_bytes = (in_pad0 + out_pad_last) * TB * 4
    vmem_limit = max(4 * (weight_bytes + 2 * tile_bytes), 16 * 1024 * 1024)

    out = pl.pallas_call(
        kernel,
        out_shape=jax.ShapeDtypeStruct((out_pad_last, b_pad), jnp.float32),
        grid=(n_tiles,),
        in_specs=in_specs,
        out_specs=pl.BlockSpec((out_pad_last, TB), lambda i: (0, i)),
        compiler_params=pltpu.CompilerParams(
            dimension_semantics=("parallel",),
            vmem_limit_bytes=int(vmem_limit)),
        cost_estimate=pl.CostEstimate(
            flops=int(flops),
            transcendentals=int(transcendentals),
            bytes_accessed=int(bytes_accessed)),
    )(*inputs)
    # Un-transpose once in the wrapper and drop the padding.
    return out[:out_dim_last, :batch].T


# --------------------------- parameter construction -------------------------

def extend_grid(grid, k_extend):
    h = (grid[:, -1:] - grid[:, :1]) / (grid.shape[1] - 1)
    for _ in range(k_extend):
        grid = jnp.concatenate([grid[:, :1] - h, grid], axis=1)
        grid = jnp.concatenate([grid, grid[:, -1:] + h], axis=1)
    return grid


def make_kan_layer_params(key, in_dim, out_dim, num, k,
                          scale_base_mu=0.0, scale_base_sigma=1.0, scale_sp=1.0,
                          grid_range=(-1.0, 1.0)):
    k_coef, k_sb = jax.random.split(key)
    grid = jnp.linspace(grid_range[0], grid_range[1], num + 1,
                        dtype=jnp.float32)[None, :].repeat(in_dim, axis=0)
    grid = extend_grid(grid, k_extend=k)                 # (in_dim, num+1+2k)
    n_coef = grid.shape[1] - k - 1                       # = num + k
    # TODO(synk): PyTorch fits coef to noise via lstsq (curve2coef); here we
    # draw deterministic small-scale coefficients of the same shape instead.
    coef = 0.1 * jax.random.normal(k_coef, (in_dim, out_dim, n_coef),
                                   dtype=jnp.float32)
    mask = jnp.ones((in_dim, out_dim), jnp.float32)
    scale_base = (scale_base_mu / math.sqrt(in_dim)
                  + scale_base_sigma
                  * (jax.random.uniform(k_sb, (in_dim, out_dim),
                                        dtype=jnp.float32) * 2.0 - 1.0)
                  / math.sqrt(in_dim))
    scale_sp_p = jnp.ones((in_dim, out_dim), jnp.float32) * scale_sp \
        / math.sqrt(in_dim) * mask
    return (grid, coef, scale_base, scale_sp_p, mask)


def pack_layer_params(lp, k):
    """Pre-transpose everything to the batch-on-lanes layout, fold mask/scales
    into a single per-layer weight tensor, precompute knot-span reciprocals."""
    grid, coef, sb, sp, mask = lp                        # grid: (in_dim, G)
    in_dim, G = grid.shape
    out_dim = coef.shape[1]
    n_coef = G - k - 1
    in_pad = _round_up(in_dim, SUBLANE)
    out_pad = _round_up(out_dim, SUBLANE)

    # Knots with features on the sublane axis: (in_pad, G).
    grid_t = jnp.zeros((in_pad, G), jnp.float32).at[:in_dim, :].set(grid)

    # Masked reciprocals of the Cox-de Boor knot spans, one column per (kk, i).
    # NOTE: zero spans map to 0 here (reference's nan_to_num maps inf->3.4e38);
    # identical for the uniform extended grid used by MultKAN.
    invA_t = jnp.zeros((in_pad, k * G if k > 0 else 1), jnp.float32)
    negInvB_t = jnp.zeros((in_pad, k * G if k > 0 else 1), jnp.float32)
    for kk in range(1, k + 1):
        d1 = grid[:, kk:-1] - grid[:, :-(kk + 1)]        # g_{i+kk}   - g_i
        d2 = grid[:, kk + 1:] - grid[:, 1:-kk]           # g_{i+kk+1} - g_{i+1}
        ia = jnp.where(d1 == 0, 0.0, 1.0 / jnp.where(d1 == 0, 1.0, d1))
        ib = jnp.where(d2 == 0, 0.0, 1.0 / jnp.where(d2 == 0, 1.0, d2))
        n_b = G - kk - 1
        c0 = (kk - 1) * G
        invA_t = invA_t.at[:in_dim, c0:c0 + n_b].set(ia)
        negInvB_t = negInvB_t.at[:in_dim, c0:c0 + n_b].set(-ib)

    # Combined weight (out, in) per coefficient; index 0 is the SiLU/base path.
    w_all = jnp.zeros((n_coef + 1, out_pad, in_pad), jnp.float32)
    w_all = w_all.at[0, :out_dim, :in_dim].set((mask * sb).T)
    wsp = coef * (mask * sp)[:, :, None]                 # (in, out, n_coef)
    wsp = jnp.transpose(wsp, (2, 1, 0))                  # (n_coef, out, in)
    w_all = w_all.at[1:, :out_dim, :in_dim].set(wsp)

    return dict(grid_t=grid_t, invA_t=invA_t, negInvB_t=negInvB_t, w_all=w_all,
                in_dim=in_dim, out_dim=out_dim,
                in_pad=in_pad, out_pad=out_pad, n_coef=n_coef)


class MultKANPallas:
    """Simplified MultKAN: widths [[w,0],...] -> chain of KANLayers, fused into
    one Pallas kernel for the whole forward pass."""

    def __init__(self, width, grid=3, k=3, seed=0, batch_tile=256):
        self.width = [[w, 0] if isinstance(w, int) else w for w in width]
        # TODO(synk): multiplication nodes (w[1] > 0) are not supported; this
        # basic MultKAN.forward never exercises them.
        assert all(w[1] == 0 for w in self.width)
        self.depth = len(self.width) - 1
        self.k = k
        self.batch_tile = batch_tile
        width_in = [sum(w) for w in self.width]
        width_out = [w[0] for w in self.width]
        key = jax.random.PRNGKey(seed)
        keys = jax.random.split(key, self.depth)
        self.layers = [
            make_kan_layer_params(keys[l], width_in[l], width_out[l + 1],
                                  num=grid, k=k)
            for l in range(self.depth)
        ]
        self.packed = [pack_layer_params(lp, k) for lp in self.layers]

    def __call__(self, x):
        return multkan_forward(x, self.packed, self.k, self.batch_tile)


# ----------------------------- pure-JAX reference ---------------------------

def _b_batch_ref(x, grid, k):
    xe = x[:, :, None]
    ge = grid[None, :, :]
    v = ((xe >= ge[:, :, :-1]) & (xe < ge[:, :, 1:])).astype(jnp.float32)
    for kk in range(1, k + 1):
        v = jnp.nan_to_num(
            (xe - ge[:, :, :-(kk + 1)])
            / (ge[:, :, kk:-1] - ge[:, :, :-(kk + 1)]) * v[:, :, :-1]
            + (ge[:, :, kk + 1:] - xe)
            / (ge[:, :, kk + 1:] - ge[:, :, 1:-kk]) * v[:, :, 1:])
    return v


def kan_layer_ref(x, lp, k):
    grid, coef, sb, sp, mask = lp
    bsp = _b_batch_ref(x, grid, k)                       # (B, in, n_coef)
    y = jnp.einsum('ijk,jlk->ijl', bsp, coef)            # (B, in, out)
    base = x * jax.nn.sigmoid(x)
    y = sb[None] * base[:, :, None] + sp[None] * y
    y = mask[None] * y
    return jnp.sum(y, axis=1)


def multkan_ref(x, model):
    for lp in model.layers:
        x = kan_layer_ref(x, lp, model.k)
    return x


# ----------------------------------- main ------------------------------------

if __name__ == "__main__":
    batch = 1024                 # TB=256 -> 4 grid steps (>=2 per v7x core)
    width = [4, 8, 3]            # layers: 4->8, 8->3
    model = MultKANPallas(width=width, grid=3, k=3, seed=0, batch_tile=256)

    key = jax.random.PRNGKey(0)
    x = jax.random.uniform(key, (batch, width[0]), dtype=jnp.float32,
                           minval=-0.9, maxval=0.9)

    y = model(x)
    jax.block_until_ready(y)

    y_ref = multkan_ref(x, model)
    assert y.shape == (batch, width[-1])
    max_err = float(jnp.max(jnp.abs(y - y_ref)))
    assert jnp.allclose(y, y_ref, atol=3e-5, rtol=3e-5), (
        f"mismatch: max err {max_err}")

    print("KERNEL_OK")
</pallas_src>

<mosaic_0001>
module attributes {stable_mosaic.version = 11 : i64} {
  func.func @multkan_kernel(%arg0: i32, %arg1: memref<8x256xf32, #tpu.memory_space<vmem>>, %arg2: memref<8x10xf32, #tpu.memory_space<vmem>>, %arg3: memref<8x30xf32, #tpu.memory_space<vmem>>, %arg4: memref<8x30xf32, #tpu.memory_space<vmem>>, %arg5: memref<7x8x8xf32, #tpu.memory_space<vmem>>, %arg6: memref<8x10xf32, #tpu.memory_space<vmem>>, %arg7: memref<8x30xf32, #tpu.memory_space<vmem>>, %arg8: memref<8x30xf32, #tpu.memory_space<vmem>>, %arg9: memref<7x8x8xf32, #tpu.memory_space<vmem>>, %arg10: memref<8x256xf32, #tpu.memory_space<vmem>>) attributes {dimension_semantics = [#tpu.dimension_semantics<parallel>], iteration_bounds = array<i64: 4>, scalar_prefetch = 0 : i64, scratch_operands = 0 : i64, tpu.core_type = #tpu.core_type<tc>, window_params = [{transform_indices = @transform_0, window_bounds = array<i64: 8, 256>}, {pipeline_mode = #tpu.pipeline_mode<synchronous>, transform_indices = @transform_1, window_bounds = array<i64: 8, 10>}, {pipeline_mode = #tpu.pipeline_mode<synchronous>, transform_indices = @transform_2, window_bounds = array<i64: 8, 30>}, {pipeline_mode = #tpu.pipeline_mode<synchronous>, transform_indices = @transform_3, window_bounds = array<i64: 8, 30>}, {pipeline_mode = #tpu.pipeline_mode<synchronous>, transform_indices = @transform_4, window_bounds = array<i64: 7, 8, 8>}, {pipeline_mode = #tpu.pipeline_mode<synchronous>, transform_indices = @transform_5, window_bounds = array<i64: 8, 10>}, {pipeline_mode = #tpu.pipeline_mode<synchronous>, transform_indices = @transform_6, window_bounds = array<i64: 8, 30>}, {pipeline_mode = #tpu.pipeline_mode<synchronous>, transform_indices = @transform_7, window_bounds = array<i64: 8, 30>}, {pipeline_mode = #tpu.pipeline_mode<synchronous>, transform_indices = @transform_8, window_bounds = array<i64: 7, 8, 8>}, {transform_indices = @transform_9, window_bounds = array<i64: 8, 256>}]} {
    %c0 = arith.constant 0 : index
    %c0_0 = arith.constant 0 : index
    %0 = vector.load %arg1[%c0, %c0_0] : memref<8x256xf32, #tpu.memory_space<vmem>>, vector<8x256xf32>
    %1 = arith.negf %0 : vector<8x256xf32>
    %2 = math.exp %1 : vector<8x256xf32>
    %cst = arith.constant 1.000000e+00 : f32
    %3 = vector.broadcast %cst : f32 to vector<8x256xf32>
    %4 = arith.addf %3, %2 : vector<8x256xf32>
    %5 = arith.divf %3, %4 : vector<8x256xf32>
    %6 = arith.mulf %0, %5 : vector<8x256xf32>
    %c0_1 = arith.constant 0 : index
    %c0_2 = arith.constant 0 : index
    %c0_3 = arith.constant 0 : index
    %7 = vector.load %arg5[%c0_1, %c0_2, %c0_3] : memref<7x8x8xf32, #tpu.memory_space<vmem>>, vector<1x8x8xf32>
    %8 = vector.shape_cast %7 : vector<1x8x8xf32> to vector<8x8xf32>
    %cst_4 = arith.constant dense<0.000000e+00> : vector<8x256xf32>
    %9 = tpu.matmul %8, %6, %cst_4 {dimension_numbers = #tpu.dot_dimension_numbers<[1], [0], [0], [1], [0, 0, 1, 1], [], []>} : vector<8x8xf32>, vector<8x256xf32>, vector<8x256xf32> -> vector<8x256xf32>
    %c0_5 = arith.constant 0 : index
    %c0_6 = arith.constant 0 : index
    %10 = vector.load %arg2[%c0_5, %c0_6] : memref<8x10xf32, #tpu.memory_space<vmem>>, vector<8x1xf32>
    %11 = vector.broadcast %10 : vector<8x1xf32> to vector<8x256xf32>
    %12 = arith.subf %0, %11 : vector<8x256xf32>
    %c0_7 = arith.constant 0 : index
    %c1 = arith.constant 1 : index
    %13 = vector.load %arg2[%c0_7, %c1] : memref<8x10xf32, #tpu.memory_space<vmem>>, vector<8x1xf32>
    %14 = vector.broadcast %13 : vector<8x1xf32> to vector<8x256xf32>
    %15 = arith.subf %0, %14 : vector<8x256xf32>
    %c0_8 = arith.constant 0 : index
    %c2 = arith.constant 2 : index
    %16 = vector.load %arg2[%c0_8, %c2] : memref<8x10xf32, #tpu.memory_space<vmem>>, vector<8x1xf32>
    %17 = vector.broadcast %16 : vector<8x1xf32> to vector<8x256xf32>
    %18 = arith.subf %0, %17 : vector<8x256xf32>
    %c0_9 = arith.constant 0 : index
    %c3 = arith.constant 3 : index
    %19 = vector.load %arg2[%c0_9, %c3] : memref<8x10xf32, #tpu.memory_space<vmem>>, vector<8x1xf32>
    %20 = vector.broadcast %19 : vector<8x1xf32> to vector<8x256xf32>
    %21 = arith.subf %0, %20 : vector<8x256xf32>
    %c0_10 = arith.constant 0 : index
    %c4 = arith.constant 4 : index
    %22 = vector.load %arg2[%c0_10, %c4] : memref<8x10xf32, #tpu.memory_space<vmem>>, vector<8x1xf32>
    %23 = vector.broadcast %22 : vector<8x1xf32> to vector<8x256xf32>
    %24 = arith.subf %0, %23 : vector<8x256xf32>
    %c0_11 = arith.constant 0 : index
    %c5 = arith.constant 5 : index
    %25 = vector.load %arg2[%c0_11, %c5] : memref<8x10xf32, #tpu.memory_space<vmem>>, vector<8x1xf32>
    %26 = vector.broadcast %25 : vector<8x1xf32> to vector<8x256xf32>
    %27 = arith.subf %0, %26 : vector<8x256xf32>
    %c0_12 = arith.constant 0 : index
    %c6 = arith.constant 6 : index
    %28 = vector.load %arg2[%c0_12, %c6] : memref<8x10xf32, #tpu.memory_space<vmem>>, vector<8x1xf32>
    %29 = vector.broadcast %28 : vector<8x1xf32> to vector<8x256xf32>
    %30 = arith.subf %0, %29 : vector<8x256xf32>
    %c0_13 = arith.constant 0 : index
    %c7 = arith.constant 7 : index
    %31 = vector.load %arg2[%c0_13, %c7] : memref<8x10xf32, #tpu.memory_space<vmem>>, vector<8x1xf32>
    %32 = vector.broadcast %31 : vector<8x1xf32> to vector<8x256xf32>
    %33 = arith.subf %0, %32 : vector<8x256xf32>
    %c0_14 = arith.constant 0 : index
    %c8 = arith.constant 8 : index
    %34 = vector.load %arg2[%c0_14, %c8] : memref<8x10xf32, #tpu.memory_space<vmem>>, vector<8x1xf32>
    %35 = vector.broadcast %34 : vector<8x1xf32> to vector<8x256xf32>
    %36 = arith.subf %0, %35 : vector<8x256xf32>
    %c0_15 = arith.constant 0 : index
    %c9 = arith.constant 9 : index
    %37 = vector.load %arg2[%c0_15, %c9] : memref<8x10xf32, #tpu.memory_space<vmem>>, vector<8x1xf32>
    %38 = vector.broadcast %37 : vector<8x1xf32> to vector<8x256xf32>
    %39 = arith.subf %0, %38 : vector<8x256xf32>
    %cst_16 = arith.constant 0.000000e+00 : f32
    %40 = vector.broadcast %cst_16 : f32 to vector<8x256xf32>
    %41 = arith.cmpf oge, %12, %40 : vector<8x256xf32>
    %cst_17 = arith.constant 1.000000e+00 : f32
    %cst_18 = arith.constant 0.000000e+00 : f32
    %42 = vector.broadcast %cst_17 : f32 to vector<8x256xf32>
    %43 = vector.broadcast %cst_18 : f32 to vector<8x256xf32>
    %44 = arith.select %41, %42, %43 : vector<8x256xi1>, vector<8x256xf32>
    %cst_19 = arith.constant 0.000000e+00 : f32
    %45 = vector.broadcast %cst_19 : f32 to vector<8x256xf32>
    %46 = arith.cmpf oge, %15, %45 : vector<8x256xf32>
    %cst_20 = arith.constant 1.000000e+00 : f32
    %cst_21 = arith.constant 0.000000e+00 : f32
    %47 = vector.broadcast %cst_20 : f32 to vector<8x256xf32>
    %48 = vector.broadcast %cst_21 : f32 to vector<8x256xf32>
    %49 = arith.select %46, %47, %48 : vector<8x256xi1>, vector<8x256xf32>
    %cst_22 = arith.constant 0.000000e+00 : f32
    %50 = vector.broadcast %cst_22 : f32 to vector<8x256xf32>
    %51 = arith.cmpf oge, %18, %50 : vector<8x256xf32>
    %cst_23 = arith.constant 1.000000e+00 : f32
    %cst_24 = arith.constant 0.000000e+00 : f32
    %52 = vector.broadcast %cst_23 : f32 to vector<8x256xf32>
    %53 = vector.broadcast %cst_24 : f32 to vector<8x256xf32>
    %54 = arith.select %51, %52, %53 : vector<8x256xi1>, vector<8x256xf32>
    %cst_25 = arith.constant 0.000000e+00 : f32
    %55 = vector.broadcast %cst_25 : f32 to vector<8x256xf32>
    %56 = arith.cmpf oge, %21, %55 : vector<8x256xf32>
    %cst_26 = arith.constant 1.000000e+00 : f32
    %cst_27 = arith.constant 0.000000e+00 : f32
    %57 = vector.broadcast %cst_26 : f32 to vector<8x256xf32>
    %58 = vector.broadcast %cst_27 : f32 to vector<8x256xf32>
    %59 = arith.select %56, %57, %58 : vector<8x256xi1>, vector<8x256xf32>
    %cst_28 = arith.constant 0.000000e+00 : f32
    %60 = vector.broadcast %cst_28 : f32 to vector<8x256xf32>
    %61 = arith.cmpf oge, %24, %60 : vector<8x256xf32>
    %cst_29 = arith.constant 1.000000e+00 : f32
    %cst_30 = arith.constant 0.000000e+00 : f32
    %62 = vector.broadcast %cst_29 : f32 to vector<8x256xf32>
    %63 = vector.broadcast %cst_30 : f32 to vector<8x256xf32>
    %64 = arith.select %61, %62, %63 : vector<8x256xi1>, vector<8x256xf32>
    %cst_31 = arith.constant 0.000000e+00 : f32
    %65 = vector.broadcast %cst_31 : f32 to vector<8x256xf32>
    %66 = arith.cmpf oge, %27, %65 : vector<8x256xf32>
    %cst_32 = arith.constant 1.000000e+00 : f32
    %cst_33 = arith.constant 0.000000e+00 : f32
    %67 = vector.broadcast %cst_32 : f32 to vector<8x256xf32>
    %68 = vector.broadcast %cst_33 : f32 to vector<8x256xf32>
    %69 = arith.select %66, %67, %68 : vector<8x256xi1>, vector<8x256xf32>
    %cst_34 = arith.constant 0.000000e+00 : f32
    %70 = vector.broadcast %cst_34 : f32 to vector<8x256xf32>
    %71 = arith.cmpf oge, %30, %70 : vector<8x256xf32>
    %cst_35 = arith.constant 1.000000e+00 : f32
    %cst_36 = arith.constant 0.000000e+00 : f32
    %72 = vector.broadcast %cst_35 : f32 to vector<8x256xf32>
    %73 = vector.broadcast %cst_36 : f32 to vector<8x256xf32>
    %74 = arith.select %71, %72, %73 : vector<8x256xi1>, vector<8x256xf32>
    %cst_37 = arith.constant 0.000000e+00 : f32
    %75 = vector.broadcast %cst_37 : f32 to vector<8x256xf32>
    %76 = arith.cmpf oge, %33, %75 : vector<8x256xf32>
    %cst_38 = arith.constant 1.000000e+00 : f32
    %cst_39 = arith.constant 0.000000e+00 : f32
    %77 = vector.broadcast %cst_38 : f32 to vector<8x256xf32>
    %78 = vector.broadcast %cst_39 : f32 to vector<8x256xf32>
    %79 = arith.select %76, %77, %78 : vector<8x256xi1>, vector<8x256xf32>
    %cst_40 = arith.constant 0.000000e+00 : f32
    %80 = vector.broadcast %cst_40 : f32 to vector<8x256xf32>
    %81 = arith.cmpf oge, %36, %80 : vector<8x256xf32>
    %cst_41 = arith.constant 1.000000e+00 : f32
    %cst_42 = arith.constant 0.000000e+00 : f32
    %82 = vector.broadcast %cst_41 : f32 to vector<8x256xf32>
    %83 = vector.broadcast %cst_42 : f32 to vector<8x256xf32>
    %84 = arith.select %81, %82, %83 : vector<8x256xi1>, vector<8x256xf32>
    %cst_43 = arith.constant 0.000000e+00 : f32
    %85 = vector.broadcast %cst_43 : f32 to vector<8x256xf32>
    %86 = arith.cmpf oge, %39, %85 : vector<8x256xf32>
    %cst_44 = arith.constant 1.000000e+00 : f32
    %cst_45 = arith.constant 0.000000e+00 : f32
    %87 = vector.broadcast %cst_44 : f32 to vector<8x256xf32>
    %88 = vector.broadcast %cst_45 : f32 to vector<8x256xf32>
    %89 = arith.select %86, %87, %88 : vector<8x256xi1>, vector<8x256xf32>
    %90 = arith.subf %44, %49 : vector<8x256xf32>
    %91 = arith.subf %49, %54 : vector<8x256xf32>
    %92 = arith.subf %54, %59 : vector<8x256xf32>
    %93 = arith.subf %59, %64 : vector<8x256xf32>
    %94 = arith.subf %64, %69 : vector<8x256xf32>
    %95 = arith.subf %69, %74 : vector<8x256xf32>
    %96 = arith.subf %74, %79 : vector<8x256xf32>
    %97 = arith.subf %79, %84 : vector<8x256xf32>
    %98 = arith.subf %84, %89 : vector<8x256xf32>
    %c0_46 = arith.constant 0 : index
    %c0_47 = arith.constant 0 : index
    %99 = vector.load %arg3[%c0_46, %c0_47] : memref<8x30xf32, #tpu.memory_space<vmem>>, vector<8x1xf32>
    %100 = vector.broadcast %99 : vector<8x1xf32> to vector<8x256xf32>
    %101 = arith.mulf %12, %100 : vector<8x256xf32>
    %102 = arith.mulf %101, %90 : vector<8x256xf32>
    %c0_48 = arith.constant 0 : index
    %c0_49 = arith.constant 0 : index
    %103 = vector.load %arg4[%c0_48, %c0_49] : memref<8x30xf32, #tpu.memory_space<vmem>>, vector<8x1xf32>
    %104 = vector.broadcast %103 : vector<8x1xf32> to vector<8x256xf32>
    %105 = arith.mulf %18, %104 : vector<8x256xf32>
    %106 = arith.mulf %105, %91 : vector<8x256xf32>
    %107 = arith.addf %102, %106 : vector<8x256xf32>
    %c0_50 = arith.constant 0 : index
    %c1_51 = arith.constant 1 : index
    %108 = vector.load %arg3[%c0_50, %c1_51] : memref<8x30xf32, #tpu.memory_space<vmem>>, vector<8x1xf32>
    %109 = vector.broadcast %108 : vector<8x1xf32> to vector<8x256xf32>
    %110 = arith.mulf %15, %109 : vector<8x256xf32>
    %111 = arith.mulf %110, %91 : vector<8x256xf32>
    %c0_52 = arith.constant 0 : index
    %c1_53 = arith.constant 1 : index
    %112 = vector.load %arg4[%c0_52, %c1_53] : memref<8x30xf32, #tpu.memory_space<vmem>>, vector<8x1xf32>
    %113 = vector.broadcast %112 : vector<8x1xf32> to vector<8x256xf32>
    %114 = arith.mulf %21, %113 : vector<8x256xf32>
    %115 = arith.mulf %114, %92 : vector<8x256xf32>
    %116 = arith.addf %111, %115 : vector<8x256xf32>
    %c0_54 = arith.constant 0 : index
    %c2_55 = arith.constant 2 : index
    %117 = vector.load %arg3[%c0_54, %c2_55] : memref<8x30xf32, #tpu.memory_space<vmem>>, vector<8x1xf32>
    %118 = vector.broadcast %117 : vector<8x1xf32> to vector<8x256xf32>
    %119 = arith.mulf %18, %118 : vector<8x256xf32>
    %120 = arith.mulf %119, %92 : vector<8x256xf32>
    %c0_56 = arith.constant 0 : index
    %c2_57 = arith.constant 2 : index
    %121 = vector.load %arg4[%c0_56, %c2_57] : memref<8x30xf32, #tpu.memory_space<vmem>>, vector<8x1xf32>
    %122 = vector.broadcast %121 : vector<8x1xf32> to vector<8x256xf32>
    %123 = arith.mulf %24, %122 : vector<8x256xf32>
    %124 = arith.mulf %123, %93 : vector<8x256xf32>
    %125 = arith.addf %120, %124 : vector<8x256xf32>
    %c0_58 = arith.constant 0 : index
    %c3_59 = arith.constant 3 : index
    %126 = vector.load %arg3[%c0_58, %c3_59] : memref<8x30xf32, #tpu.memory_space<vmem>>, vector<8x1xf32>
    %127 = vector.broadcast %126 : vector<8x1xf32> to vector<8x256xf32>
    %128 = arith.mulf %21, %127 : vector<8x256xf32>
    %129 = arith.mulf %128, %93 : vector<8x256xf32>
    %c0_60 = arith.constant 0 : index
    %c3_61 = arith.constant 3 : index
    %130 = vector.load %arg4[%c0_60, %c3_61] : memref<8x30xf32, #tpu.memory_space<vmem>>, vector<8x1xf32>
    %131 = vector.broadcast %130 : vector<8x1xf32> to vector<8x256xf32>
    %132 = arith.mulf %27, %131 : vector<8x256xf32>
    %133 = arith.mulf %132, %94 : vector<8x256xf32>
    %134 = arith.addf %129, %133 : vector<8x256xf32>
    %c0_62 = arith.constant 0 : index
    %c4_63 = arith.constant 4 : index
    %135 = vector.load %arg3[%c0_62, %c4_63] : memref<8x30xf32, #tpu.memory_space<vmem>>, vector<8x1xf32>
    %136 = vector.broadcast %135 : vector<8x1xf32> to vector<8x256xf32>
    %137 = arith.mulf %24, %136 : vector<8x256xf32>
    %138 = arith.mulf %137, %94 : vector<8x256xf32>
    %c0_64 = arith.constant 0 : index
    %c4_65 = arith.constant 4 : index
    %139 = vector.load %arg4[%c0_64, %c4_65] : memref<8x30xf32, #tpu.memory_space<vmem>>, vector<8x1xf32>
    %140 = vector.broadcast %139 : vector<8x1xf32> to vector<8x256xf32>
    %141 = arith.mulf %30, %140 : vector<8x256xf32>
    %142 = arith.mulf %141, %95 : vector<8x256xf32>
    %143 = arith.addf %138, %142 : vector<8x256xf32>
    %c0_66 = arith.constant 0 : index
    %c5_67 = arith.constant 5 : index
    %144 = vector.load %arg3[%c0_66, %c5_67] : memref<8x30xf32, #tpu.memory_space<vmem>>, vector<8x1xf32>
    %145 = vector.broadcast %144 : vector<8x1xf32> to vector<8x256xf32>
    %146 = arith.mulf %27, %145 : vector<8x256xf32>
    %147 = arith.mulf %146, %95 : vector<8x256xf32>
    %c0_68 = arith.constant 0 : index
    %c5_69 = arith.constant 5 : index
    %148 = vector.load %arg4[%c0_68, %c5_69] : memref<8x30xf32, #tpu.memory_space<vmem>>, vector<8x1xf32>
    %149 = vector.broadcast %148 : vector<8x1xf32> to vector<8x256xf32>
    %150 = arith.mulf %33, %149 : vector<8x256xf32>
    %151 = arith.mulf %150, %96 : vector<8x256xf32>
    %152 = arith.addf %147, %151 : vector<8x256xf32>
    %c0_70 = arith.constant 0 : index
    %c6_71 = arith.constant 6 : index
    %153 = vector.load %arg3[%c0_70, %c6_71] : memref<8x30xf32, #tpu.memory_space<vmem>>, vector<8x1xf32>
    %154 = vector.broadcast %153 : vector<8x1xf32> to vector<8x256xf32>
    %155 = arith.mulf %30, %154 : vector<8x256xf32>
    %156 = arith.mulf %155, %96 : vector<8x256xf32>
    %c0_72 = arith.constant 0 : index
    %c6_73 = arith.constant 6 : index
    %157 = vector.load %arg4[%c0_72, %c6_73] : memref<8x30xf32, #tpu.memory_space<vmem>>, vector<8x1xf32>
    %158 = vector.broadcast %157 : vector<8x1xf32> to vector<8x256xf32>
    %159 = arith.mulf %36, %158 : vector<8x256xf32>
    %160 = arith.mulf %159, %97 : vector<8x256xf32>
    %161 = arith.addf %156, %160 : vector<8x256xf32>
    %c0_74 = arith.constant 0 : index
    %c7_75 = arith.constant 7 : index
    %162 = vector.load %arg3[%c0_74, %c7_75] : memref<8x30xf32, #tpu.memory_space<vmem>>, vector<8x1xf32>
    %163 = vector.broadcast %162 : vector<8x1xf32> to vector<8x256xf32>
    %164 = arith.mulf %33, %163 : vector<8x256xf32>
    %165 = arith.mulf %164, %97 : vector<8x256xf32>
    %c0_76 = arith.constant 0 : index
    %c7_77 = arith.constant 7 : index
    %166 = vector.load %arg4[%c0_76, %c7_77] : memref<8x30xf32, #tpu.memory_space<vmem>>, vector<8x1xf32>
    %167 = vector.broadcast %166 : vector<8x1xf32> to vector<8x256xf32>
    %168 = arith.mulf %39, %167 : vector<8x256xf32>
    %169 = arith.mulf %168, %98 : vector<8x256xf32>
    %170 = arith.addf %165, %169 : vector<8x256xf32>
    %c0_78 = arith.constant 0 : index
    %c10 = arith.constant 10 : index
    %171 = vector.load %arg3[%c0_78, %c10] : memref<8x30xf32, #tpu.memory_space<vmem>>, vector<8x1xf32>
    %172 = vector.broadcast %171 : vector<8x1xf32> to vector<8x256xf32>
    %173 = arith.mulf %12, %172 : vector<8x256xf32>
    %174 = arith.mulf %173, %107 : vector<8x256xf32>
    %c0_79 = arith.constant 0 : index
    %c10_80 = arith.constant 10 : index
    %175 = vector.load %arg4[%c0_79, %c10_80] : memref<8x30xf32, #tpu.memory_space<vmem>>, vector<8x1xf32>
    %176 = vector.broadcast %175 : vector<8x1xf32> to vector<8x256xf32>
    %177 = arith.mulf %21, %176 : vector<8x256xf32>
    %178 = arith.mulf %177, %116 : vector<8x256xf32>
    %179 = arith.addf %174, %178 : vector<8x256xf32>
    %c0_81 = arith.constant 0 : index
    %c11 = arith.constant 11 : index
    %180 = vector.load %arg3[%c0_81, %c11] : memref<8x30xf32, #tpu.memory_space<vmem>>, vector<8x1xf32>
    %181 = vector.broadcast %180 : vector<8x1xf32> to vector<8x256xf32>
    %182 = arith.mulf %15, %181 : vector<8x256xf32>
    %183 = arith.mulf %182, %116 : vector<8x256xf32>
    %c0_82 = arith.constant 0 : index
    %c11_83 = arith.constant 11 : index
    %184 = vector.load %arg4[%c0_82, %c11_83] : memref<8x30xf32, #tpu.memory_space<vmem>>, vector<8x1xf32>
    %185 = vector.broadcast %184 : vector<8x1xf32> to vector<8x256xf32>
    %186 = arith.mulf %24, %185 : vector<8x256xf32>
    %187 = arith.mulf %186, %125 : vector<8x256xf32>
    %188 = arith.addf %183, %187 : vector<8x256xf32>
    %c0_84 = arith.constant 0 : index
    %c12 = arith.constant 12 : index
    %189 = vector.load %arg3[%c0_84, %c12] : memref<8x30xf32, #tpu.memory_space<vmem>>, vector<8x1xf32>
    %190 = vector.broadcast %189 : vector<8x1xf32> to vector<8x256xf32>
    %191 = arith.mulf %18, %190 : vector<8x256xf32>
    %192 = arith.mulf %191, %125 : vector<8x256xf32>
    %c0_85 = arith.constant 0 : index
    %c12_86 = arith.constant 12 : index
    %193 = vector.load %arg4[%c0_85, %c12_86] : memref<8x30xf32, #tpu.memory_space<vmem>>, vector<8x1xf32>
    %194 = vector.broadcast %193 : vector<8x1xf32> to vector<8x256xf32>
    %195 = arith.mulf %27, %194 : vector<8x256xf32>
    %196 = arith.mulf %195, %134 : vector<8x256xf32>
    %197 = arith.addf %192, %196 : vector<8x256xf32>
    %c0_87 = arith.constant 0 : index
    %c13 = arith.constant 13 : index
    %198 = vector.load %arg3[%c0_87, %c13] : memref<8x30xf32, #tpu.memory_space<vmem>>, vector<8x1xf32>
    %199 = vector.broadcast %198 : vector<8x1xf32> to vector<8x256xf32>
    %200 = arith.mulf %21, %199 : vector<8x256xf32>
    %201 = arith.mulf %200, %134 : vector<8x256xf32>
    %c0_88 = arith.constant 0 : index
    %c13_89 = arith.constant 13 : index
    %202 = vector.load %arg4[%c0_88, %c13_89] : memref<8x30xf32, #tpu.memory_space<vmem>>, vector<8x1xf32>
    %203 = vector.broadcast %202 : vector<8x1xf32> to vector<8x256xf32>
    %204 = arith.mulf %30, %203 : vector<8x256xf32>
    %205 = arith.mulf %204, %143 : vector<8x256xf32>
    %206 = arith.addf %201, %205 : vector<8x256xf32>
    %c0_90 = arith.constant 0 : index
    %c14 = arith.constant 14 : index
    %207 = vector.load %arg3[%c0_90, %c14] : memref<8x30xf32, #tpu.memory_space<vmem>>, vector<8x1xf32>
    %208 = vector.broadcast %207 : vector<8x1xf32> to vector<8x256xf32>
    %209 = arith.mulf %24, %208 : vector<8x256xf32>
    %210 = arith.mulf %209, %143 : vector<8x256xf32>
    %c0_91 = arith.constant 0 : index
    %c14_92 = arith.constant 14 : index
    %211 = vector.load %arg4[%c0_91, %c14_92] : memref<8x30xf32, #tpu.memory_space<vmem>>, vector<8x1xf32>
    %212 = vector.broadcast %211 : vector<8x1xf32> to vector<8x256xf32>
    %213 = arith.mulf %33, %212 : vector<8x256xf32>
    %214 = arith.mulf %213, %152 : vector<8x256xf32>
    %215 = arith.addf %210, %214 : vector<8x256xf32>
    %c0_93 = arith.constant 0 : index
    %c15 = arith.constant 15 : index
    %216 = vector.load %arg3[%c0_93, %c15] : memref<8x30xf32, #tpu.memory_space<vmem>>, vector<8x1xf32>
    %217 = vector.broadcast %216 : vector<8x1xf32> to vector<8x256xf32>
    %218 = arith.mulf %27, %217 : vector<8x256xf32>
    %219 = arith.mulf %218, %152 : vector<8x256xf32>
    %c0_94 = arith.constant 0 : index
    %c15_95 = arith.constant 15 : index
    %220 = vector.load %arg4[%c0_94, %c15_95] : memref<8x30xf32, #tpu.memory_space<vmem>>, vector<8x1xf32>
    %221 = vector.broadcast %220 : vector<8x1xf32> to vector<8x256xf32>
    %222 = arith.mulf %36, %221 : vector<8x256xf32>
    %223 = arith.mulf %222, %161 : vector<8x256xf32>
    %224 = arith.addf %219, %223 : vector<8x256xf32>
    %c0_96 = arith.constant 0 : index
    %c16 = arith.constant 16 : index
    %225 = vector.load %arg3[%c0_96, %c16] : memref<8x30xf32, #tpu.memory_space<vmem>>, vector<8x1xf32>
    %226 = vector.broadcast %225 : vector<8x1xf32> to vector<8x256xf32>
    %227 = arith.mulf %30, %226 : vector<8x256xf32>
    %228 = arith.mulf %227, %161 : vector<8x256xf32>
    %c0_97 = arith.constant 0 : index
    %c16_98 = arith.constant 16 : index
    %229 = vector.load %arg4[%c0_97, %c16_98] : memref<8x30xf32, #tpu.memory_space<vmem>>, vector<8x1xf32>
    %230 = vector.broadcast %229 : vector<8x1xf32> to vector<8x256xf32>
    %231 = arith.mulf %39, %230 : vector<8x256xf32>
    %232 = arith.mulf %231, %170 : vector<8x256xf32>
    %233 = arith.addf %228, %232 : vector<8x256xf32>
    %c0_99 = arith.constant 0 : index
    %c20 = arith.constant 20 : index
    %234 = vector.load %arg3[%c0_99, %c20] : memref<8x30xf32, #tpu.memory_space<vmem>>, vector<8x1xf32>
    %235 = vector.broadcast %234 : vector<8x1xf32> to vector<8x256xf32>
    %236 = arith.mulf %12, %235 : vector<8x256xf32>
    %237 = arith.mulf %236, %179 : vector<8x256xf32>
    %c0_100 = arith.constant 0 : index
    %c20_101 = arith.constant 20 : index
    %238 = vector.load %arg4[%c0_100, %c20_101] : memref<8x30xf32, #tpu.memory_space<vmem>>, vector<8x1xf32>
    %239 = vector.broadcast %238 : vector<8x1xf32> to vector<8x256xf32>
    %240 = arith.mulf %24, %239 : vector<8x256xf32>
    %241 = arith.mulf %240, %188 : vector<8x256xf32>
    %242 = arith.addf %237, %241 : vector<8x256xf32>
    %c1_102 = arith.constant 1 : index
    %c0_103 = arith.constant 0 : index
    %c0_104 = arith.constant 0 : index
    %243 = vector.load %arg5[%c1_102, %c0_103, %c0_104] : memref<7x8x8xf32, #tpu.memory_space<vmem>>, vector<1x8x8xf32>
    %244 = vector.shape_cast %243 : vector<1x8x8xf32> to vector<8x8xf32>
    %cst_105 = arith.constant dense<0.000000e+00> : vector<8x256xf32>
    %245 = tpu.matmul %244, %242, %cst_105 {dimension_numbers = #tpu.dot_dimension_numbers<[1], [0], [0], [1], [0, 0, 1, 1], [], []>} : vector<8x8xf32>, vector<8x256xf32>, vector<8x256xf32> -> vector<8x256xf32>
    %246 = arith.addf %9, %245 : vector<8x256xf32>
    %c0_106 = arith.constant 0 : index
    %c21 = arith.constant 21 : index
    %247 = vector.load %arg3[%c0_106, %c21] : memref<8x30xf32, #tpu.memory_space<vmem>>, vector<8x1xf32>
    %248 = vector.broadcast %247 : vector<8x1xf32> to vector<8x256xf32>
    %249 = arith.mulf %15, %248 : vector<8x256xf32>
    %250 = arith.mulf %249, %188 : vector<8x256xf32>
    %c0_107 = arith.constant 0 : index
    %c21_108 = arith.constant 21 : index
    %251 = vector.load %arg4[%c0_107, %c21_108] : memref<8x30xf32, #tpu.memory_space<vmem>>, vector<8x1xf32>
    %252 = vector.broadcast %251 : vector<8x1xf32> to vector<8x256xf32>
    %253 = arith.mulf %27, %252 : vector<8x256xf32>
    %254 = arith.mulf %253, %197 : vector<8x256xf32>
    %255 = arith.addf %250, %254 : vector<8x256xf32>
    %c2_109 = arith.constant 2 : index
    %c0_110 = arith.constant 0 : index
    %c0_111 = arith.constant 0 : index
    %256 = vector.load %arg5[%c2_109, %c0_110, %c0_111] : memref<7x8x8xf32, #tpu.memory_space<vmem>>, vector<1x8x8xf32>
    %257 = vector.shape_cast %256 : vector<1x8x8xf32> to vector<8x8xf32>
    %cst_112 = arith.constant dense<0.000000e+00> : vector<8x256xf32>
    %258 = tpu.matmul %257, %255, %cst_112 {dimension_numbers = #tpu.dot_dimension_numbers<[1], [0], [0], [1], [0, 0, 1, 1], [], []>} : vector<8x8xf32>, vector<8x256xf32>, vector<8x256xf32> -> vector<8x256xf32>
    %259 = arith.addf %246, %258 : vector<8x256xf32>
    %c0_113 = arith.constant 0 : index
    %c22 = arith.constant 22 : index
    %260 = vector.load %arg3[%c0_113, %c22] : memref<8x30xf32, #tpu.memory_space<vmem>>, vector<8x1xf32>
    %261 = vector.broadcast %260 : vector<8x1xf32> to vector<8x256xf32>
    %262 = arith.mulf %18, %261 : vector<8x256xf32>
    %263 = arith.mulf %262, %197 : vector<8x256xf32>
    %c0_114 = arith.constant 0 : index
    %c22_115 = arith.constant 22 : index
    %264 = vector.load %arg4[%c0_114, %c22_115] : memref<8x30xf32, #tpu.memory_space<vmem>>, vector<8x1xf32>
    %265 = vector.broadcast %264 : vector<8x1xf32> to vector<8x256xf32>
    %266 = arith.mulf %30, %265 : vector<8x256xf32>
    %267 = arith.mulf %266, %206 : vector<8x256xf32>
    %268 = arith.addf %263, %267 : vector<8x256xf32>
    %c3_116 = arith.constant 3 : index
    %c0_117 = arith.constant 0 : index
    %c0_118 = arith.constant 0 : index
    %269 = vector.load %arg5[%c3_116, %c0_117, %c0_118] : memref<7x8x8xf32, #tpu.memory_space<vmem>>, vector<1x8x8xf32>
    %270 = vector.shape_cast %269 : vector<1x8x8xf32> to vector<8x8xf32>
    %cst_119 = arith.constant dense<0.000000e+00> : vector<8x256xf32>
    %271 = tpu.matmul %270, %268, %cst_119 {dimension_numbers = #tpu.dot_dimension_numbers<[1], [0], [0], [1], [0, 0, 1, 1], [], []>} : vector<8x8xf32>, vector<8x256xf32>, vector<8x256xf32> -> vector<8x256xf32>
    %272 = arith.addf %259, %271 : vector<8x256xf32>
    %c0_120 = arith.constant 0 : index
    %c23 = arith.constant 23 : index
    %273 = vector.load %arg3[%c0_120, %c23] : memref<8x30xf32, #tpu.memory_space<vmem>>, vector<8x1xf32>
    %274 = vector.broadcast %273 : vector<8x1xf32> to vector<8x256xf32>
    %275 = arith.mulf %21, %274 : vector<8x256xf32>
    %276 = arith.mulf %275, %206 : vector<8x256xf32>
    %c0_121 = arith.constant 0 : index
    %c23_122 = arith.constant 23 : index
    %277 = vector.load %arg4[%c0_121, %c23_122] : memref<8x30xf32, #tpu.memory_space<vmem>>, vector<8x1xf32>
    %278 = vector.broadcast %277 : vector<8x1xf32> to vector<8x256xf32>
    %279 = arith.mulf %33, %278 : vector<8x256xf32>
    %280 = arith.mulf %279, %215 : vector<8x256xf32>
    %281 = arith.addf %276, %280 : vector<8x256xf32>
    %c4_123 = arith.constant 4 : index
    %c0_124 = arith.constant 0 : index
    %c0_125 = arith.constant 0 : index
    %282 = vector.load %arg5[%c4_123, %c0_124, %c0_125] : memref<7x8x8xf32, #tpu.memory_space<vmem>>, vector<1x8x8xf32>
    %283 = vector.shape_cast %282 : vector<1x8x8xf32> to vector<8x8xf32>
    %cst_126 = arith.constant dense<0.000000e+00> : vector<8x256xf32>
    %284 = tpu.matmul %283, %281, %cst_126 {dimension_numbers = #tpu.dot_dimension_numbers<[1], [0], [0], [1], [0, 0, 1, 1], [], []>} : vector<8x8xf32>, vector<8x256xf32>, vector<8x256xf32> -> vector<8x256xf32>
    %285 = arith.addf %272, %284 : vector<8x256xf32>
    %c0_127 = arith.constant 0 : index
    %c24 = arith.constant 24 : index
    %286 = vector.load %arg3[%c0_127, %c24] : memref<8x30xf32, #tpu.memory_space<vmem>>, vector<8x1xf32>
    %287 = vector.broadcast %286 : vector<8x1xf32> to vector<8x256xf32>
    %288 = arith.mulf %24, %287 : vector<8x256xf32>
    %289 = arith.mulf %288, %215 : vector<8x256xf32>
    %c0_128 = arith.constant 0 : index
    %c24_129 = arith.constant 24 : index
    %290 = vector.load %arg4[%c0_128, %c24_129] : memref<8x30xf32, #tpu.memory_space<vmem>>, vector<8x1xf32>
    %291 = vector.broadcast %290 : vector<8x1xf32> to vector<8x256xf32>
    %292 = arith.mulf %36, %291 : vector<8x256xf32>
    %293 = arith.mulf %292, %224 : vector<8x256xf32>
    %294 = arith.addf %289, %293 : vector<8x256xf32>
    %c5_130 = arith.constant 5 : index
    %c0_131 = arith.constant 0 : index
    %c0_132 = arith.constant 0 : index
    %295 = vector.load %arg5[%c5_130, %c0_131, %c0_132] : memref<7x8x8xf32, #tpu.memory_space<vmem>>, vector<1x8x8xf32>
    %296 = vector.shape_cast %295 : vector<1x8x8xf32> to vector<8x8xf32>
    %cst_133 = arith.constant dense<0.000000e+00> : vector<8x256xf32>
    %297 = tpu.matmul %296, %294, %cst_133 {dimension_numbers = #tpu.dot_dimension_numbers<[1], [0], [0], [1], [0, 0, 1, 1], [], []>} : vector<8x8xf32>, vector<8x256xf32>, vector<8x256xf32> -> vector<8x256xf32>
    %298 = arith.addf %285, %297 : vector<8x256xf32>
    %c0_134 = arith.constant 0 : index
    %c25 = arith.constant 25 : index
    %299 = vector.load %arg3[%c0_134, %c25] : memref<8x30xf32, #tpu.memory_space<vmem>>, vector<8x1xf32>
    %300 = vector.broadcast %299 : vector<8x1xf32> to vector<8x256xf32>
    %301 = arith.mulf %27, %300 : vector<8x256xf32>
    %302 = arith.mulf %301, %224 : vector<8x256xf32>
    %c0_135 = arith.constant 0 : index
    %c25_136 = arith.constant 25 : index
    %303 = vector.load %arg4[%c0_135, %c25_136] : memref<8x30xf32, #tpu.memory_space<vmem>>, vector<8x1xf32>
    %304 = vector.broadcast %303 : vector<8x1xf32> to vector<8x256xf32>
    %305 = arith.mulf %39, %304 : vector<8x256xf32>
    %306 = arith.mulf %305, %233 : vector<8x256xf32>
    %307 = arith.addf %302, %306 : vector<8x256xf32>
    %c6_137 = arith.constant 6 : index
    %c0_138 = arith.constant 0 : index
    %c0_139 = arith.constant 0 : index
    %308 = vector.load %arg5[%c6_137, %c0_138, %c0_139] : memref<7x8x8xf32, #tpu.memory_space<vmem>>, vector<1x8x8xf32>
    %309 = vector.shape_cast %308 : vector<1x8x8xf32> to vector<8x8xf32>
    %cst_140 = arith.constant dense<0.000000e+00> : vector<8x256xf32>
    %310 = tpu.matmul %309, %307, %cst_140 {dimension_numbers = #tpu.dot_dimension_numbers<[1], [0], [0], [1], [0, 0, 1, 1], [], []>} : vector<8x8xf32>, vector<8x256xf32>, vector<8x256xf32> -> vector<8x256xf32>
    %311 = arith.addf %298, %310 : vector<8x256xf32>
    %312 = arith.negf %311 : vector<8x256xf32>
    %313 = math.exp %312 : vector<8x256xf32>
    %cst_141 = arith.constant 1.000000e+00 : f32
    %314 = vector.broadcast %cst_141 : f32 to vector<8x256xf32>
    %315 = arith.addf %314, %313 : vector<8x256xf32>
    %316 = arith.divf %314, %315 : vector<8x256xf32>
    %317 = arith.mulf %311, %316 : vector<8x256xf32>
    %c0_142 = arith.constant 0 : index
    %c0_143 = arith.constant 0 : index
    %c0_144 = arith.constant 0 : index
    %318 = vector.load %arg9[%c0_142, %c0_143, %c0_144] : memref<7x8x8xf32, #tpu.memory_space<vmem>>, vector<1x8x8xf32>
    %319 = vector.shape_cast %318 : vector<1x8x8xf32> to vector<8x8xf32>
    %cst_145 = arith.constant dense<0.000000e+00> : vector<8x256xf32>
    %320 = tpu.matmul %319, %317, %cst_145 {dimension_numbers = #tpu.dot_dimension_numbers<[1], [0], [0], [1], [0, 0, 1, 1], [], []>} : vector<8x8xf32>, vector<8x256xf32>, vector<8x256xf32> -> vector<8x256xf32>
    %c0_146 = arith.constant 0 : index
    %c0_147 = arith.constant 0 : index
    %321 = vector.load %arg6[%c0_146, %c0_147] : memref<8x10xf32, #tpu.memory_space<vmem>>, vector<8x1xf32>
    %322 = vector.broadcast %321 : vector<8x1xf32> to vector<8x256xf32>
    %323 = arith.subf %311, %322 : vector<8x256xf32>
    %c0_148 = arith.constant 0 : index
    %c1_149 = arith.constant 1 : index
    %324 = vector.load %arg6[%c0_148, %c1_149] : memref<8x10xf32, #tpu.memory_space<vmem>>, vector<8x1xf32>
    %325 = vector.broadcast %324 : vector<8x1xf32> to vector<8x256xf32>
    %326 = arith.subf %311, %325 : vector<8x256xf32>
    %c0_150 = arith.constant 0 : index
    %c2_151 = arith.constant 2 : index
    %327 = vector.load %arg6[%c0_150, %c2_151] : memref<8x10xf32, #tpu.memory_space<vmem>>, vector<8x1xf32>
    %328 = vector.broadcast %327 : vector<8x1xf32> to vector<8x256xf32>
    %329 = arith.subf %311, %328 : vector<8x256xf32>
    %c0_152 = arith.constant 0 : index
    %c3_153 = arith.constant 3 : index
    %330 = vector.load %arg6[%c0_152, %c3_153] : memref<8x10xf32, #tpu.memory_space<vmem>>, vector<8x1xf32>
    %331 = vector.broadcast %330 : vector<8x1xf32> to vector<8x256xf32>
    %332 = arith.subf %311, %331 : vector<8x256xf32>
    %c0_154 = arith.constant 0 : index
    %c4_155 = arith.constant 4 : index
    %333 = vector.load %arg6[%c0_154, %c4_155] : memref<8x10xf32, #tpu.memory_space<vmem>>, vector<8x1xf32>
    %334 = vector.broadcast %333 : vector<8x1xf32> to vector<8x256xf32>
    %335 = arith.subf %311, %334 : vector<8x256xf32>
    %c0_156 = arith.constant 0 : index
    %c5_157 = arith.constant 5 : index
    %336 = vector.load %arg6[%c0_156, %c5_157] : memref<8x10xf32, #tpu.memory_space<vmem>>, vector<8x1xf32>
    %337 = vector.broadcast %336 : vector<8x1xf32> to vector<8x256xf32>
    %338 = arith.subf %311, %337 : vector<8x256xf32>
    %c0_158 = arith.constant 0 : index
    %c6_159 = arith.constant 6 : index
    %339 = vector.load %arg6[%c0_158, %c6_159] : memref<8x10xf32, #tpu.memory_space<vmem>>, vector<8x1xf32>
    %340 = vector.broadcast %339 : vector<8x1xf32> to vector<8x256xf32>
    %341 = arith.subf %311, %340 : vector<8x256xf32>
    %c0_160 = arith.constant 0 : index
    %c7_161 = arith.constant 7 : index
    %342 = vector.load %arg6[%c0_160, %c7_161] : memref<8x10xf32, #tpu.memory_space<vmem>>, vector<8x1xf32>
    %343 = vector.broadcast %342 : vector<8x1xf32> to vector<8x256xf32>
    %344 = arith.subf %311, %343 : vector<8x256xf32>
    %c0_162 = arith.constant 0 : index
    %c8_163 = arith.constant 8 : index
    %345 = vector.load %arg6[%c0_162, %c8_163] : memref<8x10xf32, #tpu.memory_space<vmem>>, vector<8x1xf32>
    %346 = vector.broadcast %345 : vector<8x1xf32> to vector<8x256xf32>
    %347 = arith.subf %311, %346 : vector<8x256xf32>
    %c0_164 = arith.constant 0 : index
    %c9_165 = arith.constant 9 : index
    %348 = vector.load %arg6[%c0_164, %c9_165] : memref<8x10xf32, #tpu.memory_space<vmem>>, vector<8x1xf32>
    %349 = vector.broadcast %348 : vector<8x1xf32> to vector<8x256xf32>
    %350 = arith.subf %311, %349 : vector<8x256xf32>
    %cst_166 = arith.constant 0.000000e+00 : f32
    %351 = vector.broadcast %cst_166 : f32 to vector<8x256xf32>
    %352 = arith.cmpf oge, %323, %351 : vector<8x256xf32>
    %cst_167 = arith.constant 1.000000e+00 : f32
    %cst_168 = arith.constant 0.000000e+00 : f32
    %353 = vector.broadcast %cst_167 : f32 to vector<8x256xf32>
    %354 = vector.broadcast %cst_168 : f32 to vector<8x256xf32>
    %355 = arith.select %352, %353, %354 : vector<8x256xi1>, vector<8x256xf32>
    %cst_169 = arith.constant 0.000000e+00 : f32
    %356 = vector.broadcast %cst_169 : f32 to vector<8x256xf32>
    %357 = arith.cmpf oge, %326, %356 : vector<8x256xf32>
    %cst_170 = arith.constant 1.000000e+00 : f32
    %cst_171 = arith.constant 0.000000e+00 : f32
    %358 = vector.broadcast %cst_170 : f32 to vector<8x256xf32>
    %359 = vector.broadcast %cst_171 : f32 to vector<8x256xf32>
    %360 = arith.select %357, %358, %359 : vector<8x256xi1>, vector<8x256xf32>
    %cst_172 = arith.constant 0.000000e+00 : f32
    %361 = vector.broadcast %cst_172 : f32 to vector<8x256xf32>
    %362 = arith.cmpf oge, %329, %361 : vector<8x256xf32>
    %cst_173 = arith.constant 1.000000e+00 : f32
    %cst_174 = arith.constant 0.000000e+00 : f32
    %363 = vector.broadcast %cst_173 : f32 to vector<8x256xf32>
    %364 = vector.broadcast %cst_174 : f32 to vector<8x256xf32>
    %365 = arith.select %362, %363, %364 : vector<8x256xi1>, vector<8x256xf32>
    %cst_175 = arith.constant 0.000000e+00 : f32
    %366 = vector.broadcast %cst_175 : f32 to vector<8x256xf32>
    %367 = arith.cmpf oge, %332, %366 : vector<8x256xf32>
    %cst_176 = arith.constant 1.000000e+00 : f32
    %cst_177 = arith.constant 0.000000e+00 : f32
    %368 = vector.broadcast %cst_176 : f32 to vector<8x256xf32>
    %369 = vector.broadcast %cst_177 : f32 to vector<8x256xf32>
    %370 = arith.select %367, %368, %369 : vector<8x256xi1>, vector<8x256xf32>
    %cst_178 = arith.constant 0.000000e+00 : f32
    %371 = vector.broadcast %cst_178 : f32 to vector<8x256xf32>
    %372 = arith.cmpf oge, %335, %371 : vector<8x256xf32>
    %cst_179 = arith.constant 1.000000e+00 : f32
    %cst_180 = arith.constant 0.000000e+00 : f32
    %373 = vector.broadcast %cst_179 : f32 to vector<8x256xf32>
    %374 = vector.broadcast %cst_180 : f32 to vector<8x256xf32>
    %375 = arith.select %372, %373, %374 : vector<8x256xi1>, vector<8x256xf32>
    %cst_181 = arith.constant 0.000000e+00 : f32
    %376 = vector.broadcast %cst_181 : f32 to vector<8x256xf32>
    %377 = arith.cmpf oge, %338, %376 : vector<8x256xf32>
    %cst_182 = arith.constant 1.000000e+00 : f32
    %cst_183 = arith.constant 0.000000e+00 : f32
    %378 = vector.broadcast %cst_182 : f32 to vector<8x256xf32>
    %379 = vector.broadcast %cst_183 : f32 to vector<8x256xf32>
    %380 = arith.select %377, %378, %379 : vector<8x256xi1>, vector<8x256xf32>
    %cst_184 = arith.constant 0.000000e+00 : f32
    %381 = vector.broadcast %cst_184 : f32 to vector<8x256xf32>
    %382 = arith.cmpf oge, %341, %381 : vector<8x256xf32>
    %cst_185 = arith.constant 1.000000e+00 : f32
    %cst_186 = arith.constant 0.000000e+00 : f32
    %383 = vector.broadcast %cst_185 : f32 to vector<8x256xf32>
    %384 = vector.broadcast %cst_186 : f32 to vector<8x256xf32>
    %385 = arith.select %382, %383, %384 : vector<8x256xi1>, vector<8x256xf32>
    %cst_187 = arith.constant 0.000000e+00 : f32
    %386 = vector.broadcast %cst_187 : f32 to vector<8x256xf32>
    %387 = arith.cmpf oge, %344, %386 : vector<8x256xf32>
    %cst_188 = arith.constant 1.000000e+00 : f32
    %cst_189 = arith.constant 0.000000e+00 : f32
    %388 = vector.broadcast %cst_188 : f32 to vector<8x256xf32>
    %389 = vector.broadcast %cst_189 : f32 to vector<8x256xf32>
    %390 = arith.select %387, %388, %389 : vector<8x256xi1>, vector<8x256xf32>
    %cst_190 = arith.constant 0.000000e+00 : f32
    %391 = vector.broadcast %cst_190 : f32 to vector<8x256xf32>
    %392 = arith.cmpf oge, %347, %391 : vector<8x256xf32>
    %cst_191 = arith.constant 1.000000e+00 : f32
    %cst_192 = arith.constant 0.000000e+00 : f32
    %393 = vector.broadcast %cst_191 : f32 to vector<8x256xf32>
    %394 = vector.broadcast %cst_192 : f32 to vector<8x256xf32>
    %395 = arith.select %392, %393, %394 : vector<8x256xi1>, vector<8x256xf32>
    %cst_193 = arith.constant 0.000000e+00 : f32
    %396 = vector.broadcast %cst_193 : f32 to vector<8x256xf32>
    %397 = arith.cmpf oge, %350, %396 : vector<8x256xf32>
    %cst_194 = arith.constant 1.000000e+00 : f32
    %cst_195 = arith.constant 0.000000e+00 : f32
    %398 = vector.broadcast %cst_194 : f32 to vector<8x256xf32>
    %399 = vector.broadcast %cst_195 : f32 to vector<8x256xf32>
    %400 = arith.select %397, %398, %399 : vector<8x256xi1>, vector<8x256xf32>
    %401 = arith.subf %355, %360 : vector<8x256xf32>
    %402 = arith.subf %360, %365 : vector<8x256xf32>
    %403 = arith.subf %365, %370 : vector<8x256xf32>
    %404 = arith.subf %370, %375 : vector<8x256xf32>
    %405 = arith.subf %375, %380 : vector<8x256xf32>
    %406 = arith.subf %380, %385 : vector<8x256xf32>
    %407 = arith.subf %385, %390 : vector<8x256xf32>
    %408 = arith.subf %390, %395 : vector<8x256xf32>
    %409 = arith.subf %395, %400 : vector<8x256xf32>
    %c0_196 = arith.constant 0 : index
    %c0_197 = arith.constant 0 : index
    %410 = vector.load %arg7[%c0_196, %c0_197] : memref<8x30xf32, #tpu.memory_space<vmem>>, vector<8x1xf32>
    %411 = vector.broadcast %410 : vector<8x1xf32> to vector<8x256xf32>
    %412 = arith.mulf %323, %411 : vector<8x256xf32>
    %413 = arith.mulf %412, %401 : vector<8x256xf32>
    %c0_198 = arith.constant 0 : index
    %c0_199 = arith.constant 0 : index
    %414 = vector.load %arg8[%c0_198, %c0_199] : memref<8x30xf32, #tpu.memory_space<vmem>>, vector<8x1xf32>
    %415 = vector.broadcast %414 : vector<8x1xf32> to vector<8x256xf32>
    %416 = arith.mulf %329, %415 : vector<8x256xf32>
    %417 = arith.mulf %416, %402 : vector<8x256xf32>
    %418 = arith.addf %413, %417 : vector<8x256xf32>
    %c0_200 = arith.constant 0 : index
    %c1_201 = arith.constant 1 : index
    %419 = vector.load %arg7[%c0_200, %c1_201] : memref<8x30xf32, #tpu.memory_space<vmem>>, vector<8x1xf32>
    %420 = vector.broadcast %419 : vector<8x1xf32> to vector<8x256xf32>
    %421 = arith.mulf %326, %420 : vector<8x256xf32>
    %422 = arith.mulf %421, %402 : vector<8x256xf32>
    %c0_202 = arith.constant 0 : index
    %c1_203 = arith.constant 1 : index
    %423 = vector.load %arg8[%c0_202, %c1_203] : memref<8x30xf32, #tpu.memory_space<vmem>>, vector<8x1xf32>
    %424 = vector.broadcast %423 : vector<8x1xf32> to vector<8x256xf32>
    %425 = arith.mulf %332, %424 : vector<8x256xf32>
    %426 = arith.mulf %425, %403 : vector<8x256xf32>
    %427 = arith.addf %422, %426 : vector<8x256xf32>
    %c0_204 = arith.constant 0 : index
    %c2_205 = arith.constant 2 : index
    %428 = vector.load %arg7[%c0_204, %c2_205] : memref<8x30xf32, #tpu.memory_space<vmem>>, vector<8x1xf32>
    %429 = vector.broadcast %428 : vector<8x1xf32> to vector<8x256xf32>
    %430 = arith.mulf %329, %429 : vector<8x256xf32>
    %431 = arith.mulf %430, %403 : vector<8x256xf32>
    %c0_206 = arith.constant 0 : index
    %c2_207 = arith.constant 2 : index
    %432 = vector.load %arg8[%c0_206, %c2_207] : memref<8x30xf32, #tpu.memory_space<vmem>>, vector<8x1xf32>
    %433 = vector.broadcast %432 : vector<8x1xf32> to vector<8x256xf32>
    %434 = arith.mulf %335, %433 : vector<8x256xf32>
    %435 = arith.mulf %434, %404 : vector<8x256xf32>
    %436 = arith.addf %431, %435 : vector<8x256xf32>
    %c0_208 = arith.constant 0 : index
    %c3_209 = arith.constant 3 : index
    %437 = vector.load %arg7[%c0_208, %c3_209] : memref<8x30xf32, #tpu.memory_space<vmem>>, vector<8x1xf32>
    %438 = vector.broadcast %437 : vector<8x1xf32> to vector<8x256xf32>
    %439 = arith.mulf %332, %438 : vector<8x256xf32>
    %440 = arith.mulf %439, %404 : vector<8x256xf32>
    %c0_210 = arith.constant 0 : index
    %c3_211 = arith.constant 3 : index
    %441 = vector.load %arg8[%c0_210, %c3_211] : memref<8x30xf32, #tpu.memory_space<vmem>>, vector<8x1xf32>
    %442 = vector.broadcast %441 : vector<8x1xf32> to vector<8x256xf32>
    %443 = arith.mulf %338, %442 : vector<8x256xf32>
    %444 = arith.mulf %443, %405 : vector<8x256xf32>
    %445 = arith.addf %440, %444 : vector<8x256xf32>
    %c0_212 = arith.constant 0 : index
    %c4_213 = arith.constant 4 : index
    %446 = vector.load %arg7[%c0_212, %c4_213] : memref<8x30xf32, #tpu.memory_space<vmem>>, vector<8x1xf32>
    %447 = vector.broadcast %446 : vector<8x1xf32> to vector<8x256xf32>
    %448 = arith.mulf %335, %447 : vector<8x256xf32>
    %449 = arith.mulf %448, %405 : vector<8x256xf32>
    %c0_214 = arith.constant 0 : index
    %c4_215 = arith.constant 4 : index
    %450 = vector.load %arg8[%c0_214, %c4_215] : memref<8x30xf32, #tpu.memory_space<vmem>>, vector<8x1xf32>
    %451 = vector.broadcast %450 : vector<8x1xf32> to vector<8x256xf32>
    %452 = arith.mulf %341, %451 : vector<8x256xf32>
    %453 = arith.mulf %452, %406 : vector<8x256xf32>
    %454 = arith.addf %449, %453 : vector<8x256xf32>
    %c0_216 = arith.constant 0 : index
    %c5_217 = arith.constant 5 : index
    %455 = vector.load %arg7[%c0_216, %c5_217] : memref<8x30xf32, #tpu.memory_space<vmem>>, vector<8x1xf32>
    %456 = vector.broadcast %455 : vector<8x1xf32> to vector<8x256xf32>
    %457 = arith.mulf %338, %456 : vector<8x256xf32>
    %458 = arith.mulf %457, %406 : vector<8x256xf32>
    %c0_218 = arith.constant 0 : index
    %c5_219 = arith.constant 5 : index
    %459 = vector.load %arg8[%c0_218, %c5_219] : memref<8x30xf32, #tpu.memory_space<vmem>>, vector<8x1xf32>
    %460 = vector.broadcast %459 : vector<8x1xf32> to vector<8x256xf32>
    %461 = arith.mulf %344, %460 : vector<8x256xf32>
    %462 = arith.mulf %461, %407 : vector<8x256xf32>
    %463 = arith.addf %458, %462 : vector<8x256xf32>
    %c0_220 = arith.constant 0 : index
    %c6_221 = arith.constant 6 : index
    %464 = vector.load %arg7[%c0_220, %c6_221] : memref<8x30xf32, #tpu.memory_space<vmem>>, vector<8x1xf32>
    %465 = vector.broadcast %464 : vector<8x1xf32> to vector<8x256xf32>
    %466 = arith.mulf %341, %465 : vector<8x256xf32>
    %467 = arith.mulf %466, %407 : vector<8x256xf32>
    %c0_222 = arith.constant 0 : index
    %c6_223 = arith.constant 6 : index
    %468 = vector.load %arg8[%c0_222, %c6_223] : memref<8x30xf32, #tpu.memory_space<vmem>>, vector<8x1xf32>
    %469 = vector.broadcast %468 : vector<8x1xf32> to vector<8x256xf32>
    %470 = arith.mulf %347, %469 : vector<8x256xf32>
    %471 = arith.mulf %470, %408 : vector<8x256xf32>
    %472 = arith.addf %467, %471 : vector<8x256xf32>
    %c0_224 = arith.constant 0 : index
    %c7_225 = arith.constant 7 : index
    %473 = vector.load %arg7[%c0_224, %c7_225] : memref<8x30xf32, #tpu.memory_space<vmem>>, vector<8x1xf32>
    %474 = vector.broadcast %473 : vector<8x1xf32> to vector<8x256xf32>
    %475 = arith.mulf %344, %474 : vector<8x256xf32>
    %476 = arith.mulf %475, %408 : vector<8x256xf32>
    %c0_226 = arith.constant 0 : index
    %c7_227 = arith.constant 7 : index
    %477 = vector.load %arg8[%c0_226, %c7_227] : memref<8x30xf32, #tpu.memory_space<vmem>>, vector<8x1xf32>
    %478 = vector.broadcast %477 : vector<8x1xf32> to vector<8x256xf32>
    %479 = arith.mulf %350, %478 : vector<8x256xf32>
    %480 = arith.mulf %479, %409 : vector<8x256xf32>
    %481 = arith.addf %476, %480 : vector<8x256xf32>
    %c0_228 = arith.constant 0 : index
    %c10_229 = arith.constant 10 : index
    %482 = vector.load %arg7[%c0_228, %c10_229] : memref<8x30xf32, #tpu.memory_space<vmem>>, vector<8x1xf32>
    %483 = vector.broadcast %482 : vector<8x1xf32> to vector<8x256xf32>
    %484 = arith.mulf %323, %483 : vector<8x256xf32>
    %485 = arith.mulf %484, %418 : vector<8x256xf32>
    %c0_230 = arith.constant 0 : index
    %c10_231 = arith.constant 10 : index
    %486 = vector.load %arg8[%c0_230, %c10_231] : memref<8x30xf32, #tpu.memory_space<vmem>>, vector<8x1xf32>
    %487 = vector.broadcast %486 : vector<8x1xf32> to vector<8x256xf32>
    %488 = arith.mulf %332, %487 : vector<8x256xf32>
    %489 = arith.mulf %488, %427 : vector<8x256xf32>
    %490 = arith.addf %485, %489 : vector<8x256xf32>
    %c0_232 = arith.constant 0 : index
    %c11_233 = arith.constant 11 : index
    %491 = vector.load %arg7[%c0_232, %c11_233] : memref<8x30xf32, #tpu.memory_space<vmem>>, vector<8x1xf32>
    %492 = vector.broadcast %491 : vector<8x1xf32> to vector<8x256xf32>
    %493 = arith.mulf %326, %492 : vector<8x256xf32>
    %494 = arith.mulf %493, %427 : vector<8x256xf32>
    %c0_234 = arith.constant 0 : index
    %c11_235 = arith.constant 11 : index
    %495 = vector.load %arg8[%c0_234, %c11_235] : memref<8x30xf32, #tpu.memory_space<vmem>>, vector<8x1xf32>
    %496 = vector.broadcast %495 : vector<8x1xf32> to vector<8x256xf32>
    %497 = arith.mulf %335, %496 : vector<8x256xf32>
    %498 = arith.mulf %497, %436 : vector<8x256xf32>
    %499 = arith.addf %494, %498 : vector<8x256xf32>
    %c0_236 = arith.constant 0 : index
    %c12_237 = arith.constant 12 : index
    %500 = vector.load %arg7[%c0_236, %c12_237] : memref<8x30xf32, #tpu.memory_space<vmem>>, vector<8x1xf32>
    %501 = vector.broadcast %500 : vector<8x1xf32> to vector<8x256xf32>
    %502 = arith.mulf %329, %501 : vector<8x256xf32>
    %503 = arith.mulf %502, %436 : vector<8x256xf32>
    %c0_238 = arith.constant 0 : index
    %c12_239 = arith.constant 12 : index
    %504 = vector.load %arg8[%c0_238, %c12_239] : memref<8x30xf32, #tpu.memory_space<vmem>>, vector<8x1xf32>
    %505 = vector.broadcast %504 : vector<8x1xf32> to vector<8x256xf32>
    %506 = arith.mulf %338, %505 : vector<8x256xf32>
    %507 = arith.mulf %506, %445 : vector<8x256xf32>
    %508 = arith.addf %503, %507 : vector<8x256xf32>
    %c0_240 = arith.constant 0 : index
    %c13_241 = arith.constant 13 : index
    %509 = vector.load %arg7[%c0_240, %c13_241] : memref<8x30xf32, #tpu.memory_space<vmem>>, vector<8x1xf32>
    %510 = vector.broadcast %509 : vector<8x1xf32> to vector<8x256xf32>
    %511 = arith.mulf %332, %510 : vector<8x256xf32>
    %512 = arith.mulf %511, %445 : vector<8x256xf32>
    %c0_242 = arith.constant 0 : index
    %c13_243 = arith.constant 13 : index
    %513 = vector.load %arg8[%c0_242, %c13_243] : memref<8x30xf32, #tpu.memory_space<vmem>>, vector<8x1xf32>
    %514 = vector.broadcast %513 : vector<8x1xf32> to vector<8x256xf32>
    %515 = arith.mulf %341, %514 : vector<8x256xf32>
    %516 = arith.mulf %515, %454 : vector<8x256xf32>
    %517 = arith.addf %512, %516 : vector<8x256xf32>
    %c0_244 = arith.constant 0 : index
    %c14_245 = arith.constant 14 : index
    %518 = vector.load %arg7[%c0_244, %c14_245] : memref<8x30xf32, #tpu.memory_space<vmem>>, vector<8x1xf32>
    %519 = vector.broadcast %518 : vector<8x1xf32> to vector<8x256xf32>
    %520 = arith.mulf %335, %519 : vector<8x256xf32>
    %521 = arith.mulf %520, %454 : vector<8x256xf32>
    %c0_246 = arith.constant 0 : index
    %c14_247 = arith.constant 14 : index
    %522 = vector.load %arg8[%c0_246, %c14_247] : memref<8x30xf32, #tpu.memory_space<vmem>>, vector<8x1xf32>
    %523 = vector.broadcast %522 : vector<8x1xf32> to vector<8x256xf32>
    %524 = arith.mulf %344, %523 : vector<8x256xf32>
    %525 = arith.mulf %524, %463 : vector<8x256xf32>
    %526 = arith.addf %521, %525 : vector<8x256xf32>
    %c0_248 = arith.constant 0 : index
    %c15_249 = arith.constant 15 : index
    %527 = vector.load %arg7[%c0_248, %c15_249] : memref<8x30xf32, #tpu.memory_space<vmem>>, vector<8x1xf32>
    %528 = vector.broadcast %527 : vector<8x1xf32> to vector<8x256xf32>
    %529 = arith.mulf %338, %528 : vector<8x256xf32>
    %530 = arith.mulf %529, %463 : vector<8x256xf32>
    %c0_250 = arith.constant 0 : index
    %c15_251 = arith.constant 15 : index
    %531 = vector.load %arg8[%c0_250, %c15_251] : memref<8x30xf32, #tpu.memory_space<vmem>>, vector<8x1xf32>
    %532 = vector.broadcast %531 : vector<8x1xf32> to vector<8x256xf32>
    %533 = arith.mulf %347, %532 : vector<8x256xf32>
    %534 = arith.mulf %533, %472 : vector<8x256xf32>
    %535 = arith.addf %530, %534 : vector<8x256xf32>
    %c0_252 = arith.constant 0 : index
    %c16_253 = arith.constant 16 : index
    %536 = vector.load %arg7[%c0_252, %c16_253] : memref<8x30xf32, #tpu.memory_space<vmem>>, vector<8x1xf32>
    %537 = vector.broadcast %536 : vector<8x1xf32> to vector<8x256xf32>
    %538 = arith.mulf %341, %537 : vector<8x256xf32>
    %539 = arith.mulf %538, %472 : vector<8x256xf32>
    %c0_254 = arith.constant 0 : index
    %c16_255 = arith.constant 16 : index
    %540 = vector.load %arg8[%c0_254, %c16_255] : memref<8x30xf32, #tpu.memory_space<vmem>>, vector<8x1xf32>
    %541 = vector.broadcast %540 : vector<8x1xf32> to vector<8x256xf32>
    %542 = arith.mulf %350, %541 : vector<8x256xf32>
    %543 = arith.mulf %542, %481 : vector<8x256xf32>
    %544 = arith.addf %539, %543 : vector<8x256xf32>
    %c0_256 = arith.constant 0 : index
    %c20_257 = arith.constant 20 : index
    %545 = vector.load %arg7[%c0_256, %c20_257] : memref<8x30xf32, #tpu.memory_space<vmem>>, vector<8x1xf32>
    %546 = vector.broadcast %545 : vector<8x1xf32> to vector<8x256xf32>
    %547 = arith.mulf %323, %546 : vector<8x256xf32>
    %548 = arith.mulf %547, %490 : vector<8x256xf32>
    %c0_258 = arith.constant 0 : index
    %c20_259 = arith.constant 20 : index
    %549 = vector.load %arg8[%c0_258, %c20_259] : memref<8x30xf32, #tpu.memory_space<vmem>>, vector<8x1xf32>
    %550 = vector.broadcast %549 : vector<8x1xf32> to vector<8x256xf32>
    %551 = arith.mulf %335, %550 : vector<8x256xf32>
    %552 = arith.mulf %551, %499 : vector<8x256xf32>
    %553 = arith.addf %548, %552 : vector<8x256xf32>
    %c1_260 = arith.constant 1 : index
    %c0_261 = arith.constant 0 : index
    %c0_262 = arith.constant 0 : index
    %554 = vector.load %arg9[%c1_260, %c0_261, %c0_262] : memref<7x8x8xf32, #tpu.memory_space<vmem>>, vector<1x8x8xf32>
    %555 = vector.shape_cast %554 : vector<1x8x8xf32> to vector<8x8xf32>
    %cst_263 = arith.constant dense<0.000000e+00> : vector<8x256xf32>
    %556 = tpu.matmul %555, %553, %cst_263 {dimension_numbers = #tpu.dot_dimension_numbers<[1], [0], [0], [1], [0, 0, 1, 1], [], []>} : vector<8x8xf32>, vector<8x256xf32>, vector<8x256xf32> -> vector<8x256xf32>
    %557 = arith.addf %320, %556 : vector<8x256xf32>
    %c0_264 = arith.constant 0 : index
    %c21_265 = arith.constant 21 : index
    %558 = vector.load %arg7[%c0_264, %c21_265] : memref<8x30xf32, #tpu.memory_space<vmem>>, vector<8x1xf32>
    %559 = vector.broadcast %558 : vector<8x1xf32> to vector<8x256xf32>
    %560 = arith.mulf %326, %559 : vector<8x256xf32>
    %561 = arith.mulf %560, %499 : vector<8x256xf32>
    %c0_266 = arith.constant 0 : index
    %c21_267 = arith.constant 21 : index
    %562 = vector.load %arg8[%c0_266, %c21_267] : memref<8x30xf32, #tpu.memory_space<vmem>>, vector<8x1xf32>
    %563 = vector.broadcast %562 : vector<8x1xf32> to vector<8x256xf32>
    %564 = arith.mulf %338, %563 : vector<8x256xf32>
    %565 = arith.mulf %564, %508 : vector<8x256xf32>
    %566 = arith.addf %561, %565 : vector<8x256xf32>
    %c2_268 = arith.constant 2 : index
    %c0_269 = arith.constant 0 : index
    %c0_270 = arith.constant 0 : index
    %567 = vector.load %arg9[%c2_268, %c0_269, %c0_270] : memref<7x8x8xf32, #tpu.memory_space<vmem>>, vector<1x8x8xf32>
    %568 = vector.shape_cast %567 : vector<1x8x8xf32> to vector<8x8xf32>
    %cst_271 = arith.constant dense<0.000000e+00> : vector<8x256xf32>
    %569 = tpu.matmul %568, %566, %cst_271 {dimension_numbers = #tpu.dot_dimension_numbers<[1], [0], [0], [1], [0, 0, 1, 1], [], []>} : vector<8x8xf32>, vector<8x256xf32>, vector<8x256xf32> -> vector<8x256xf32>
    %570 = arith.addf %557, %569 : vector<8x256xf32>
    %c0_272 = arith.constant 0 : index
    %c22_273 = arith.constant 22 : index
    %571 = vector.load %arg7[%c0_272, %c22_273] : memref<8x30xf32, #tpu.memory_space<vmem>>, vector<8x1xf32>
    %572 = vector.broadcast %571 : vector<8x1xf32> to vector<8x256xf32>
    %573 = arith.mulf %329, %572 : vector<8x256xf32>
    %574 = arith.mulf %573, %508 : vector<8x256xf32>
    %c0_274 = arith.constant 0 : index
    %c22_275 = arith.constant 22 : index
    %575 = vector.load %arg8[%c0_274, %c22_275] : memref<8x30xf32, #tpu.memory_space<vmem>>, vector<8x1xf32>
    %576 = vector.broadcast %575 : vector<8x1xf32> to vector<8x256xf32>
    %577 = arith.mulf %341, %576 : vector<8x256xf32>
    %578 = arith.mulf %577, %517 : vector<8x256xf32>
    %579 = arith.addf %574, %578 : vector<8x256xf32>
    %c3_276 = arith.constant 3 : index
    %c0_277 = arith.constant 0 : index
    %c0_278 = arith.constant 0 : index
    %580 = vector.load %arg9[%c3_276, %c0_277, %c0_278] : memref<7x8x8xf32, #tpu.memory_space<vmem>>, vector<1x8x8xf32>
    %581 = vector.shape_cast %580 : vector<1x8x8xf32> to vector<8x8xf32>
    %cst_279 = arith.constant dense<0.000000e+00> : vector<8x256xf32>
    %582 = tpu.matmul %581, %579, %cst_279 {dimension_numbers = #tpu.dot_dimension_numbers<[1], [0], [0], [1], [0, 0, 1, 1], [], []>} : vector<8x8xf32>, vector<8x256xf32>, vector<8x256xf32> -> vector<8x256xf32>
    %583 = arith.addf %570, %582 : vector<8x256xf32>
    %c0_280 = arith.constant 0 : index
    %c23_281 = arith.constant 23 : index
    %584 = vector.load %arg7[%c0_280, %c23_281] : memref<8x30xf32, #tpu.memory_space<vmem>>, vector<8x1xf32>
    %585 = vector.broadcast %584 : vector<8x1xf32> to vector<8x256xf32>
    %586 = arith.mulf %332, %585 : vector<8x256xf32>
    %587 = arith.mulf %586, %517 : vector<8x256xf32>
    %c0_282 = arith.constant 0 : index
    %c23_283 = arith.constant 23 : index
    %588 = vector.load %arg8[%c0_282, %c23_283] : memref<8x30xf32, #tpu.memory_space<vmem>>, vector<8x1xf32>
    %589 = vector.broadcast %588 : vector<8x1xf32> to vector<8x256xf32>
    %590 = arith.mulf %344, %589 : vector<8x256xf32>
    %591 = arith.mulf %590, %526 : vector<8x256xf32>
    %592 = arith.addf %587, %591 : vector<8x256xf32>
    %c4_284 = arith.constant 4 : index
    %c0_285 = arith.constant 0 : index
    %c0_286 = arith.constant 0 : index
    %593 = vector.load %arg9[%c4_284, %c0_285, %c0_286] : memref<7x8x8xf32, #tpu.memory_space<vmem>>, vector<1x8x8xf32>
    %594 = vector.shape_cast %593 : vector<1x8x8xf32> to vector<8x8xf32>
    %cst_287 = arith.constant dense<0.000000e+00> : vector<8x256xf32>
    %595 = tpu.matmul %594, %592, %cst_287 {dimension_numbers = #tpu.dot_dimension_numbers<[1], [0], [0], [1], [0, 0, 1, 1], [], []>} : vector<8x8xf32>, vector<8x256xf32>, vector<8x256xf32> -> vector<8x256xf32>
    %596 = arith.addf %583, %595 : vector<8x256xf32>
    %c0_288 = arith.constant 0 : index
    %c24_289 = arith.constant 24 : index
    %597 = vector.load %arg7[%c0_288, %c24_289] : memref<8x30xf32, #tpu.memory_space<vmem>>, vector<8x1xf32>
    %598 = vector.broadcast %597 : vector<8x1xf32> to vector<8x256xf32>
    %599 = arith.mulf %335, %598 : vector<8x256xf32>
    %600 = arith.mulf %599, %526 : vector<8x256xf32>
    %c0_290 = arith.constant 0 : index
    %c24_291 = arith.constant 24 : index
    %601 = vector.load %arg8[%c0_290, %c24_291] : memref<8x30xf32, #tpu.memory_space<vmem>>, vector<8x1xf32>
    %602 = vector.broadcast %601 : vector<8x1xf32> to vector<8x256xf32>
    %603 = arith.mulf %347, %602 : vector<8x256xf32>
    %604 = arith.mulf %603, %535 : vector<8x256xf32>
    %605 = arith.addf %600, %604 : vector<8x256xf32>
    %c5_292 = arith.constant 5 : index
    %c0_293 = arith.constant 0 : index
    %c0_294 = arith.constant 0 : index
    %606 = vector.load %arg9[%c5_292, %c0_293, %c0_294] : memref<7x8x8xf32, #tpu.memory_space<vmem>>, vector<1x8x8xf32>
    %607 = vector.shape_cast %606 : vector<1x8x8xf32> to vector<8x8xf32>
    %cst_295 = arith.constant dense<0.000000e+00> : vector<8x256xf32>
    %608 = tpu.matmul %607, %605, %cst_295 {dimension_numbers = #tpu.dot_dimension_numbers<[1], [0], [0], [1], [0, 0, 1, 1], [], []>} : vector<8x8xf32>, vector<8x256xf32>, vector<8x256xf32> -> vector<8x256xf32>
    %609 = arith.addf %596, %608 : vector<8x256xf32>
    %c0_296 = arith.constant 0 : index
    %c25_297 = arith.constant 25 : index
    %610 = vector.load %arg7[%c0_296, %c25_297] : memref<8x30xf32, #tpu.memory_space<vmem>>, vector<8x1xf32>
    %611 = vector.broadcast %610 : vector<8x1xf32> to vector<8x256xf32>
    %612 = arith.mulf %338, %611 : vector<8x256xf32>
    %613 = arith.mulf %612, %535 : vector<8x256xf32>
    %c0_298 = arith.constant 0 : index
    %c25_299 = arith.constant 25 : index
    %614 = vector.load %arg8[%c0_298, %c25_299] : memref<8x30xf32, #tpu.memory_space<vmem>>, vector<8x1xf32>
    %615 = vector.broadcast %614 : vector<8x1xf32> to vector<8x256xf32>
    %616 = arith.mulf %350, %615 : vector<8x256xf32>
    %617 = arith.mulf %616, %544 : vector<8x256xf32>
    %618 = arith.addf %613, %617 : vector<8x256xf32>
    %c6_300 = arith.constant 6 : index
    %c0_301 = arith.constant 0 : index
    %c0_302 = arith.constant 0 : index
    %619 = vector.load %arg9[%c6_300, %c0_301, %c0_302] : memref<7x8x8xf32, #tpu.memory_space<vmem>>, vector<1x8x8xf32>
    %620 = vector.shape_cast %619 : vector<1x8x8xf32> to vector<8x8xf32>
    %cst_303 = arith.constant dense<0.000000e+00> : vector<8x256xf32>
    %621 = tpu.matmul %620, %618, %cst_303 {dimension_numbers = #tpu.dot_dimension_numbers<[1], [0], [0], [1], [0, 0, 1, 1], [], []>} : vector<8x8xf32>, vector<8x256xf32>, vector<8x256xf32> -> vector<8x256xf32>
    %622 = arith.addf %609, %621 : vector<8x256xf32>
    %c0_304 = arith.constant 0 : index
    %c0_305 = arith.constant 0 : index
    %623 = vector.load %arg10[%c0_304, %c0_305] : memref<8x256xf32, #tpu.memory_space<vmem>>, vector<8x256xf32>
    tpu.vector_store %arg10[%c0_304, %c0_305], %622 {strides = array<i32>} : memref<8x256xf32, #tpu.memory_space<vmem>>, vector<8x256xf32>,
    return
  }
  func.func @transform_0(%arg0: i32) -> (i32, i32) {
    %c0_i32 = arith.constant 0 : i32
    %c0_i32_0 = arith.constant 0 : i32
    return %c0_i32, %arg0 : i32, i32
  }
  func.func @transform_1(%arg0: i32) -> (i32, i32) {
    %c0_i32 = arith.constant 0 : i32
    %c0_i32_0 = arith.constant 0 : i32
    %c0_i32_1 = arith.constant 0 : i32
    return %c0_i32, %c0_i32_0 : i32, i32
  }
  func.func @transform_2(%arg0: i32) -> (i32, i32) {
    %c0_i32 = arith.constant 0 : i32
    %c0_i32_0 = arith.constant 0 : i32
    %c0_i32_1 = arith.constant 0 : i32
    return %c0_i32, %c0_i32_0 : i32, i32
  }
  func.func @transform_3(%arg0: i32) -> (i32, i32) {
    %c0_i32 = arith.constant 0 : i32
    %c0_i32_0 = arith.constant 0 : i32
    %c0_i32_1 = arith.constant 0 : i32
    return %c0_i32, %c0_i32_0 : i32, i32
  }
  func.func @transform_4(%arg0: i32) -> (i32, i32, i32) {
    %c0_i32 = arith.constant 0 : i32
    %c0_i32_0 = arith.constant 0 : i32
    %c0_i32_1 = arith.constant 0 : i32
    %c0_i32_2 = arith.constant 0 : i32
    return %c0_i32, %c0_i32_0, %c0_i32_1 : i32, i32, i32
  }
  func.func @transform_5(%arg0: i32) -> (i32, i32) {
    %c0_i32 = arith.constant 0 : i32
    %c0_i32_0 = arith.constant 0 : i32
    %c0_i32_1 = arith.constant 0 : i32
    return %c0_i32, %c0_i32_0 : i32, i32
  }
  func.func @transform_6(%arg0: i32) -> (i32, i32) {
    %c0_i32 = arith.constant 0 : i32
    %c0_i32_0 = arith.constant 0 : i32
    %c0_i32_1 = arith.constant 0 : i32
    return %c0_i32, %c0_i32_0 : i32, i32
  }
  func.func @transform_7(%arg0: i32) -> (i32, i32) {
    %c0_i32 = arith.constant 0 : i32
    %c0_i32_0 = arith.constant 0 : i32
    %c0_i32_1 = arith.constant 0 : i32
    return %c0_i32, %c0_i32_0 : i32, i32
  }
  func.func @transform_8(%arg0: i32) -> (i32, i32, i32) {
    %c0_i32 = arith.constant 0 : i32
    %c0_i32_0 = arith.constant 0 : i32
    %c0_i32_1 = arith.constant 0 : i32
    %c0_i32_2 = arith.constant 0 : i32
    return %c0_i32, %c0_i32_0, %c0_i32_1 : i32, i32, i32
  }
  func.func @transform_9(%arg0: i32) -> (i32, i32) {
    %c0_i32 = arith.constant 0 : i32
    %c0_i32_0 = arith.constant 0 : i32
    return %c0_i32, %arg0 : i32, i32
  }
}

</mosaic_0001>

<bundles_post_ra>
// kernel: tpu_custom_call.1
= control target key start
LH: loop header
LB: loop body
LE: loop exit
PB: predicated region body
PF: predicated region fallthrough
CT: control target
= control target key end

     0   :  { %s4587_s0 = inlined_call_operand.hbm [shape: f32[8,1024], index: 0, kind: input, shape index: {}]   ;;  %s4588_s1 = inlined_call_operand.hbm [shape: f32[8,10], index: 1, kind: input, shape index: {}]   ;;  %s4589_s2 = inlined_call_operand.hbm [shape: f32[8,30], index: 2, kind: input, shape index: {}]   ;;  %s4590_s3 = inlined_call_operand.hbm [shape: f32[8,30], index: 3, kind: input, shape index: {}]   ;;  %s4591_s4 = inlined_call_operand.hbm [shape: f32[7,8,8], index: 4, kind: input, shape index: {}]   ;;  %s4592_s5 = inlined_call_operand.hbm [shape: f32[8,10], index: 5, kind: input, shape index: {}]   ;;  %s4593_s6 = inlined_call_operand.hbm [shape: f32[8,30], index: 6, kind: input, shape index: {}]   ;;  %s4594_s7 = inlined_call_operand.hbm [shape: f32[8,30], index: 7, kind: input, shape index: {}]   ;;  %s4595_s8 = inlined_call_operand.hbm [shape: f32[7,8,8], index: 8, kind: input, shape index: {}]   ;;  %s4596_s9 = inlined_call_operand.hbm [shape: f32[8,1024], index: 9, kind: output, shape index: {}]  }
   0x1   :  { %4690 = sst [smem:[#allocation54_spill]] %s4588_s1 }
   0x2   :  { %4691 = sst [smem:[#allocation55_spill]] %s4589_s2 }
   0x3   :  { %4692 = sst [smem:[#allocation56_spill]] %s4590_s3 }
   0x4   :  { %4693 = sst [smem:[#allocation57_spill]] %s4591_s4 }
   0x5   :  { %14 = vsyncpa [#allocation3], 0 }
   0x6   :  { %16 = vsyncpa [#allocation3 + $0x1], 0 }
   0x7   :  { %17 = vsyncpa [#allocation6], 0 }
   0x8   :  { %18 = vsyncpa [#allocation9], 0 }
   0x9   :  { %19 = vsyncpa [#allocation12], 0 }
   0xa   :  { %20 = vsyncpa [#allocation15], 0 }
   0xb   :  { %21 = vsyncpa [#allocation4], 0 }
   0xc   :  { %23 = vsyncpa [#allocation4 + $0x1], 0  ;;  %s3147_s30 = smov 0   ;;  %s3149_s10 = smov 0  }
   0xd   :  { %s3151_s11 = smov 0   ;;  %s3153_s12 = smov 0  }
   0xe LB: > { %s4694_s1 = sld [smem:[#allocation54_spill]]  ;;  %s3171_s16 = sadd.s32 4294967295, %s3061_s12   ;;  %s3061_s12 = sphi %s3153_s12, %s4821_s12   ;;  %s3057_s11 = sphi %s3151_s11, %s4820_s11   ;;  %s3053_s10 = sphi %s3149_s10, %s4819_s10   ;;  %s3049_s30 = sphi %s3147_s30, %s4818_s30  }
   0xf   : > { %p2374_p0 = scmp.ge.s32.totalorder %s3061_s12, 1  ;;  %p50_p1 = scmp.eq.s32.totalorder %s3171_s16, 0 }
  0x10   : > { %p254_p2 = scmp.lt.s32.totalorder %s3061_s12, 5  ;;  %s3063_s18 = smov [#allocation5]  }
  0x11   : > { %s268_s19 = sshll.u32 %s3063_s18, 4  ;;  %s4696_s3 = sld [smem:[#allocation56_spill]]  ;;  %s269_s19 = int_to_ptr.vmem [resolvable:$true] %s268_s19 }
  0x12   : > { %p3176_p3 = pnand %p2374_p0, %p254_p2  ;;  %s3064_s24 = smov [#allocation8]  }
  0x13   : > { %s292_s25 = sshll.u32 %s3064_s24, 4  ;;  %s316_s28 = sshll.u32 %s4592_s5, 4  ;;  %s293_s25 = int_to_ptr.vmem [resolvable:$true] %s292_s25  ;;  %s317_s28 = int_to_ptr.hbm [resolvable:$true] %s316_s28 }
  0x14   : > { %s266_s15 = sshll.u32 %s4694_s1, 4  ;;  %p2473_p4 = pneg %p3176_p3  ;;  %s267_s15 = int_to_ptr.hbm [resolvable:$true] %s266_s15 }
  0x15   : > { %s340_s14 = sshll.u32 %s4594_s7, 4  ;;  %s3065_s18 = smov [#allocation11]   ;;  %s341_s14 = int_to_ptr.hbm [resolvable:$true] %s340_s14 }
  0x16   : > { %p3187_p5 = pnand %p2473_p4, %p50_p1  ;;  %s318_s20 = sshll.u32 %s3065_s18, 4  ;;  %s319_s20 = int_to_ptr.vmem [resolvable:$true] %s318_s20 }
  0x17   : > { %s290_s22 = sshll.u32 %s4696_s3, 4  ;;  %s3066_s21 = smov [#allocation14]   ;;  %s291_s22 = int_to_ptr.hbm [resolvable:$true] %s290_s22 }
  0x18   : > { %2476 = dma.hbm_to_vmem [thread:$0]  (!%p3187_p5), %s267_s15, 128, %s269_s19, [#allocation6]  }
  0x19   : > { %2482 = dma.hbm_to_vmem [thread:$0]  (!%p3187_p5), %s291_s22, 128, %s293_s25, [#allocation9]  }
  0x1a   : > { %2488 = dma.hbm_to_vmem [thread:$0]  (!%p3187_p5), %s317_s28, 128, %s319_s20, [#allocation12]  }
  0x1b   : > { %s342_s24 = sshll.u32 %s3066_s21, 4  ;;  %s4698_s2 = sld [smem:[#allocation55_spill]]  ;;  %s343_s24 = int_to_ptr.vmem [resolvable:$true] %s342_s24 }
  0x1c   : > { %2494 = dma.hbm_to_vmem [thread:$0]  (!%p3187_p5), %s341_s14, 128, %s343_s24, [#allocation15]  }
  0x1d   : > { %s4699_s4 = sld [smem:[#allocation57_spill]]  ;;  %s3067_s29 = smov [#allocation7]  }
  0x1e   : > { %s280_s13 = sshll.u32 %s3067_s29, 4  ;;  %s3068_s28 = smov [#allocation10]   ;;  %s281_s13 = int_to_ptr.vmem [resolvable:$true] %s280_s13 }
  0x1f   : > { %s303_s18 = sshll.u32 %s3068_s28, 4  ;;  %s3069_s20 = smov 128   ;;  %s304_s18 = int_to_ptr.vmem [resolvable:$true] %s303_s18 }
  0x20   : > { %s3070_s21 = smov 8   ;;  %s328_s26 = sshll.u32 %s4593_s6, 4  ;;  %s329_s26 = int_to_ptr.hbm [resolvable:$true] %s328_s26 }
  0x21   : > { %s278_s15 = sshll.u32 %s4698_s2, 4  ;;  %s3071_s27 = smov [#allocation13]   ;;  %s279_s15 = int_to_ptr.hbm [resolvable:$true] %s278_s15 }
  0x22   : > { %2479 = dma.hbm_to_vmem [thread:$0]  (!%p3187_p5), %s279_s15, 128, %s281_s13, [#allocation6]  }
  0x23   : > { %s301_s25 = sshll.u32 %s4699_s4, 4  ;;  %s330_s15 = sshll.u32 %s3071_s27, 4  ;;  %s302_s25 = int_to_ptr.hbm [resolvable:$true] %s301_s25  ;;  %s331_s15 = int_to_ptr.vmem [resolvable:$true] %s330_s15 }
  0x24   : > { %2485 = dma.hbm_to_vmem [thread:$0]  (!%p3187_p5), %s302_s25, 896, %s304_s18, [#allocation9], %s3069_s20, %s3069_s20, %s3070_s21  }
  0x25   : > { %s351_s29 = sshll.u32 %s4595_s8, 4  ;;  %s3072_s25 = smov [#allocation16]   ;;  %s352_s29 = int_to_ptr.hbm [resolvable:$true] %s351_s29 }
  0x26   : > { %2491 = dma.hbm_to_vmem [thread:$0]  (!%p3187_p5), %s329_s26, 128, %s331_s15, [#allocation12]  }
  0x27   : > { %s353_s13 = sshll.u32 %s3072_s25, 4  ;;  %s2373_s28 = sadd.s32 4294967294, %s3061_s12   ;;  %s354_s13 = int_to_ptr.vmem [resolvable:$true] %s353_s13 }
  0x28   : > { %2497 = dma.hbm_to_vmem [thread:$0]  (!%p3187_p5), %s352_s29, 896, %s354_s13, [#allocation15], %s3069_s20, %s3069_s20, %s3070_s21  }
  0x29   : > { %s3227_s18 = sadd.s32 1, %s3061_s12   ;;  %s36_s24 = sadd.s32 1, %s3057_s11 }
  0x2a   : > { %s33_s14 = ssub.s32 %s3061_s12, %s3227_s18  ;;  %p43_p7 = scmp.ne.s32.totalorder %s3057_s11, %s3053_s10 }
  0x2b   : > { %p34_p6 = scmp.eq.s32.totalorder %s33_s14, 0  ;;  %p44_p8 = scmp.eq.s32.totalorder %s3061_s12, 0 }
  0x2c   : > { %p49_p9 = scmp.ne.s32.totalorder %s3053_s10, %s3049_s30  ;;  %p241_p12 = scmp.eq.s32.totalorder %s3171_s16, 3 }
  0x2d   : > { %s3238_s26 = scalar_select %p34_p6, %s3057_s11, %s36_s24  }
  0x2e   : > { %p3240_p10 = por %p44_p8, %p43_p7  ;;  %p3246_p11 = por %p50_p1, %p49_p9 }
  0x2f   : > { %p247_p13 = scmp.eq.s32.totalorder %s2373_s28, 3  ;;  %p2514_p0 = scmp.lt.s32.totalorder %s3061_s12, 4 }
  0x30   : > { %s367_s20 = sand.u32 1, %s3057_s11   ;;  %p3253_p2 = por %p241_p12, %p43_p7 }
  0x31   : > { %p3257_p4 = por %p247_p13, %p49_p9  ;;  %s2384_s19 = sshll.u32 %s367_s20, 4 }
  0x32   : > { %s2435_s22 = sshll.u32 %s3061_s12, 4  ;;  %s371_s14 = scalar_lea.vmem [#allocation2], %s2384_s19 }
  0x33   : > { %s376_s13 = scalar_lea.hbm %s4587_s0, %s2435_s22  ;;  %s380_s24 = sshll.u32 %s371_s14, 4  ;;  %s381_s24 = int_to_ptr.vmem [resolvable:$true] %s380_s24 }
  0x34   : > { %s378_s1 = sshll.u32 %s376_s13, 4  ;;  %p3267_p5 = pnand %p2514_p0, %p3240_p10  ;;  %s379_s1 = int_to_ptr.hbm [resolvable:$true] %s378_s1 }
  0x35   : > { %s368_s2 = scalar_lea.sflag [#allocation3], %s367_s20  ;;  %s2949_s3 = sshra.s32 %s379_s1, 4  ;;  %s2950_s3 = int_to_ptr.hbm [resolvable:$true] %s2949_s3 }
  0x36   : > { %s2951_s4 = scalar_lea.hbm %s2950_s3, 16  ;;  %p2953_p7 = pneg %p3267_p5 }
  0x37   : > { %p2952_p6 = scmp.ne.s32.totalorder %s2950_s3, %s2951_s4  ;;  %s2956_s29 = scalar_lea.hbm %s4587_s0, 64 }
  0x38   : > { %p2957_p10 = scmp.lt.s32.totalorder %s2950_s3, %s4587_s0  ;;  %p2958_p12 = scmp.lt.s32.totalorder %s2956_s29, %s2951_s4 }
  0x39   : > { %p2954_p8 = pnand %p2953_p7, %p2952_p6 }
  0x3a   : > { %p2959_p13 = por %p2958_p12, %p2957_p10 }
  0x3b   : > { %p2955_p9 = pneg %p2954_p8 }
  0x3d   : > { %p2960_p0 = pnand %p2959_p13, %p2955_p9 }
  0x3f   : > { %2963 = shalt.err (!%p2960_p0)
}
  0x40   : > { %2501 = dma.hbm_to_vmem [thread:$0]  (!%p3267_p5), %s379_s1, 256, %s381_s24, %s368_s2  }
  0x41   : > { %389 = sbr.rel (%p3176_p3) target bundleno = 757 (0x2f5), region = 56 }
  0x46   : > { %s3284_s20 = sand.u32 1, %s3053_s10  }
  0x47   : > { %s2388_s13 = sshll.u32 %s3284_s20, 4  ;;  %s392_s14 = scalar_lea.sflag [#allocation3], %s3284_s20 }
  0x48   : > { %s3290_s3 = scalar_lea.vmem [#allocation2], %s2388_s13 }
  0x49   : > { %3024 = dma.done.wait (%p3246_p11), %s392_s14, 256  }
  0x4a   : > { %3026 = vsyncadd (%p3246_p11), %s392_s14, 4294967040 }
  0x4b   : > { %3028 = dma.done.wait (%p50_p1), [#allocation6], 256  }
  0x4c   : > { %3030 = vsyncadd (%p50_p1), [#allocation6], 4294967040 }
  0x4d   : > { %3032 = dma.done.wait (%p50_p1), [#allocation9], 1024  }
  0x4e   : > { %3034 = vsyncadd (%p50_p1), [#allocation9], 4294966272 }
  0x4f   : > { %3036 = dma.done.wait (%p50_p1), [#allocation12], 256  }
  0x50   : > { %3038 = vsyncadd (%p50_p1), [#allocation12], 4294967040 }
  0x51   : > { %3040 = dma.done.wait (%p50_p1), [#allocation15], 1024  }
  0x52   : > { %3042 = vsyncadd (%p50_p1), [#allocation15], 4294966272  ;;  %v4619_v0 = vmov 4   ;;  %v4627_v1 = vmov 2   ;;  %v4635_v2 = vmov 0   ;;  %v516_v3 = vld [vmem:[#allocation5] sm:$0xff] }
  0x53   : > { %2593 = vset.pattern.permute.xlu2 %v4619_v0  ;;  %2591 = vset.pattern.permute.xlu1 %v4627_v1  ;;  %v4621_v4 = vmov 5   ;;  %v4629_v5 = vmov 3   ;;  %v4618_v6 = vmov 8   ;;  %v4616_v7 = vmov 7   ;;  %v3321_v10 = vld [vmem:[#allocation8] sm:$0xff]  ;;  %v3323_v11 = vld [vmem:[#allocation7] sm:$0xff] }
  0x54   : > { %2590 = vset.pattern.permute.xlu0 %v4635_v2  ;;  %543 = vperm.xlu2 %2593, %v516_v3   ;;  %v4607_v8 = vmov 6   ;;  %v4609_v9 = vmov 1   ;;  %v4611_v12 = vmov 9   ;;  %v4612_v13 = vmov 11   ;;  %v3368_v20 = vld [vmem:[%s3290_s3] sm:$0xff]  ;;  %v3371_v21 = vld [vmem:[%s3290_s3 + $0x8] sm:$0xff] }
  0x55   : > { %531 = vperm.xlu1 %2591, %v516_v3   ;;  %519 = vperm.xlu0 %2590, %v516_v3   ;;  %v4601_v14 = vmov 13   ;;  %v4614_v15 = vmov 16   ;;  %v4625_v16 = vmov 21   ;;  %v4633_v18 = vmov 24   ;;  %4705 = vst [vmem:[#allocation24_spill] sm:$0xff] %v3371_v21  ;;  %s2436_s1 = sshll.u32 %s3171_s16, 4 }
  0x56   : > { %v4605_v19 = vmov 10   ;;  %v4631_v27 = vmov 0.0   ;;  %v4603_v30 = vmov 12   ;;  %v4599_v43 = vmov 14   ;;  %s2222_s17 = scalar_lea.hbm %s4596_s9, %s2436_s1  ;;  %s470_s23 = scalar_lea.vmem [#allocation17], %s2388_s13 }
  0x57   : > { %v4597_v63 = vmov 15   ;;  %s2224_s24 = sshll.u32 %s470_s23, 4  ;;  %s2226_s28 = sshll.u32 %s2222_s17, 4  ;;  %s2225_s24 = int_to_ptr.vmem [resolvable:$true] %s2224_s24  ;;  %s2227_s28 = int_to_ptr.hbm [resolvable:$true] %s2226_s28 }
  0x58   : > { %s2211_s16 = scalar_lea.sflag [#allocation4], %s3284_s20  ;;  %s2993_s19 = sshra.s32 %s2227_s28, 4  ;;  %s2994_s19 = int_to_ptr.hbm [resolvable:$true] %s2993_s19 }
  0x59   : > { %s2995_s22 = scalar_lea.hbm %s2994_s19, 16  ;;  %s2999_s27 = scalar_lea.hbm %s4596_s9, 64 }
  0x5a   : > { %p2996_p1 = scmp.ne.s32.totalorder %s2994_s19, %s2995_s22  ;;  %p3000_p5 = scmp.lt.s32.totalorder %s2994_s19, %s4596_s9 }
  0x5b   : > { %p3001_p6 = scmp.lt.s32.totalorder %s2999_s27, %s2995_s22 }
  0x5c   : > { %2594 = vset.pattern.permute.xlu2 %v4621_v4  ;;  %p2997_p3 = pnand %p2996_p1, %p3253_p2 }
  0x5d   : > { %2592 = vset.pattern.permute.xlu1 %v4629_v5  ;;  %2597 = vset.pattern.permute.xlu0 %v4618_v6  ;;  %p3002_p7 = por %p3001_p6, %p3000_p5 }
  0x5e   : > { %549 = vperm.xlu2 %2594, %v516_v3   ;;  %537 = vperm.xlu1 %2592, %v516_v3   ;;  %p2998_p11 = pneg %p2997_p3 }
  0x5f   : > { %567 = vperm.xlu0 %2597, %v516_v3  }
  0x60   : > { %p3003_p8 = pnand %p3002_p7, %p2998_p11 }
  0x66   : > { %2596 = vset.pattern.permute.xlu2 %v4616_v7  ;;  %2595 = vset.pattern.permute.xlu1 %v4607_v8 }
  0x67   : > { %2598 = vset.pattern.permute.xlu0 %v4609_v9  ;;  %561 = vperm.xlu2 %2596, %v516_v3  }
  0x68   : > { %555 = vperm.xlu1 %2595, %v516_v3   ;;  %525 = vperm.xlu0 %2598, %v516_v3  }
  0x6f   : > { %2600 = vset.pattern.permute.xlu2 %v4635_v2 }
  0x70   : > { %2599 = vset.pattern.permute.xlu1 %v4611_v12  ;;  %667 = vperm.xlu0 %2598, %v3321_v10  }
  0x71   : > { %639 = vperm.xlu2 %2600, %v3323_v11   ;;  %573 = vperm.xlu1 %2599, %v516_v3  }
  0x78   : > { %2607 = vset.pattern.permute.xlu0 %v4619_v0 }
  0x79   : > { %2602 = vset.pattern.permute.xlu2 %v4609_v9  ;;  %2601 = vset.pattern.permute.xlu1 %v4635_v2 }
  0x7a   : > { %713 = vperm.xlu0 %2607, %v3323_v11   ;;  %659 = vperm.xlu2 %2602, %v3323_v11  }
  0x7b   : > { %649 = vperm.xlu1 %2601, %v3321_v10  }
  0x82   : > { %2612 = vset.pattern.permute.xlu0 %v4607_v8  ;;  %2604 = vset.pattern.permute.xlu2 %v4627_v1 }
  0x83   : > { %2603 = vset.pattern.permute.xlu1 %v4627_v1  ;;  %757 = vperm.xlu0 %2612, %v3321_v10  }
  0x84   : > { %685 = vperm.xlu2 %2604, %v3321_v10   ;;  %677 = vperm.xlu1 %2603, %v3323_v11  }
  0x8b   : > { %2617 = vset.pattern.permute.xlu0 %v4612_v13 }
  0x8c   : > { %2606 = vset.pattern.permute.xlu2 %v4629_v5  ;;  %2605 = vset.pattern.permute.xlu1 %v4629_v5 }
  0x8d   : > { %803 = vperm.xlu0 %2617, %v3323_v11   ;;  %703 = vperm.xlu2 %2606, %v3321_v10  }
  0x8e   : > { %695 = vperm.xlu1 %2605, %v3323_v11  }
  0x95   : > { %2622 = vset.pattern.permute.xlu0 %v4601_v14  ;;  %2609 = vset.pattern.permute.xlu2 %v4621_v4 }
  0x96   : > { %2608 = vset.pattern.permute.xlu1 %v4619_v0  ;;  %847 = vperm.xlu0 %2622, %v3321_v10  }
  0x97   : > { %731 = vperm.xlu2 %2609, %v3323_v11   ;;  %721 = vperm.xlu1 %2608, %v3321_v10  }
  0x9e   : > { %2627 = vset.pattern.permute.xlu0 %v4614_v15 }
  0x9f   : > { %2611 = vset.pattern.permute.xlu2 %v4607_v8  ;;  %2610 = vset.pattern.permute.xlu1 %v4621_v4 }
  0xa0   : > { %893 = vperm.xlu0 %2627, %v3323_v11   ;;  %749 = vperm.xlu2 %2611, %v3323_v11  }
  0xa1   : > { %739 = vperm.xlu1 %2610, %v3321_v10  }
  0xa8   : > { %2632 = vset.pattern.permute.xlu0 %v4625_v16  ;;  %2614 = vset.pattern.permute.xlu2 %v4616_v7 }
  0xa9   : > { %2613 = vset.pattern.permute.xlu1 %v4616_v7  ;;  %1026 = vperm.xlu0 %2632, %v3321_v10  }
  0xaa   : > { %775 = vperm.xlu2 %2614, %v3321_v10   ;;  %767 = vperm.xlu1 %2613, %v3323_v11  }
  0xae   : > { %v544_v17 = vpop.permute.xlu2 %543 }
  0xaf   : > { %v3376_v22 = vsub.f32 %v3368_v20, %v544_v17  ;;  %v3379_v23 = vsub.f32 %v3371_v21, %v544_v17 }
  0xb1   : > { %2637 = vset.pattern.permute.xlu0 %v4633_v18  ;;  %4706 = vst [vmem:[#allocation25_spill] sm:$0xff] %v3376_v22  ;;  %vm594_vm0 = vcmp.ge.f32.partialorder %v3376_v22, 0.0  ;;  %vm595_vm1 = vcmp.ge.f32.partialorder %v3379_v23, 0.0  ;;  %v3596_v18 = vld [vmem:[#allocation11] sm:$0xff] }
  0xb2   : > { %2616 = vset.pattern.permute.xlu2 %v4605_v19  ;;  %2615 = vset.pattern.permute.xlu1 %v4605_v19  ;;  %4707 = vst [vmem:[#allocation26_spill] sm:$0xff] %v3379_v23  ;;  %v596_v28 = vsel %vm594_vm0, 1.0, %v4631_v27  ;;  %v597_v29 = vsel %vm595_vm1, 1.0, %v4631_v27 }
  0xb3   : > { %1213 = vperm.xlu0 %2637, %v3323_v11   ;;  %793 = vperm.xlu2 %2616, %v3321_v10  }
  0xb4   : > { %785 = vperm.xlu1 %2615, %v3323_v11  }
  0xb8   : > { %v550_v24 = vpop.permute.xlu2 %549 }
  0xb9   : > { %v3386_v25 = vsub.f32 %v3368_v20, %v550_v24  ;;  %v3389_v26 = vsub.f32 %v3371_v21, %v550_v24 }
  0xbb   : > { %vm598_vm2 = vcmp.ge.f32.partialorder %v3386_v25, 0.0  ;;  %vm599_vm3 = vcmp.ge.f32.partialorder %v3389_v26, 0.0  ;;  %2642 = vset.pattern.permute.xlu0 %v4609_v9  ;;  %2619 = vset.pattern.permute.xlu2 %v4603_v30 }
  0xbc   : > { %2618 = vset.pattern.permute.xlu1 %v4612_v13  ;;  %v3399_v31 = vsel %vm598_vm2, 1.0, %v4631_v27  ;;  %v3402_v32 = vsel %vm599_vm3, 1.0, %v4631_v27  ;;  %821 = vperm.xlu2 %2619, %v3323_v11  }
  0xbd   : > { %811 = vperm.xlu1 %2618, %v3321_v10   ;;  %v3407_v33 = vsub.f32 %v596_v28, %v3399_v31  ;;  %v3410_v34 = vsub.f32 %v597_v29, %v3402_v32  ;;  %1392 = vperm.xlu0 %2642, %v3596_v18  }
  0xc1   : > { %v562_v35 = vpop.permute.xlu2 %561 }
  0xc2   : > { %v3421_v39 = vsub.f32 %v3368_v20, %v562_v35  ;;  %v3424_v40 = vsub.f32 %v3371_v21, %v562_v35 }
  0xc4   : > { %2621 = vset.pattern.permute.xlu2 %v4601_v14  ;;  %vm606_vm6 = vcmp.ge.f32.partialorder %v3421_v39, 0.0  ;;  %vm607_vm7 = vcmp.ge.f32.partialorder %v3424_v40, 0.0 }
  0xc5   : > { %2620 = vset.pattern.permute.xlu1 %v4603_v30  ;;  %839 = vperm.xlu2 %2621, %v3323_v11   ;;  %v608_v52 = vsel %vm606_vm6, 1.0, %v4631_v27  ;;  %v609_v53 = vsel %vm607_vm7, 1.0, %v4631_v27  ;;  %v4623_v30 = vmov 20  }
  0xc6   : > { %829 = vperm.xlu1 %2620, %v3321_v10  }
  0xc7   : > { %v532_v36 = vpop.permute.xlu1 %531  ;;  %v3416_v37 = vpop.permute.xlu0 %519 }
  0xc8   : > { %v3427_v41 = vsub.f32 %v3368_v20, %v532_v36  ;;  %v3430_v42 = vsub.f32 %v3371_v21, %v532_v36  ;;  %v3514_v14 = vsub.f32 %v3368_v20, %v3416_v37 }
  0xca   : > { %4708 = vst [vmem:[#allocation27_spill] sm:$0xff] %v3430_v42  ;;  %vm586_vm4 = vcmp.ge.f32.partialorder %v3427_v41, 0.0  ;;  %vm587_vm5 = vcmp.ge.f32.partialorder %v3430_v42, 0.0  ;;  %vm578_vm0 = vcmp.ge.f32.partialorder %v3514_v14, 0.0 }
  0xcb   : > { %v3418_v38 = vpop.permute.xlu2 %639  ;;  %v588_v50 = vsel %vm586_vm4, 1.0, %v4631_v27  ;;  %v589_v51 = vsel %vm587_vm5, 1.0, %v4631_v27 }
  0xcd   : > { %2624 = vset.pattern.permute.xlu2 %v4599_v43 }
  0xce   : > { %2623 = vset.pattern.permute.xlu1 %v4599_v43  ;;  %865 = vperm.xlu2 %2624, %v3321_v10  }
  0xcf   : > { %857 = vperm.xlu1 %2623, %v3323_v11  }
  0xd0   : > { %v538_v44 = vpop.permute.xlu1 %537 }
  0xd1   : > { %v568_v45 = vpop.permute.xlu0 %567  ;;  %v3441_v46 = vsub.f32 %v3368_v20, %v538_v44  ;;  %v3444_v47 = vsub.f32 %v3371_v21, %v538_v44 }
  0xd2   : > { %v3447_v48 = vsub.f32 %v3368_v20, %v568_v45  ;;  %v3450_v49 = vsub.f32 %v3371_v21, %v568_v45 }
  0xd3   : > { %4709 = vst [vmem:[#allocation28_spill] sm:$0xff] %v3441_v46  ;;  %vm590_vm8 = vcmp.ge.f32.partialorder %v3441_v46, 0.0  ;;  %vm591_vm9 = vcmp.ge.f32.partialorder %v3444_v47, 0.0 }
  0xd4   : > { %4710 = vst [vmem:[#allocation29_spill] sm:$0xff] %v3444_v47  ;;  %vm610_vm10 = vcmp.ge.f32.partialorder %v3447_v48, 0.0  ;;  %vm611_vm11 = vcmp.ge.f32.partialorder %v3450_v49, 0.0  ;;  %v660_v54 = vpop.permute.xlu2 %659  ;;  %v592_v55 = vsel %vm590_vm8, 1.0, %v4631_v27  ;;  %v593_v56 = vsel %vm591_vm9, 1.0, %v4631_v27 }
  0xd5   : > { %4711 = vst [vmem:[#allocation30_spill] sm:$0xff] %v3447_v48  ;;  %v3463_v57 = vsel %vm610_vm10, 1.0, %v4631_v27  ;;  %v3466_v58 = vsel %vm611_vm11, 1.0, %v4631_v27  ;;  %v3468_v59 = vsub.f32 %v592_v55, %v596_v28  ;;  %v3470_v60 = vsub.f32 %v593_v56, %v597_v29 }
  0xd6   : > { %4712 = vst [vmem:[#allocation31_spill] sm:$0xff] %v3450_v49  ;;  %v3472_v61 = vsub.f32 %v588_v50, %v592_v55  ;;  %v3474_v62 = vsub.f32 %v589_v51, %v593_v56  ;;  %2626 = vset.pattern.permute.xlu2 %v4597_v63  ;;  %v3479_v3 = vsub.f32 %v608_v52, %v3463_v57 }
  0xd7   : > { %2625 = vset.pattern.permute.xlu1 %v4597_v63  ;;  %v3482_v17 = vsub.f32 %v609_v53, %v3466_v58  ;;  %883 = vperm.xlu2 %2626, %v3321_v10  }
  0xd8   : > { %875 = vperm.xlu1 %2625, %v3323_v11  }
  0xda   : > { %v556_v24 = vpop.permute.xlu1 %555  ;;  %v526_v35 = vpop.permute.xlu0 %525 }
  0xdb   : > { %v3487_v28 = vsub.f32 %v3368_v20, %v556_v24  ;;  %v3490_v29 = vsub.f32 %v3371_v21, %v556_v24  ;;  %v3493_v36 = vsub.f32 %v3368_v20, %v526_v35  ;;  %v3496_v44 = vsub.f32 %v3371_v21, %v526_v35 }
  0xdd   : > { %4713 = vst [vmem:[#allocation32_spill] sm:$0xff] %v3496_v44  ;;  %vm602_vm12 = vcmp.ge.f32.partialorder %v3487_v28, 0.0  ;;  %vm603_vm13 = vcmp.ge.f32.partialorder %v3490_v29, 0.0  ;;  %vm582_vm14 = vcmp.ge.f32.partialorder %v3493_v36, 0.0  ;;  %vm583_vm15 = vcmp.ge.f32.partialorder %v3496_v44, 0.0 }
  0xde   : > { %v686_v45 = vpop.permute.xlu2 %685  ;;  %v604_v55 = vsel %vm602_vm12, 1.0, %v4631_v27  ;;  %v605_v56 = vsel %vm603_vm13, 1.0, %v4631_v27  ;;  %v3507_v35 = vsel %vm582_vm14, 1.0, %v4631_v27  ;;  %v3510_v43 = vsel %vm583_vm15, 1.0, %v4631_v27 }
  0xdf   : > { %v688_v24 = vmul.f32 %v686_v45, %v3376_v22  ;;  %v689_v63 = vmul.f32 %v686_v45, %v3379_v23  ;;  %2629 = vset.pattern.permute.xlu2 %v4623_v30  ;;  %v620_v19 = vsub.f32 %v3507_v35, %v588_v50  ;;  %v621_v9 = vsub.f32 %v3510_v43, %v589_v51 }
  0xe0   : > { %2628 = vset.pattern.permute.xlu1 %v4614_v15  ;;  %911 = vperm.xlu2 %2629, %v3323_v11   ;;  %v3529_v12 = vsub.f32 %v3399_v31, %v604_v55  ;;  %v3532_v13 = vsub.f32 %v3402_v32, %v605_v56  ;;  %v3534_v15 = vsub.f32 %v604_v55, %v608_v52  ;;  %vm930_vm12 = vcmask 64512  }
  0xe1   : > { %v3521_v45 = vmul.f32 %v688_v24, %v3468_v59  ;;  %v3524_v8 = vmul.f32 %v689_v63, %v3470_v60  ;;  %901 = vperm.xlu1 %2628, %v3321_v10   ;;  %v3536_v50 = vsub.f32 %v605_v56, %v609_v53  ;;  %v3540_v24 = vsub.f32 %v3371_v21, %v3416_v37 }
  0xe2   : > { %v668_v63 = vpop.permute.xlu0 %667  ;;  %v662_v7 = vmul.f32 %v660_v54, %v3493_v36  ;;  %v663_v6 = vmul.f32 %v660_v54, %v3496_v44 }
  0xe3   : > { %v670_v51 = vmul.f32 %v668_v63, %v3441_v46  ;;  %v671_v31 = vmul.f32 %v668_v63, %v3444_v47  ;;  %v574_v0 = vpop.permute.xlu1 %573  ;;  %vm579_vm1 = vcmp.ge.f32.partialorder %v3540_v24, 0.0  ;;  %v643_v5 = vmul.f32 %v3418_v38, %v3540_v24 }
  0xe4   : > { %v3547_v32 = vsub.f32 %v3368_v20, %v574_v0  ;;  %v3550_v52 = vsub.f32 %v3371_v21, %v574_v0  ;;  %v664_v53 = vmul.f32 %v662_v7, %v620_v19  ;;  %v665_v55 = vmul.f32 %v663_v6, %v621_v9 }
  0xe5   : > { %v672_v37 = vmul.f32 %v670_v51, %v3472_v61  ;;  %v673_v56 = vmul.f32 %v671_v31, %v3474_v62  ;;  %v580_v31 = vsel %vm578_vm0, 1.0, %v4631_v27 }
  0xe6   : > { %vm614_vm2 = vcmp.ge.f32.partialorder %v3547_v32, 0.0  ;;  %vm615_vm3 = vcmp.ge.f32.partialorder %v3550_v52, 0.0  ;;  %v618_v1 = vsub.f32 %v580_v31, %v3507_v35 }
  0xe7   : > { %v704_v54 = vpop.permute.xlu2 %703  ;;  %v3558_v63 = vadd.f32 %v672_v37, %v664_v53  ;;  %v3560_v4 = vadd.f32 %v673_v56, %v665_v55  ;;  %v3563_v0 = vsel %vm614_vm2, 1.0, %v4631_v27  ;;  %v3566_v6 = vsel %vm615_vm3, 1.0, %v4631_v27 }
  0xe8   : > { %2631 = vset.pattern.permute.xlu2 %v4625_v16  ;;  %v706_v7 = vmul.f32 %v704_v54, %v3386_v25  ;;  %v707_v51 = vmul.f32 %v704_v54, %v3389_v26  ;;  %v581_v55 = vsel %vm579_vm1, 1.0, %v4631_v27 }
  0xe9   : > { %2630 = vset.pattern.permute.xlu1 %v4623_v30  ;;  %1018 = vperm.xlu2 %2631, %v3323_v11   ;;  %v642_v30 = vmul.f32 %v3418_v38, %v3514_v14 }
  0xea   : > { %919 = vperm.xlu1 %2630, %v3321_v10   ;;  %v3583_v56 = vmul.f32 %v706_v7, %v3407_v33  ;;  %v3586_v54 = vmul.f32 %v707_v51, %v3410_v34  ;;  %v619_v7 = vsub.f32 %v581_v55, %v3510_v43  ;;  %v4647_v43 = vmov 22  }
  0xec   : > { %v714_v16 = vpop.permute.xlu0 %713  ;;  %v645_v44 = vmul.f32 %v643_v5, %v619_v7 }
  0xed   : > { %v716_v27 = vmul.f32 %v714_v16, %v3376_v22  ;;  %v717_v53 = vmul.f32 %v714_v16, %v3379_v23  ;;  %v650_v37 = vpop.permute.xlu1 %649  ;;  %v644_v16 = vmul.f32 %v642_v30, %v618_v1 }
  0xee   : > { %v652_v51 = vmul.f32 %v650_v37, %v3427_v41  ;;  %v653_v2 = vmul.f32 %v650_v37, %v3430_v42 }
  0xef   : > { %v3602_v35 = vmul.f32 %v716_v27, %v3407_v33  ;;  %v3605_v38 = vmul.f32 %v717_v53, %v3410_v34 }
  0xf0   : > { %v654_v31 = vmul.f32 %v652_v51, %v620_v19  ;;  %v655_v22 = vmul.f32 %v653_v2, %v621_v9  ;;  %v4714_v9 = vmov 0   ;;  %v4649_v51 = vmov 23  }
  0xf1   : > { %v732_v23 = vpop.permute.xlu2 %731  ;;  %2634 = vset.pattern.permute.xlu2 %v4647_v43  ;;  %2651 = vset.pattern.permute.xlu0 %v4714_v9 }
  0xf2   : > { %2633 = vset.pattern.permute.xlu1 %v4647_v43  ;;  %v734_v55 = vmul.f32 %v732_v23, %v3386_v25  ;;  %v735_v37 = vmul.f32 %v732_v23, %v3389_v26  ;;  %v3611_v21 = vadd.f32 %v654_v31, %v644_v16  ;;  %1091 = vperm.xlu2 %2634, %v3321_v10  }
  0xf3   : > { %1083 = vperm.xlu1 %2633, %v3323_v11   ;;  %v3615_v19 = vadd.f32 %v655_v22, %v645_v44 }
  0xf4   : > { %v3618_v1 = vmul.f32 %v734_v55, %v3529_v12  ;;  %v3621_v2 = vmul.f32 %v735_v37, %v3532_v13 }
  0xf5   : > { %v758_v5 = vpop.permute.xlu0 %757 }
  0xf6   : > { %v760_v27 = vmul.f32 %v758_v5, %v3447_v48  ;;  %v761_v23 = vmul.f32 %v758_v5, %v3450_v49  ;;  %v678_v30 = vpop.permute.xlu1 %677 }
  0xf7   : > { %v680_v33 = vmul.f32 %v678_v30, %v3427_v41  ;;  %v681_v34 = vmul.f32 %v678_v30, %v3430_v42 }
  0xf8   : > { %v762_v22 = vmul.f32 %v760_v27, %v3479_v3  ;;  %v763_v44 = vmul.f32 %v761_v23, %v3482_v17 }
  0xf9   : > { %v682_v53 = vmul.f32 %v680_v33, %v3472_v61  ;;  %v683_v7 = vmul.f32 %v681_v34, %v3474_v62 }
  0xfa   : > { %2636 = vset.pattern.permute.xlu2 %v4649_v51  ;;  %v750_v31 = vpop.permute.xlu2 %749 }
  0xfb   : > { %2635 = vset.pattern.permute.xlu1 %v4649_v51  ;;  %1156 = vperm.xlu2 %2636, %v3321_v10   ;;  %v752_v16 = vmul.f32 %v750_v31, %v3487_v28  ;;  %v753_v55 = vmul.f32 %v750_v31, %v3490_v29  ;;  %v3639_v37 = vadd.f32 %v3521_v45, %v682_v53  ;;  %v4645_v53 = vmov 25  }
  0xfc   : > { %1148 = vperm.xlu1 %2635, %v3323_v11   ;;  %v3642_v61 = vadd.f32 %v3524_v8, %v683_v7  ;;  %v4715_v7 = vmov 24  }
  0xfd   : > { %v754_v62 = vmul.f32 %v752_v16, %v3534_v15  ;;  %v755_v5 = vmul.f32 %v753_v55, %v3536_v50 }
  0xff   : > { %v3646_v27 = vpop.permute.xlu0 %803  ;;  %v3648_v30 = vadd.f32 %v762_v22, %v754_v62  ;;  %v3650_v33 = vadd.f32 %v763_v44, %v755_v5  ;;  %v4717_v5 = vsub.f32 %v3466_v58, %v3566_v6 }
 0x100   : > { %v696_v23 = vpop.permute.xlu1 %695 }
 0x101   : > { %v698_v34 = vmul.f32 %v696_v23, %v3441_v46  ;;  %v699_v31 = vmul.f32 %v696_v23, %v3444_v47 }
 0x103   : > { %v700_v45 = vmul.f32 %v698_v34, %v3468_v59  ;;  %v701_v8 = vmul.f32 %v699_v31, %v3470_v60  ;;  %2639 = vset.pattern.permute.xlu2 %v4645_v53  ;;  %v4716_v60 = vsub.f32 %v3463_v57, %v3563_v0 }
 0x104   : > { %2638 = vset.pattern.permute.xlu1 %v4715_v7  ;;  %v776_v16 = vpop.permute.xlu2 %775  ;;  %1278 = vperm.xlu2 %2639, %v3323_v11  }
 0x105   : > { %v778_v22 = vmul.f32 %v776_v16, %v3547_v32  ;;  %v779_v44 = vmul.f32 %v776_v16, %v3550_v52  ;;  %1221 = vperm.xlu1 %2638, %v3321_v10   ;;  %v3663_v55 = vadd.f32 %v3583_v56, %v700_v45  ;;  %v3666_v59 = vadd.f32 %v3586_v54, %v701_v8 }
 0x107   : > { %v780_v62 = vmul.f32 %v778_v22, %v4716_v60  ;;  %v781_v11 = vmul.f32 %v779_v44, %v4717_v5 }
 0x108   : > { %v848_v23 = vpop.permute.xlu0 %847 }
 0x109   : > { %v722_v34 = vpop.permute.xlu1 %721  ;;  %v850_v57 = vmul.f32 %v848_v23, %v3487_v28  ;;  %v851_v0 = vmul.f32 %v848_v23, %v3490_v29 }
 0x10a   : > { %v724_v31 = vmul.f32 %v722_v34, %v3487_v28  ;;  %v725_v16 = vmul.f32 %v722_v34, %v3490_v29 }
 0x10c   : > { %v726_v56 = vmul.f32 %v724_v31, %v3529_v12  ;;  %v727_v45 = vmul.f32 %v725_v16, %v3532_v13  ;;  %2641 = vset.pattern.permute.xlu2 %v4714_v9 }
 0x10d   : > { %2640 = vset.pattern.permute.xlu1 %v4645_v53  ;;  %1386 = vperm.xlu2 %2641, %v3596_v18   ;;  %v794_v58 = vpop.permute.xlu2 %793 }
 0x10e   : > { %1286 = vperm.xlu1 %2640, %v3321_v10   ;;  %v796_v6 = vmul.f32 %v794_v58, %v3441_v46  ;;  %v797_v54 = vmul.f32 %v794_v58, %v3444_v47  ;;  %v3687_v12 = vadd.f32 %v726_v56, %v3602_v35  ;;  %v3690_v13 = vadd.f32 %v727_v45, %v3605_v38 }
 0x110   : > { %v798_v8 = vmul.f32 %v796_v6, %v3558_v63  ;;  %v799_v22 = vmul.f32 %v797_v54, %v3560_v4  ;;  %v852_v44 = vmul.f32 %v850_v57, %v3687_v12  ;;  %v853_v60 = vmul.f32 %v851_v0, %v3690_v13 }
 0x111   : > { %v4718_v57 = vmov 3   ;;  %v4719_v0 = vmov 2  }
 0x112   : > { %v894_v5 = vpop.permute.xlu0 %893 }
 0x113   : > { %v896_v10 = vmul.f32 %v894_v5, %v3487_v28  ;;  %v897_v23 = vmul.f32 %v894_v5, %v3490_v29  ;;  %v740_v34 = vpop.permute.xlu1 %739 }
 0x114   : > { %v742_v35 = vmul.f32 %v740_v34, %v3421_v39  ;;  %v743_v31 = vmul.f32 %v740_v34, %v3424_v40 }
 0x115   : > { %v3701_v38 = vmul.f32 %v896_v10, %v3648_v30  ;;  %v3704_v16 = vmul.f32 %v897_v23, %v3650_v33  ;;  %2644 = vset.pattern.permute.xlu2 %v4718_v57  ;;  %v3726_v23 = vld [vmem:[#allocation14] sm:$0xff] }
 0x116   : > { %v744_v56 = vmul.f32 %v742_v35, %v3534_v15  ;;  %v745_v45 = vmul.f32 %v743_v31, %v3536_v50  ;;  %2643 = vset.pattern.permute.xlu1 %v4719_v0  ;;  %1404 = vperm.xlu2 %2644, %v3596_v18   ;;  %v822_v58 = vpop.permute.xlu2 %821 }
 0x117   : > { %1398 = vperm.xlu1 %2643, %v3596_v18   ;;  %v824_v6 = vmul.f32 %v822_v58, %v3427_v41  ;;  %v825_v54 = vmul.f32 %v822_v58, %v3430_v42  ;;  %1516 = vperm.xlu0 %2651, %v3726_v23  }
 0x118   : > { %v3715_v5 = vadd.f32 %v744_v56, %v3618_v1  ;;  %v3718_v15 = vadd.f32 %v745_v45, %v3621_v2  ;;  %v4720_v1 = vmov 5   ;;  %v4721_v56 = vmov 4  }
 0x119   : > { %v3721_v50 = vmul.f32 %v824_v6, %v3639_v37  ;;  %v3724_v10 = vmul.f32 %v825_v54, %v3642_v61 }
 0x11c   : > { %v768_v34 = vpop.permute.xlu1 %767 }
 0x11d   : > { %v770_v35 = vmul.f32 %v768_v34, %v3421_v39  ;;  %v771_v31 = vmul.f32 %v768_v34, %v3424_v40 }
 0x11e   : > { %2646 = vset.pattern.permute.xlu2 %v4720_v1 }
 0x11f   : > { %2645 = vset.pattern.permute.xlu1 %v4721_v56  ;;  %v772_v2 = vmul.f32 %v770_v35, %v3479_v3  ;;  %v773_v45 = vmul.f32 %v771_v31, %v3482_v17  ;;  %1416 = vperm.xlu2 %2646, %v3596_v18   ;;  %v840_v58 = vpop.permute.xlu2 %839  ;;  %v3745_v3 = vld [vmem:[#allocation13] sm:$0xff] }
 0x120   : > { %1410 = vperm.xlu1 %2645, %v3596_v18   ;;  %v842_v6 = vmul.f32 %v840_v58, %v3441_v46  ;;  %v843_v54 = vmul.f32 %v840_v58, %v3444_v47  ;;  %2656 = vset.pattern.permute.xlu0 %v4718_v57  ;;  %v4729_v47 = vmov 9  }
 0x121   : > { %v3739_v53 = vadd.f32 %v780_v62, %v772_v2  ;;  %v3741_v34 = vadd.f32 %v781_v11, %v773_v45  ;;  %1562 = vperm.xlu0 %2656, %v3745_v3   ;;  %v4722_v2 = vmov 8   ;;  %v4723_v45 = vmov 7  }
 0x122   : > { %v844_v43 = vmul.f32 %v842_v6, %v3663_v55  ;;  %v845_v51 = vmul.f32 %v843_v54, %v3666_v59 }
 0x124   : > { %v3749_v17 = vadd.f32 %v852_v44, %v844_v43  ;;  %v3751_v35 = vadd.f32 %v853_v60, %v845_v51 }
 0x126   : > { %v786_v31 = vpop.permute.xlu1 %785 }
 0x127   : > { %v788_v62 = vmul.f32 %v786_v31, %v3514_v14  ;;  %v789_v11 = vmul.f32 %v786_v31, %v3540_v24  ;;  %2648 = vset.pattern.permute.xlu2 %v4722_v2  ;;  %v4725_v2 = vld [vmem:[#allocation24_spill] sm:$0xff] }
 0x128   : > { %2647 = vset.pattern.permute.xlu1 %v4723_v45  ;;  %1434 = vperm.xlu2 %2648, %v3596_v18   ;;  %v866_v54 = vpop.permute.xlu2 %865 }
 0x129   : > { %v790_v58 = vmul.f32 %v788_v62, %v3611_v21  ;;  %v791_v6 = vmul.f32 %v789_v11, %v3615_v19  ;;  %1428 = vperm.xlu1 %2647, %v3596_v18   ;;  %v868_v43 = vmul.f32 %v866_v54, %v3421_v39  ;;  %v869_v51 = vmul.f32 %v866_v54, %v3424_v40  ;;  %v4727_v54 = vld [vmem:[#allocation25_spill] sm:$0xff] }
 0x12a   : > { %v4724_v19 = vmov 11   ;;  %v806_v62 = vmul.f32 %v3646_v27, %v3493_v36  ;;  %v2398_v11 = vmul.f32 -1.442695, %v3368_v20 }
 0x12b   : > { %v3763_v44 = vadd.f32 %v798_v8, %v790_v58  ;;  %v3765_v60 = vadd.f32 %v799_v22, %v791_v6  ;;  %v3768_v31 = vmul.f32 %v868_v43, %v3715_v5  ;;  %v3771_v21 = vmul.f32 %v869_v51, %v3718_v15  ;;  %2661 = vset.pattern.permute.xlu0 %v4724_v19  ;;  %v4726_v58 = vld [vmem:[#allocation32_spill] sm:$0xff]  ;;  %v4728_v51 = vld [vmem:[#allocation26_spill] sm:$0xff] }
 0x12c   : > { %1678 = vperm.xlu0 %2661, %v3726_v23   ;;  %v2399_v8 = vmul.f32 -1.442695, %v4725_v2  ;;  %v807_v22 = vmul.f32 %v3646_v27, %v4726_v58  ;;  %2693 = vpow2.f32 %v2398_v11  ;;  %v808_v1 = vmul.f32 %v806_v62, %v3558_v63 }
 0x12e   : > { %2695 = vpow2.f32 %v2399_v8  ;;  %v809_v46 = vmul.f32 %v807_v22, %v3560_v4 }
 0x12f   : > { %v812_v6 = vpop.permute.xlu1 %811 }
 0x130   : > { %v814_v43 = vmul.f32 %v812_v6, %v4727_v54  ;;  %v815_v45 = vmul.f32 %v812_v6, %v4728_v51  ;;  %2650 = vset.pattern.permute.xlu2 %v4714_v9 }
 0x131   : > { %2649 = vset.pattern.permute.xlu1 %v4729_v47  ;;  %1506 = vperm.xlu2 %2650, %v3745_v3   ;;  %v884_v27 = vpop.permute.xlu2 %883 }
 0x132   : > { %v816_v7 = vmul.f32 %v814_v43, %v3639_v37  ;;  %v817_v42 = vmul.f32 %v815_v45, %v3642_v61  ;;  %1440 = vperm.xlu1 %2649, %v3596_v18   ;;  %v886_v11 = vmul.f32 %v884_v27, %v3447_v48  ;;  %v887_v8 = vmul.f32 %v884_v27, %v3450_v49  ;;  %v2694_v47 = vpop.eup %2693  ;;  %v1027_v45 = vpop.permute.xlu0 %1026 }
 0x133   : > { %v481_v62 = vadd.f32 1.0, %v2694_v47  ;;  %v1029_v43 = vmul.f32 %v1027_v45, %v3386_v25  ;;  %v1030_v27 = vmul.f32 %v1027_v45, %v3389_v26 }
 0x134   : > { %v3793_v63 = vadd.f32 %v816_v7, %v808_v1  ;;  %v3795_v9 = vadd.f32 %v817_v42, %v809_v46  ;;  %v3798_v4 = vmul.f32 %v886_v11, %v3648_v30  ;;  %v3801_v37 = vmul.f32 %v887_v8, %v3650_v33  ;;  %2666 = vset.pattern.permute.xlu0 %v4721_v56  ;;  %v2696_v61 = vpop.eup %2695 }
 0x135   : > { %1580 = vperm.xlu0 %2666, %v3745_v3   ;;  %v3805_v22 = vadd.f32 1.0, %v2696_v61  ;;  %2697 = vrcp.f32 %v481_v62  ;;  %v4730_v30 = vmov 1   ;;  %vm488_vm4 = vweird.f32 %v481_v62 }
 0x137   : > { %2699 = vrcp.f32 %v3805_v22  ;;  %vm503_vm8 = vweird.f32 %v3805_v22 }
 0x138   : > { %v830_v7 = vpop.permute.xlu1 %829 }
 0x139   : > { %v832_v42 = vmul.f32 %v830_v7, %v3386_v25  ;;  %v833_v46 = vmul.f32 %v830_v7, %v3389_v26  ;;  %2653 = vset.pattern.permute.xlu2 %v4730_v30 }
 0x13a   : > { %2652 = vset.pattern.permute.xlu1 %v4730_v30  ;;  %1534 = vperm.xlu2 %2653, %v3726_v23   ;;  %v3815_v6 = vpop.permute.xlu2 %911 }
 0x13b   : > { %v834_v33 = vmul.f32 %v832_v42, %v3663_v55  ;;  %v835_v1 = vmul.f32 %v833_v46, %v3666_v59  ;;  %1526 = vperm.xlu1 %2652, %v3745_v3   ;;  %v2698_v47 = vpop.eup %2697  ;;  %v4732_v55 = vmov 21   ;;  %v1214_v46 = vpop.permute.xlu0 %1213 }
 0x13c   : > { %v484_v42 = vmul.f32 %v2698_v47, %v481_v62  ;;  %vm489_vm5 = vweird.f32 %v2698_v47 }
 0x13d   : > { %v3821_v11 = vadd.f32 %v834_v33, %v3721_v50  ;;  %v3824_v8 = vadd.f32 %v835_v1, %v3724_v10  ;;  %2671 = vset.pattern.permute.xlu0 %v4732_v55  ;;  %v3827_v59 = vpop.eup %2699  ;;  %v1216_v55 = vmul.f32 %v1214_v46, %v4727_v54  ;;  %vm490_vm6 = vmor %vm488_vm4, %vm489_vm5 }
 0x13e   : > { %1892 = vperm.xlu0 %2671, %v3726_v23   ;;  %v499_v50 = vmul.f32 %v3827_v59, %v3805_v22  ;;  %v485_v30 = vsub.f32 1.0, %v484_v42  ;;  %vm504_vm9 = vweird.f32 %v3827_v59 }
 0x13f   : > { %4731 = vst [vmem:[#allocation24_spill] sm:$0xff] %v3824_v8  ;;  %v1031_v61 = vmul.f32 %v1029_v43, %v3821_v11  ;;  %v1032_v7 = vmul.f32 %v1030_v27, %v3824_v8  ;;  %v1217_v43 = vmul.f32 %v1214_v46, %v4728_v51  ;;  %vm3864_vm10 = vmor %vm503_vm8, %vm504_vm9 }
 0x140   : > { %v500_v1 = vsub.f32 1.0, %v499_v50  ;;  %v486_v27 = vmul.f32 %v2698_v47, %v485_v30 }
 0x141   : > { %v858_v45 = vpop.permute.xlu1 %857 }
 0x142   : > { %v860_v10 = vmul.f32 %v858_v45, %v4727_v54  ;;  %v861_v33 = vmul.f32 %v858_v45, %v4728_v51  ;;  %2655 = vset.pattern.permute.xlu2 %v4719_v0  ;;  %v494_v45 = vand.u32 2147483648, %v481_v62  ;;  %v501_v50 = vmul.f32 %v3827_v59, %v500_v1 }
 0x143   : > { %2654 = vset.pattern.permute.xlu1 %v4719_v0  ;;  %1552 = vperm.xlu2 %2655, %v3726_v23   ;;  %v1019_v42 = vpop.permute.xlu2 %1018  ;;  %v487_v8 = vadd.f32 %v2698_v47, %v486_v27  ;;  %v4733_v1 = vmov 6  }
 0x144   : > { %v862_v49 = vmul.f32 %v860_v10, %v3687_v12  ;;  %v863_v48 = vmul.f32 %v861_v33, %v3690_v13  ;;  %1544 = vperm.xlu1 %2654, %v3745_v3   ;;  %v1021_v56 = vmul.f32 %v1019_v42, %v3493_v36  ;;  %v1022_v46 = vmul.f32 %v1019_v42, %v4726_v58 }
 0x145   : > { %v492_v13 = vand.u32 2147483647, %v481_v62  ;;  %v495_v33 = vor.u32 1.1754944e-38, %v494_v45  ;;  %v502_v36 = vadd.f32 %v3827_v59, %v501_v50  ;;  %v491_v58 = vsel %vm490_vm6, %v2698_v47, %v487_v8 }
 0x146   : > { %v3848_v0 = vadd.f32 %v3768_v31, %v862_v49  ;;  %v3851_v12 = vadd.f32 %v3771_v21, %v863_v48  ;;  %v1023_v30 = vmul.f32 %v1021_v56, %v3793_v63  ;;  %v1024_v10 = vmul.f32 %v1022_v46, %v3795_v9  ;;  %2672 = vset.pattern.permute.xlu0 %v4733_v1 }
 0x147   : > { %vm493_vm7 = vcmp.eq.f32.partialorder %v492_v13, 8.507059e+37  ;;  %1422 = vperm.xlu0 %2672, %v3596_v18   ;;  %v507_v21 = vand.u32 2147483647, %v3805_v22  ;;  %v506_v47 = vsel %vm3864_vm10, %v3827_v59, %v502_v36  ;;  %v509_v18 = vand.u32 2147483648, %v3805_v22  ;;  %v515_v13 = vld [vmem:[#allocation10] sm:$0xff] }
 0x148   : > { %v3860_v48 = vadd.f32 %v1031_v61, %v1023_v30  ;;  %v3862_v49 = vadd.f32 %v1032_v7, %v1024_v10  ;;  %v496_v56 = vsel %vm493_vm7, %v495_v33, %v491_v58  ;;  %v3875_v61 = vmul.f32 %v1216_v55, %v3848_v0 }
 0x149   : > { %v513_v8 = vmul.f32 %v496_v56, %v3368_v20  ;;  %vm508_vm11 = vcmp.eq.f32.partialorder %v507_v21, 8.507059e+37  ;;  %v3880_v42 = vmul.f32 %v1217_v43, %v3851_v12  ;;  %v4736_v45 = vmov 10  }
 0x14a   : > { %v876_v62 = vpop.permute.xlu1 %875  ;;  %v510_v20 = vor.u32 1.1754944e-38, %v509_v18  ;;  %v4737_v31 = vmov 23   ;;  %v914_v21 = vmul.f32 %v3815_v6, %v3514_v14  ;;  %v4739_v18 = vmov 22  }
 0x14b   : > { %v878_v7 = vmul.f32 %v876_v62, %v3386_v25  ;;  %v879_v27 = vmul.f32 %v876_v62, %v3389_v26  ;;  %2658 = vset.pattern.permute.xlu2 %v4736_v45  ;;  %992 = vmatpush.msra.mxu2 %v513_v8  ;;  %v4738_v62 = vmov 20  }
 0x14c   : > { %2657 = vset.pattern.permute.xlu1 %v4718_v57  ;;  %1652 = vperm.xlu2 %2658, %v3745_v3   ;;  %v1092_v55 = vpop.permute.xlu2 %1091  ;;  %v511_v43 = vsel %vm508_vm11, %v510_v20, %v506_v47 }
 0x14d   : > { %v880_v59 = vmul.f32 %v878_v7, %v3715_v5  ;;  %v881_v22 = vmul.f32 %v879_v27, %v3718_v15  ;;  %1570 = vperm.xlu1 %2657, %v3726_v23   ;;  %v1094_v50 = vmul.f32 %v1092_v55, %v3487_v28  ;;  %v1095_v46 = vmul.f32 %v1092_v55, %v3490_v29  ;;  %v929_v27 = vld [vmem:[#allocation10 + $0x8] sm:$0xff] }
 0x14e   : > { %v514_v15 = vmul.f32 %v511_v43, %v4725_v2  ;;  %2402 = vmatmul.msk.f32.vlgmr.msra.gmra.mxu2 %vm930_vm12, %v515_v13  ;;  %v4743_v55 = vmov 24   ;;  %v4745_v43 = vld [vmem:[#allocation29_spill] sm:$0xff] }
 0x14f   : > { %v3891_v57 = vadd.f32 %v3798_v4, %v880_v59  ;;  %v3894_v5 = vadd.f32 %v3801_v37, %v881_v22  ;;  %v1096_v30 = vmul.f32 %v1094_v50, %v3749_v17  ;;  %v1097_v28 = vmul.f32 %v1095_v46, %v3751_v35  ;;  %1616 = vperm.xlu0 %2672, %v3745_v3   ;;  %v1036_v22 = vld [vmem:[#allocation10 + $0x10] sm:$0xff] }
 0x150   : > { %1012 = vmatpush.msra.mxu3 %v514_v15  ;;  %v4746_v15 = vmov 5  }
 0x151   : > { %2403 = vmatmul.msk.f32.vlgmr.msra.gmra.mxu3 %vm930_vm12, %v515_v13 }
 0x153   : > { %v902_v29 = vpop.permute.xlu1 %901 }
 0x154   : > { %v904_v4 = vmul.f32 %v902_v29, %v3547_v32  ;;  %v905_v10 = vmul.f32 %v902_v29, %v3550_v52  ;;  %2660 = vset.pattern.permute.xlu2 %v4724_v19 }
 0x155   : > { %2659 = vset.pattern.permute.xlu1 %v4736_v45  ;;  %1670 = vperm.xlu2 %2660, %v3745_v3   ;;  %v1157_v33 = vpop.permute.xlu2 %1156 }
 0x156   : > { %v906_v2 = vmul.f32 %v904_v4, %v3739_v53  ;;  %v907_v37 = vmul.f32 %v905_v10, %v3741_v34  ;;  %1660 = vperm.xlu1 %2659, %v3726_v23   ;;  %v1159_v36 = vmul.f32 %v1157_v33, %v3421_v39  ;;  %v1160_v58 = vmul.f32 %v1157_v33, %v3424_v40 }
 0x157   : > { %2681 = vset.pattern.permute.xlu0 %v4737_v31  ;;  %v915_v39 = vmul.f32 %v3815_v6, %v3540_v24 }
 0x158   : > { %v3913_v56 = vadd.f32 %v906_v2, %v3701_v38  ;;  %v3916_v19 = vadd.f32 %v907_v37, %v3704_v16  ;;  %v1161_v53 = vmul.f32 %v1159_v36, %v3848_v0  ;;  %v1162_v34 = vmul.f32 %v1160_v58, %v3851_v12  ;;  %2022 = vperm.xlu0 %2681, %v3726_v23   ;;  %v1166_v2 = vld [vmem:[#allocation10 + $0x20] sm:$0xff]  ;;  %v4749_v36 = vld [vmem:[#allocation30_spill] sm:$0xff] }
 0x159   : > { %v916_v0 = vmul.f32 %v914_v21, %v3763_v44  ;;  %v917_v24 = vmul.f32 %v915_v39, %v3765_v60  ;;  %v4740_v60 = vld [vmem:[#allocation27_spill] sm:$0xff]  ;;  %v4748_v37 = vmov 25   ;;  %v4751_v21 = vmov 21  }
 0x15a   : > { %v4750_v58 = vld [vmem:[#allocation31_spill] sm:$0xff] }
 0x15c   : > { %v920_v40 = vpop.permute.xlu1 %919 }
 0x15d   : > { %v922_v38 = vmul.f32 %v920_v40, %v4727_v54  ;;  %v923_v16 = vmul.f32 %v920_v40, %v4728_v51  ;;  %2663 = vset.pattern.permute.xlu2 %v4738_v62 }
 0x15e   : > { %2662 = vset.pattern.permute.xlu1 %v4738_v62  ;;  %1786 = vperm.xlu2 %2663, %v3726_v23   ;;  %v1279_v12 = vpop.permute.xlu2 %1278  ;;  %v4752_v62 = vmov 13  }
 0x15f   : > { %1778 = vperm.xlu1 %2662, %v3745_v3   ;;  %v924_v14 = vmul.f32 %v922_v38, %v3793_v63  ;;  %v925_v6 = vmul.f32 %v923_v16, %v3795_v9  ;;  %v1281_v54 = vmul.f32 %v1279_v12, %v3386_v25  ;;  %v1282_v51 = vmul.f32 %v1279_v12, %v3389_v26  ;;  %v1231_v38 = vld [vmem:[#allocation10 + $0x28] sm:$0xff] }
 0x160   : > { %2686 = vset.pattern.permute.xlu0 %v4739_v18  ;;  %v4741_v9 = vmov 12  }
 0x161   : > { %v926_v8 = vadd.f32 %v924_v14, %v916_v0  ;;  %v927_v47 = vadd.f32 %v925_v6, %v917_v24  ;;  %v3940_v44 = vmul.f32 %v1281_v54, %v3891_v57  ;;  %v3943_v7 = vmul.f32 %v1282_v51, %v3894_v5  ;;  %1949 = vperm.xlu0 %2686, %v3745_v3   ;;  %v1296_v14 = vld [vmem:[#allocation10 + $0x30] sm:$0xff] }
 0x162   : > { %v4754_v24 = vmov 7  }
 0x163   : > { %949 = vmatpush.msra.mxu0 %v926_v8  ;;  %969 = vmatpush.msra.mxu1 %v927_v47  ;;  %v4755_v8 = vmov 15  }
 0x164   : > { %2400 = vmatmul.msk.f32.vlgmr.msra.gmra.mxu0 %vm930_vm12, %v929_v27  ;;  %2401 = vmatmul.msk.f32.vlgmr.msra.gmra.mxu1 %vm930_vm12, %v929_v27 }
 0x165   : > { %1055 = vmatpush.msrb.mxu0 %v3860_v48  ;;  %1075 = vmatpush.msrb.mxu1 %v3862_v49  ;;  %v1084_v25 = vpop.permute.xlu1 %1083  ;;  %v4742_v49 = vld [vmem:[#allocation24_spill] sm:$0xff] }
 0x166   : > { %v1086_v26 = vmul.f32 %v1084_v25, %v3427_v41  ;;  %v1087_v63 = vmul.f32 %v1084_v25, %v4740_v60  ;;  %2665 = vset.pattern.permute.xlu2 %v4741_v9  ;;  %v1101_v41 = vld [vmem:[#allocation10 + $0x18] sm:$0xff] }
 0x167   : > { %2664 = vset.pattern.permute.xlu1 %v4741_v9  ;;  %1696 = vperm.xlu2 %2665, %v3726_v23  }
 0x168   : > { %1688 = vperm.xlu1 %2664, %v3745_v3   ;;  %v1088_v48 = vmul.f32 %v1086_v26, %v3821_v11  ;;  %v1089_v45 = vmul.f32 %v1087_v63, %v4742_v49  ;;  %v4744_v11 = vld [vmem:[#allocation28_spill] sm:$0xff] }
 0x169   : > { %2691 = vset.pattern.permute.xlu0 %v4743_v55 }
 0x16a   : > { %v1098_v20 = vadd.f32 %v1096_v30, %v1088_v48  ;;  %v1099_v59 = vadd.f32 %v1097_v28, %v1089_v45  ;;  %2087 = vperm.xlu0 %2691, %v3726_v23   ;;  %v4747_v30 = vmov 4  }
 0x16c   : > { %1120 = vmatpush.msrb.mxu2 %v1098_v20  ;;  %1140 = vmatpush.msrb.mxu3 %v1099_v59 }
 0x16d   : > { %2404 = vmatmul.msk.f32.vlgmr.msrb.gmra.mxu0 %vm930_vm12, %v1036_v22  ;;  %2405 = vmatmul.msk.f32.vlgmr.msrb.gmra.mxu1 %vm930_vm12, %v1036_v22 }
 0x16e   : > { %v1149_v50 = vpop.permute.xlu1 %1148  ;;  %2406 = vmatmul.msk.f32.vlgmr.msrb.gmra.mxu2 %vm930_vm12, %v1101_v41  ;;  %2407 = vmatmul.msk.f32.vlgmr.msrb.gmra.mxu3 %vm930_vm12, %v1101_v41 }
 0x16f   : > { %v1151_v46 = vmul.f32 %v1149_v50, %v4744_v11  ;;  %v1152_v13 = vmul.f32 %v1149_v50, %v4745_v43  ;;  %2668 = vset.pattern.permute.xlu2 %v4746_v15 }
 0x170   : > { %2667 = vset.pattern.permute.xlu1 %v4747_v30  ;;  %1598 = vperm.xlu2 %2668, %v3745_v3  }
 0x171   : > { %v1153_v28 = vmul.f32 %v1151_v46, %v3749_v17  ;;  %v1154_v29 = vmul.f32 %v1152_v13, %v3751_v35  ;;  %1588 = vperm.xlu1 %2667, %v3726_v23  }
 0x172   : > { %2692 = vset.pattern.permute.xlu0 %v4748_v37 }
 0x173   : > { %v1163_v4 = vadd.f32 %v1161_v53, %v1153_v28  ;;  %v1164_v10 = vadd.f32 %v1162_v34, %v1154_v29 }
 0x175   : > { %1185 = vmatpush.msra.mxu0 %v1163_v4  ;;  %1205 = vmatpush.msra.mxu1 %v1164_v10 }
 0x176   : > { %2408 = vmatmul.msk.f32.vlgmr.msra.gmra.mxu0 %vm930_vm12, %v1166_v2  ;;  %2409 = vmatmul.msk.f32.vlgmr.msra.gmra.mxu1 %vm930_vm12, %v1166_v2 }
 0x177   : > { %v1222_v33 = vpop.permute.xlu1 %1221 }
 0x178   : > { %v1224_v17 = vmul.f32 %v1222_v33, %v4749_v36  ;;  %v1225_v35 = vmul.f32 %v1222_v33, %v4750_v58  ;;  %2670 = vset.pattern.permute.xlu2 %v4751_v21 }
 0x179   : > { %2669 = vset.pattern.permute.xlu1 %v4746_v15  ;;  %1884 = vperm.xlu2 %2670, %v3745_v3  }
 0x17a   : > { %v1226_v53 = vmul.f32 %v1224_v17, %v3891_v57  ;;  %v1227_v34 = vmul.f32 %v1225_v35, %v3894_v5  ;;  %1606 = vperm.xlu1 %2669, %v3726_v23  }
 0x17c   : > { %v1228_v39 = vadd.f32 %v1226_v53, %v3875_v61  ;;  %v1229_v40 = vadd.f32 %v1227_v34, %v3880_v42 }
 0x17e   : > { %1250 = vmatpush.msra.mxu2 %v1228_v39  ;;  %1270 = vmatpush.msra.mxu3 %v1229_v40 }
 0x17f   : > { %2410 = vmatmul.msk.f32.vlgmr.msra.gmra.mxu2 %vm930_vm12, %v1231_v38  ;;  %2411 = vmatmul.msk.f32.vlgmr.msra.gmra.mxu3 %vm930_vm12, %v1231_v38 }
 0x180   : > { %v1287_v16 = vpop.permute.xlu1 %1286 }
 0x181   : > { %v1289_v57 = vmul.f32 %v1287_v16, %v3547_v32  ;;  %v1290_v5 = vmul.f32 %v1287_v16, %v3550_v52  ;;  %2674 = vset.pattern.permute.xlu2 %v4752_v62  ;;  %v3999_v32 = vpop.permute.xlu2 %1386  ;;  %v4753_v52 = vmov 14  }
 0x182   : > { %2673 = vset.pattern.permute.xlu1 %v4752_v62  ;;  %1714 = vperm.xlu2 %2674, %v3726_v23  }
 0x183   : > { %v1291_v61 = vmul.f32 %v1289_v57, %v3913_v56  ;;  %v1292_v42 = vmul.f32 %v1290_v5, %v3916_v19  ;;  %1706 = vperm.xlu1 %2673, %v3745_v3  }
 0x185   : > { %v1293_v0 = vadd.f32 %v1291_v61, %v3940_v44  ;;  %v1294_v12 = vadd.f32 %v1292_v42, %v3943_v7 }
 0x187   : > { %1315 = vmatpush.msrb.mxu0 %v1293_v0  ;;  %1335 = vmatpush.msrb.mxu1 %v1294_v12 }
 0x188   : > { %2412 = vmatmul.msk.f32.vlgmr.msrb.gmra.mxu0 %vm930_vm12, %v1296_v14  ;;  %2413 = vmatmul.msk.f32.vlgmr.msrb.gmra.mxu1 %vm930_vm12, %v1296_v14 }
 0x189   : > { %v4003_v56 = vpop.permute.xlu1 %1398  ;;  %v4007_v19 = vpop.permute.xlu2 %1404 }
 0x18a   : > { %2676 = vset.pattern.permute.xlu2 %v4753_v52 }
 0x18b   : > { %2675 = vset.pattern.permute.xlu1 %v4753_v52  ;;  %1732 = vperm.xlu2 %2676, %v3726_v23  }
 0x18c   : > { %1724 = vperm.xlu1 %2675, %v3745_v3  }
 0x191   : > { %v4015_v54 = vpop.permute.xlu2 %1416 }
 0x192   : > { %v4013_v6 = vpop.permute.xlu1 %1410 }
 0x193   : > { %2678 = vset.pattern.permute.xlu2 %v4754_v24 }
 0x194   : > { %2677 = vset.pattern.permute.xlu1 %v4733_v1  ;;  %1634 = vperm.xlu2 %2678, %v3745_v3  }
 0x195   : > { %1624 = vperm.xlu1 %2677, %v3726_v23  }
 0x199   : > { %v4025_v1 = vpop.permute.xlu2 %1434 }
 0x19b   : > { %v4021_v51 = vpop.permute.xlu1 %1428 }
 0x19c   : > { %2680 = vset.pattern.permute.xlu2 %v4737_v31  ;;  %v4756_v31 = vmov 16  }
 0x19d   : > { %2679 = vset.pattern.permute.xlu1 %v4754_v24  ;;  %2014 = vperm.xlu2 %2680, %v3745_v3  }
 0x19e   : > { %1642 = vperm.xlu1 %2679, %v3726_v23  }
 0x1a1   : > { %v4035_v44 = vpop.permute.xlu2 %1506 }
 0x1a4   : > { %v4029_v47 = vpop.permute.xlu1 %1440 }
 0x1a5   : > { %2683 = vset.pattern.permute.xlu2 %v4755_v8 }
 0x1a6   : > { %2682 = vset.pattern.permute.xlu1 %v4755_v8  ;;  %1750 = vperm.xlu2 %2683, %v3726_v23  }
 0x1a7   : > { %1742 = vperm.xlu1 %2682, %v3745_v3  }
 0x1a9   : > { %v4043_v27 = vpop.permute.xlu2 %1534 }
 0x1ad   : > { %v4037_v7 = vpop.permute.xlu1 %1526 }
 0x1ae   : > { %2685 = vset.pattern.permute.xlu2 %v4756_v31 }
 0x1af   : > { %2684 = vset.pattern.permute.xlu1 %v4756_v31  ;;  %1768 = vperm.xlu2 %2685, %v3726_v23  }
 0x1b0   : > { %1760 = vperm.xlu1 %2684, %v3745_v3  }
 0x1b1   : > { %v4051_v26 = vpop.permute.xlu2 %1552 }
 0x1b6   : > { %v4045_v25 = vpop.permute.xlu1 %1544 }
 0x1b7   : > { %2688 = vset.pattern.permute.xlu2 %v4748_v37 }
 0x1b8   : > { %2687 = vset.pattern.permute.xlu1 %v4739_v18  ;;  %2144 = vperm.xlu2 %2688, %v3745_v3   ;;  %v4055_v18 = vpop.permute.xlu0 %1392 }
 0x1b9   : > { %1957 = vperm.xlu1 %2687, %v3726_v23   ;;  %v4057_v63 = vpop.permute.xlu2 %1652 }
 0x1bf   : > { %v4053_v60 = vpop.permute.xlu1 %1570 }
 0x1c0   : > { %2690 = vset.pattern.permute.xlu2 %v4743_v55  ;;  %v4061_v48 = vpop.permute.xlu0 %1516 }
 0x1c1   : > { %2689 = vset.pattern.permute.xlu1 %v4748_v37  ;;  %2079 = vperm.xlu2 %2690, %v3745_v3   ;;  %v4063_v49 = vpop.permute.xlu2 %1670 }
 0x1c2   : > { %2152 = vperm.xlu1 %2689, %v3726_v23  }
 0x1c8   : > { %v4059_v9 = vpop.permute.xlu1 %1660  ;;  %v4067_v20 = vpop.permute.xlu0 %1562 }
 0x1c9   : > { %v4069_v3 = vpop.permute.xlu2 %1786 }
 0x1d0   : > { %v4073_v55 = vpop.permute.xlu0 %1678 }
 0x1d1   : > { %v4065_v45 = vpop.permute.xlu1 %1778  ;;  %v4075_v41 = vpop.permute.xlu2 %1696 }
 0x1d2   : > { %v994_v50 = vpop.f32.mrf.mxu2 }
 0x1d4   : > { %v1014_v11 = vpop.f32.mrf.mxu3 }
 0x1d8   : > { %v4079_v15 = vpop.permute.xlu0 %1580 }
 0x1d9   : > { %4758 = vst [vmem:[#allocation25_spill] sm:$0xff] %v4079_v15  ;;  %v4081_v29 = vpop.permute.xlu2 %1598 }
 0x1da   : > { %v4071_v23 = vpop.permute.xlu1 %1688 }
 0x1e0   : > { %v4085_v21 = vpop.permute.xlu0 %1892 }
 0x1e1   : > { %v951_v59 = vpop.f32.mrf.mxu0  ;;  %v971_v22 = vpop.f32.mrf.mxu1 }
 0x1e2   : > { %v995_v30 = vadd.f32 %v994_v50, %v951_v59  ;;  %v1015_v28 = vadd.f32 %v1014_v11, %v971_v22  ;;  %v4087_v53 = vpop.permute.xlu2 %1884 }
 0x1e3   : > { %v4077_v46 = vpop.permute.xlu1 %1588 }
 0x1e4   : > { %4757 = vst [vmem:[#allocation32_spill] sm:$0xff] %v4077_v46 }
 0x1e8   : > { %v1423_v12 = vpop.permute.xlu0 %1422 }
 0x1ea   : > { %v1057_v43 = vpop.f32.mrf.mxu0  ;;  %v1077_v13 = vpop.f32.mrf.mxu1 }
 0x1eb   : > { %v1080_v2 = vadd.f32 %v1057_v43, %v995_v30  ;;  %v1081_v37 = vadd.f32 %v1077_v13, %v1015_v28  ;;  %v4101_v24 = vpop.permute.xlu2 %1714 }
 0x1ec   : > { %v4083_v33 = vpop.permute.xlu1 %1606  ;;  %4763 = vst [vmem:[#allocation29_spill] sm:$0xff] %v4101_v24 }
 0x1f1   : > { %v1122_v4 = vpop.f32.mrf.mxu2  ;;  %v1142_v10 = vpop.f32.mrf.mxu3 }
 0x1f2   : > { %v1145_v58 = vadd.f32 %v1122_v4, %v1080_v2  ;;  %v1146_v35 = vadd.f32 %v1142_v10, %v1081_v37 }
 0x1f3   : > { %v1187_v36 = vpop.f32.mrf.mxu0  ;;  %v1207_v17 = vpop.f32.mrf.mxu1 }
 0x1f4   : > { %v1210_v34 = vadd.f32 %v1187_v36, %v1145_v58  ;;  %v1211_v39 = vadd.f32 %v1207_v17, %v1146_v35  ;;  %v4143_v4 = vpop.permute.xlu2 %1732 }
 0x1f5   : > { %v4089_v5 = vpop.permute.xlu1 %1706  ;;  %4771 = vst [vmem:[#allocation37_spill] sm:$0xff] %v4143_v4 }
 0x1f6   : > { %4759 = vst [vmem:[#allocation26_spill] sm:$0xff] %v4089_v5 }
 0x1fe   : > { %v4111_v59 = vpop.permute.xlu1 %1724 }
 0x1ff   : > { %4766 = vst [vmem:[#allocation33_spill] sm:$0xff] %v4111_v59 }
 0x202   : > { %v1252_v40 = vpop.f32.mrf.mxu2  ;;  %v1272_v38 = vpop.f32.mrf.mxu3 }
 0x203   : > { %v1275_v16 = vadd.f32 %v1252_v40, %v1210_v34  ;;  %v1276_v57 = vadd.f32 %v1272_v38, %v1211_v39  ;;  %v1617_v34 = vpop.permute.xlu0 %1616 }
 0x205   : > { %v1317_v62 = vpop.f32.mrf.mxu0  ;;  %v1337_v61 = vpop.f32.mrf.mxu1 }
 0x206   : > { %v4091_v42 = vadd.f32 %v1317_v62, %v1275_v16  ;;  %v4093_v0 = vadd.f32 %v1337_v61, %v1276_v57 }
 0x207   : > { %v1625_v16 = vpop.permute.xlu1 %1624 }
 0x208   : > { %4760 = vst [vmem:[#allocation27_spill] sm:$0xff] %v4091_v42  ;;  %v4096_v14 = vsub.f32 %v4091_v42, %v1423_v12  ;;  %v4099_v52 = vsub.f32 %v4093_v0, %v1423_v12  ;;  %v4105_v8 = vsub.f32 %v4091_v42, %v4021_v51  ;;  %v4109_v31 = vsub.f32 %v4093_v0, %v4021_v51 }
 0x209   : > { %v4115_v22 = vsub.f32 %v4091_v42, %v4025_v1  ;;  %v4119_v50 = vsub.f32 %v4093_v0, %v4025_v1  ;;  %v4769_v51 = vmov 0.0   ;;  %v4137_v1 = vsub.f32 %v4091_v42, %v4029_v47 }
 0x20a   : > { %4761 = vst [vmem:[#allocation24_spill] sm:$0xff] %v4096_v14  ;;  %vm1469_vm13 = vcmp.ge.f32.partialorder %v4096_v14, 0.0  ;;  %vm1470_vm14 = vcmp.ge.f32.partialorder %v4099_v52, 0.0  ;;  %vm1473_vm15 = vcmp.ge.f32.partialorder %v4105_v8, 0.0  ;;  %vm1474_vm0 = vcmp.ge.f32.partialorder %v4109_v31, 0.0 }
 0x20b   : > { %4762 = vst [vmem:[#allocation28_spill] sm:$0xff] %v4099_v52  ;;  %v4126_v11 = vsel %vm1469_vm13, 1.0, %v4769_v51  ;;  %v4129_v43 = vsel %vm1470_vm14, 1.0, %v4769_v51  ;;  %v1475_v13 = vsel %vm1473_vm15, 1.0, %v4769_v51  ;;  %v1476_v30 = vsel %vm1474_vm0, 1.0, %v4769_v51 }
 0x20c   : > { %4764 = vst [vmem:[#allocation30_spill] sm:$0xff] %v4105_v8  ;;  %vm1477_vm1 = vcmp.ge.f32.partialorder %v4115_v22, 0.0  ;;  %vm1478_vm2 = vcmp.ge.f32.partialorder %v4119_v50, 0.0  ;;  %v4141_v28 = vsub.f32 %v4093_v0, %v4029_v47  ;;  %v4152_v37 = vsub.f32 %v4126_v11, %v1475_v13 }
 0x20d   : > { %4765 = vst [vmem:[#allocation31_spill] sm:$0xff] %v4109_v31  ;;  %v4146_v10 = vsel %vm1477_vm1, 1.0, %v4769_v51  ;;  %v4149_v2 = vsel %vm1478_vm2, 1.0, %v4769_v51  ;;  %v4155_v36 = vsub.f32 %v4129_v43, %v1476_v30  ;;  %v4159_v17 = vsub.f32 %v4091_v42, %v4055_v18 }
 0x20e   : > { %4767 = vst [vmem:[#allocation34_spill] sm:$0xff] %v4115_v22  ;;  %v4163_v47 = vsub.f32 %v4093_v0, %v4055_v18  ;;  %v4167_v58 = vsub.f32 %v4091_v42, %v4003_v56  ;;  %v4171_v35 = vsub.f32 %v4093_v0, %v4003_v56  ;;  %v4175_v39 = vsub.f32 %v4091_v42, %v4007_v19 }
 0x20f   : > { %4768 = vst [vmem:[#allocation35_spill] sm:$0xff] %v4119_v50  ;;  %v4179_v40 = vsub.f32 %v4093_v0, %v4007_v19  ;;  %v4183_v18 = vsub.f32 %v4091_v42, %v4013_v6  ;;  %v4187_v38 = vsub.f32 %v4093_v0, %v4013_v6  ;;  %v1619_v56 = vmul.f32 %v1617_v34, %v4096_v14 }
 0x210   : > { %4770 = vst [vmem:[#allocation36_spill] sm:$0xff] %v4137_v1  ;;  %v1620_v57 = vmul.f32 %v1617_v34, %v4099_v52  ;;  %v4193_v62 = vsub.f32 %v4091_v42, %v4015_v54  ;;  %v4197_v19 = vsub.f32 %v4093_v0, %v4015_v54  ;;  %v4200_v61 = vsub.f32 %v1475_v13, %v4146_v10 }
 0x211   : > { %4772 = vst [vmem:[#allocation38_spill] sm:$0xff] %v4146_v10  ;;  %v4203_v12 = vsub.f32 %v1476_v30, %v4149_v2  ;;  %v1627_v6 = vmul.f32 %v1625_v16, %v4115_v22  ;;  %v1628_v5 = vmul.f32 %v1625_v16, %v4119_v50  ;;  %vm1449_vm3 = vcmp.ge.f32.partialorder %v4159_v17, 0.0 }
 0x212   : > { %4773 = vst [vmem:[#allocation39_spill] sm:$0xff] %v4149_v2  ;;  %vm1450_vm4 = vcmp.ge.f32.partialorder %v4163_v47, 0.0  ;;  %vm1453_vm5 = vcmp.ge.f32.partialorder %v4167_v58, 0.0  ;;  %vm1454_vm6 = vcmp.ge.f32.partialorder %v4171_v35, 0.0  ;;  %vm1457_vm7 = vcmp.ge.f32.partialorder %v4175_v39, 0.0  ;;  %v4231_v2 = vpop.permute.xlu2 %1634 }
 0x213   : > { %4774 = vst [vmem:[#allocation40_spill] sm:$0xff] %v4175_v39  ;;  %vm1458_vm8 = vcmp.ge.f32.partialorder %v4179_v40, 0.0  ;;  %vm1461_vm9 = vcmp.ge.f32.partialorder %v4183_v18, 0.0  ;;  %vm1462_vm10 = vcmp.ge.f32.partialorder %v4187_v38, 0.0  ;;  %v4216_v54 = vmul.f32 %v1619_v56, %v4152_v37 }
 0x214   : > { %4775 = vst [vmem:[#allocation41_spill] sm:$0xff] %v4200_v61  ;;  %vm1481_vm11 = vcmp.ge.f32.partialorder %v4137_v1, 0.0  ;;  %vm1465_vm13 = vcmp.ge.f32.partialorder %v4193_v62, 0.0  ;;  %vm1466_vm14 = vcmp.ge.f32.partialorder %v4197_v19, 0.0  ;;  %v1451_v13 = vsel %vm1449_vm3, 1.0, %v4769_v51 }
 0x215   : > { %4776 = vst [vmem:[#allocation42_spill] sm:$0xff] %v4203_v12  ;;  %v4223_v30 = vsel %vm1450_vm4, 1.0, %v4769_v51  ;;  %v1455_v34 = vsel %vm1453_vm5, 1.0, %v4769_v51  ;;  %v1456_v16 = vsel %vm1454_vm6, 1.0, %v4769_v51  ;;  %v1459_v50 = vsel %vm1457_vm7, 1.0, %v4769_v51 }
 0x216   : > { %4777 = vst [vmem:[#allocation43_spill] sm:$0xff] %v4216_v54  ;;  %v1460_v56 = vsel %vm1458_vm8, 1.0, %v4769_v51  ;;  %v1463_v22 = vsel %vm1461_vm9, 1.0, %v4769_v51  ;;  %v1464_v54 = vsel %vm1462_vm10, 1.0, %v4769_v51  ;;  %v4234_v10 = vmul.f32 %v1620_v57, %v4155_v36 }
 0x217   : > { %4778 = vst [vmem:[#allocation44_spill] sm:$0xff] %v4231_v2  ;;  %v4237_v24 = vmul.f32 %v1627_v6, %v4200_v61  ;;  %v1467_v4 = vsel %vm1465_vm13, 1.0, %v4769_v51  ;;  %v1468_v59 = vsel %vm1466_vm14, 1.0, %v4769_v51  ;;  %v4242_v52 = vmul.f32 %v1628_v5, %v4203_v12 }
 0x218   : > { %4779 = vst [vmem:[#allocation45_spill] sm:$0xff] %v4234_v10  ;;  %v4247_v46 = vsel %vm1481_vm11, 1.0, %v4769_v51  ;;  %v4251_v14 = vmul.f32 %v4231_v2, %v4105_v8  ;;  %v1487_v57 = vsub.f32 %v1451_v13, %v1455_v34  ;;  %v4254_v6 = vsub.f32 %v4223_v30, %v1456_v16 }
 0x219   : > { %4780 = vst [vmem:[#allocation46_spill] sm:$0xff] %v4237_v24  ;;  %v1489_v61 = vsub.f32 %v1455_v34, %v1459_v50  ;;  %v1491_v10 = vsub.f32 %v1459_v50, %v1463_v22  ;;  %v1492_v24 = vsub.f32 %v1460_v56, %v1464_v54  ;;  %v4256_v15 = vsub.f32 %v1456_v16, %v1460_v56 }
 0x21a   : > { %4781 = vst [vmem:[#allocation47_spill] sm:$0xff] %v4242_v52  ;;  %v4258_v5 = vsub.f32 %v1463_v22, %v1467_v4  ;;  %v4260_v12 = vsub.f32 %v1464_v54, %v1468_v59  ;;  %v4263_v52 = vsub.f32 %v1467_v4, %v4126_v11  ;;  %v1556_v34 = vmul.f32 %v4051_v26, %v4187_v38 }
 0x21b   : > { %4782 = vst [vmem:[#allocation48_spill] sm:$0xff] %v4247_v46  ;;  %v4266_v46 = vsub.f32 %v1468_v59, %v4129_v43  ;;  %v1565_v50 = vmul.f32 %v4067_v20, %v4175_v39  ;;  %v1566_v22 = vmul.f32 %v4067_v20, %v4179_v40  ;;  %v1573_v54 = vmul.f32 %v4053_v60, %v4193_v62 }
 0x21c   : > { %4783 = vst [vmem:[#allocation49_spill] sm:$0xff] %v4251_v14  ;;  %v1555_v14 = vmul.f32 %v4051_v26, %v4183_v18  ;;  %v1574_v11 = vmul.f32 %v4053_v60, %v4197_v19  ;;  %v1601_v59 = vmul.f32 %v4081_v29, %v4193_v62  ;;  %v4282_v4 = vmul.f32 %v1556_v34, %v1492_v24 }
 0x21d   : > { %4784 = vst [vmem:[#allocation50_spill] sm:$0xff] %v4258_v5  ;;  %v1602_v26 = vmul.f32 %v4081_v29, %v4197_v19  ;;  %v1389_v16 = vsub.f32 %v4091_v42, %v3999_v32  ;;  %v4288_v56 = vmul.f32 %v1565_v50, %v1491_v10  ;;  %v4290_v20 = vmul.f32 %v1566_v22, %v1492_v24 }
 0x21e   : > { %4785 = vst [vmem:[#allocation51_spill] sm:$0xff] %v4260_v12  ;;  %v1557_v43 = vmul.f32 %v1555_v14, %v1491_v10  ;;  %v4293_v2 = vmul.f32 %v1573_v54, %v4258_v5  ;;  %v1519_v60 = vmul.f32 %v4061_v48, %v4167_v58  ;;  %v4298_v14 = vmul.f32 %v1574_v11, %v4260_v12  ;;  %v4311_v12 = vpop.permute.xlu1 %1642 }
 0x21f   : > { %vm1445_vm15 = vcmp.ge.f32.partialorder %v1389_v16, 0.0  ;;  %v1529_v29 = vmul.f32 %v4037_v7, %v4159_v17  ;;  %v1537_v34 = vmul.f32 %v4043_v27, %v4175_v39  ;;  %v4305_v10 = vmul.f32 %v1601_v59, %v4263_v52  ;;  %4787 = vst [vmem:[#allocation53_spill] sm:$0xff] %v4311_v12 }
 0x220   : > { %v1447_v24 = vsel %vm1445_vm15, 1.0, %v4769_v51  ;;  %v1509_v50 = vmul.f32 %v4035_v44, %v1389_v16  ;;  %v1521_v22 = vmul.f32 %v1519_v60, %v1487_v57  ;;  %v1547_v11 = vmul.f32 %v4045_v25, %v4167_v58 }
 0x221   : > { %4786 = vst [vmem:[#allocation52_spill] sm:$0xff] %v4305_v10  ;;  %v1485_v54 = vsub.f32 %v1447_v24, %v1451_v13  ;;  %v1531_v42 = vmul.f32 %v1529_v29, %v1487_v57  ;;  %v1539_v1 = vmul.f32 %v1537_v34, %v1489_v61  ;;  %v4314_v5 = vmul.f32 %v1602_v26, %v4266_v46 }
 0x222   : > { %v1609_v59 = vmul.f32 %v4083_v33, %v4105_v8  ;;  %v1610_v10 = vmul.f32 %v4083_v33, %v4109_v31  ;;  %v1663_v60 = vmul.f32 %v4059_v9, %v4175_v39  ;;  %v1549_v29 = vmul.f32 %v1547_v11, %v1489_v61  ;;  %v4340_v61 = vpop.permute.xlu2 %2014 }
 0x223   : > { %v1511_v13 = vmul.f32 %v1509_v50, %v1485_v54  ;;  %v1541_v57 = vadd.f32 %v1539_v1, %v1531_v42  ;;  %v1673_v34 = vmul.f32 %v4063_v49, %v4159_v17  ;;  %v1655_v12 = vmul.f32 %v4057_v63, %v1389_v16 }
 0x224   : > { %v4325_v24 = vmul.f32 %v1609_v59, %v4152_v37  ;;  %v4328_v26 = vmul.f32 %v1610_v10, %v4155_v36  ;;  %v1681_v33 = vmul.f32 %v4073_v55, %v4183_v18  ;;  %v1559_v8 = vadd.f32 %v1557_v43, %v1549_v29 }
 0x225   : > { %v1523_v31 = vadd.f32 %v1521_v22, %v1511_v13  ;;  %v1665_v39 = vmul.f32 %v1663_v60, %v1541_v57  ;;  %v1675_v50 = vmul.f32 %v1673_v34, %v1541_v57  ;;  %v1781_v42 = vmul.f32 %v4065_v45, %v1389_v16 }
 0x226   : > { %v1789_v1 = vmul.f32 %v4069_v3, %v4183_v18  ;;  %v1390_v37 = vsub.f32 %v4093_v0, %v3999_v32  ;;  %v1530_v36 = vmul.f32 %v4037_v7, %v4163_v47  ;;  %v1683_v54 = vmul.f32 %v1681_v33, %v1559_v8 }
 0x227   : > { %v1657_v10 = vmul.f32 %v1655_v12, %v1523_v31  ;;  %v1520_v43 = vmul.f32 %v4061_v48, %v4171_v35  ;;  %v1538_v22 = vmul.f32 %v4043_v27, %v4179_v40  ;;  %v1548_v32 = vmul.f32 %v4045_v25, %v4171_v35 }
 0x228   : > { %vm1446_vm0 = vcmp.ge.f32.partialorder %v1390_v37, 0.0  ;;  %v1510_v16 = vmul.f32 %v4035_v44, %v1390_v37  ;;  %v1532_v11 = vmul.f32 %v1530_v36, %v4254_v6  ;;  %v1685_v7 = vadd.f32 %v1683_v54, %v1675_v50 }
 0x229   : > { %v1667_v59 = vadd.f32 %v1665_v39, %v1657_v10  ;;  %v1448_v60 = vsel %vm1446_vm0, 1.0, %v4769_v51  ;;  %v1540_v31 = vmul.f32 %v1538_v22, %v4256_v15  ;;  %v1522_v48 = vmul.f32 %v1520_v43, %v4254_v6  ;;  %v4359_v39 = vpop.permute.xlu1 %1742 }
 0x22a   : > { %v1486_v12 = vsub.f32 %v1448_v60, %v4223_v30  ;;  %v1550_v27 = vmul.f32 %v1548_v32, %v4256_v15  ;;  %v1664_v44 = vmul.f32 %v4059_v9, %v4179_v40  ;;  %v1791_v57 = vmul.f32 %v1789_v1, %v1685_v7  ;;  %v4386_v22 = vpop.permute.xlu2 %1750 }
 0x22b   : > { %v1783_v13 = vmul.f32 %v1781_v42, %v1667_v59  ;;  %v1542_v29 = vadd.f32 %v1540_v31, %v1532_v11  ;;  %v1674_v25 = vmul.f32 %v4063_v49, %v4163_v47  ;;  %v1656_v30 = vmul.f32 %v4057_v63, %v1390_v37  ;;  %v1796_v42 = vld [vmem:[#allocation16 + $0x8] sm:$0xff] }
 0x22c   : > { %v1512_v34 = vmul.f32 %v1510_v16, %v1486_v12  ;;  %v1560_v33 = vadd.f32 %v4282_v4, %v1550_v27  ;;  %v1682_v6 = vmul.f32 %v4073_v55, %v4187_v38  ;;  %v1782_v9 = vmul.f32 %v4065_v45, %v1390_v37  ;;  %v4790_v27 = vld [vmem:[#allocation32_spill] sm:$0xff] }
 0x22d   : > { %v1793_v15 = vadd.f32 %v1791_v57, %v1783_v13  ;;  %v1666_v50 = vmul.f32 %v1664_v44, %v1542_v29  ;;  %v1676_v36 = vmul.f32 %v1674_v25, %v1542_v29  ;;  %vm1482_vm1 = vcmp.ge.f32.partialorder %v4141_v28, 0.0  ;;  %v4791_v13 = vld [vmem:[#allocation28_spill] sm:$0xff]  ;;  %v4792_v25 = vld [vmem:[#allocation50_spill] sm:$0xff] }
 0x22e   : > { %v1524_v1 = vadd.f32 %v1522_v48, %v1512_v34  ;;  %v1684_v49 = vmul.f32 %v1682_v6, %v1560_v33  ;;  %v4369_v10 = vadd.f32 %v4293_v2, %v4288_v56  ;;  %v1691_v63 = vmul.f32 %v4071_v23, %v4167_v58  ;;  %v4789_v48 = vld [vmem:[#allocation24_spill] sm:$0xff] }
 0x22f   : > { %1815 = vmatpush.msrb.mxu2 %v1793_v15  ;;  %v1790_v55 = vmul.f32 %v4069_v3, %v4187_v38  ;;  %v1699_v4 = vmul.f32 %v4075_v41, %v4193_v62  ;;  %v1887_v45 = vmul.f32 %v4087_v53, %v4159_v17  ;;  %v4381_v37 = vadd.f32 %v4298_v14, %v4290_v20 }
 0x230   : > { %v1658_v54 = vmul.f32 %v1656_v30, %v1524_v1  ;;  %v1686_v2 = vadd.f32 %v1684_v49, %v1676_v36  ;;  %v1693_v56 = vmul.f32 %v1691_v63, %v1559_v8  ;;  %v1692_v43 = vmul.f32 %v4071_v23, %v4171_v35  ;;  %2416 = vmatmul.msk.f32.vlgmr.msrb.gmra.mxu2 %vm930_vm12, %v1796_v42  ;;  %v4794_v36 = vld [vmem:[#allocation52_spill] sm:$0xff] }
 0x231   : > { %v1701_v3 = vmul.f32 %v1699_v4, %v4369_v10  ;;  %v1889_v16 = vmul.f32 %v1887_v45, %v1685_v7  ;;  %v1895_v17 = vmul.f32 %v4085_v21, %v4193_v62  ;;  %v1700_v20 = vmul.f32 %v4075_v41, %v4197_v19  ;;  %v4788_v7 = vld [vmem:[#allocation25_spill] sm:$0xff] }
 0x232   : > { %v1668_v14 = vadd.f32 %v1666_v50, %v1658_v54  ;;  %v1792_v11 = vmul.f32 %v1790_v55, %v1686_v2  ;;  %v1694_v32 = vmul.f32 %v1692_v43, %v1560_v33  ;;  %v1888_v8 = vmul.f32 %v4087_v53, %v4163_v47  ;;  %v4793_v33 = vld [vmem:[#allocation51_spill] sm:$0xff]  ;;  %v4415_v50 = vpop.permute.xlu1 %1760 }
 0x233   : > { %v4395_v23 = vadd.f32 %v1701_v3, %v1693_v56  ;;  %v1702_v59 = vmul.f32 %v1700_v20, %v4381_v37  ;;  %v1896_v60 = vmul.f32 %v4085_v21, %v4197_v19  ;;  %v1583_v31 = vmul.f32 %v4788_v7, %v4183_v18  ;;  %v4798_v56 = vld [vmem:[#allocation31_spill] sm:$0xff]  ;;  %v4799_v3 = vld [vmem:[#allocation36_spill] sm:$0xff]  ;;  %v4801_v20 = vld [vmem:[#allocation29_spill] sm:$0xff] }
 0x234   : > { %v1784_v12 = vmul.f32 %v1782_v9, %v1668_v14  ;;  %v1584_v41 = vmul.f32 %v4788_v7, %v4187_v38  ;;  %v1591_v44 = vmul.f32 %v4790_v27, %v4789_v48  ;;  %v1592_v53 = vmul.f32 %v4790_v27, %v4791_v13 }
 0x235   : > { %v1897_v47 = vmul.f32 %v1895_v17, %v4395_v23  ;;  %v4409_v57 = vadd.f32 %v1702_v59, %v1694_v32  ;;  %v1890_v29 = vmul.f32 %v1888_v8, %v1686_v2  ;;  %v1585_v21 = vmul.f32 %v1583_v31, %v4792_v25  ;;  %v1769_v8 = vpop.permute.xlu2 %1768  ;;  %v2023_v31 = vpop.permute.xlu0 %2022 }
 0x236   : > { %v1794_v34 = vadd.f32 %v1792_v11, %v1784_v12  ;;  %v1586_v30 = vmul.f32 %v1584_v41, %v4793_v33  ;;  %v1593_v6 = vmul.f32 %v1591_v44, %v4263_v52  ;;  %v1594_v15 = vmul.f32 %v1592_v53, %v4266_v46  ;;  %v4795_v52 = vld [vmem:[#allocation33_spill] sm:$0xff]  ;;  %v4802_v12 = vld [vmem:[#allocation48_spill] sm:$0xff]  ;;  %v4803_v41 = vld [vmem:[#allocation38_spill] sm:$0xff] }
 0x237   : > { %v4419_v9 = vadd.f32 %v4325_v24, %v4794_v36  ;;  %v4423_v1 = vadd.f32 %v4328_v26, %v4314_v5  ;;  %v1899_v49 = vadd.f32 %v1897_v47, %v1889_v16  ;;  %v1898_v63 = vmul.f32 %v1896_v60, %v4409_v57  ;;  %v4796_v5 = vld [vmem:[#allocation30_spill] sm:$0xff]  ;;  %v4797_v26 = vld [vmem:[#allocation37_spill] sm:$0xff]  ;;  %v4804_v44 = vld [vmem:[#allocation44_spill] sm:$0xff] }
 0x238   : > { %1835 = vmatpush.msrb.mxu3 %v1794_v34  ;;  %v1595_v55 = vadd.f32 %v1593_v6, %v1585_v21  ;;  %v1596_v4 = vadd.f32 %v1594_v15, %v1586_v30  ;;  %v1727_v45 = vmul.f32 %v4795_v52, %v4183_v18  ;;  %v1728_v46 = vmul.f32 %v4795_v52, %v4187_v38  ;;  %v4800_v16 = vld [vmem:[#allocation53_spill] sm:$0xff]  ;;  %v4805_v47 = vld [vmem:[#allocation40_spill] sm:$0xff]  ;;  %v4807_v21 = vld [vmem:[#allocation39_spill] sm:$0xff] }
 0x239   : > { %v1484_v24 = vsel %vm1482_vm1, 1.0, %v4769_v51  ;;  %1921 = vmatpush.msra.mxu2 %v1899_v49  ;;  %v1900_v54 = vadd.f32 %v1898_v63, %v1890_v29  ;;  %v1735_v2 = vmul.f32 %v4797_v26, %v4796_v5  ;;  %v1736_v43 = vmul.f32 %v4797_v26, %v4798_v56  ;;  %2417 = vmatmul.msk.f32.vlgmr.msrb.gmra.mxu3 %vm930_vm12, %v1796_v42  ;;  %v4806_v29 = vld [vmem:[#allocation26_spill] sm:$0xff]  ;;  %v4808_v63 = vld [vmem:[#allocation27_spill] sm:$0xff] }
 0x23a   : > { %v1645_v17 = vmul.f32 %v4800_v16, %v4799_v3  ;;  %v1717_v14 = vmul.f32 %v4801_v20, %v4789_v48  ;;  %v1729_v11 = vmul.f32 %v1727_v45, %v1595_v55  ;;  %v1730_v32 = vmul.f32 %v1728_v46, %v1596_v4  ;;  %v4810_v45 = vld [vmem:[#allocation46_spill] sm:$0xff] }
 0x23b   : > { %v1646_v51 = vmul.f32 %v4800_v16, %v4141_v28  ;;  %1941 = vmatpush.msra.mxu3 %v1900_v54  ;;  %v1718_v59 = vmul.f32 %v4801_v20, %v4791_v13  ;;  %v1737_v60 = vmul.f32 %v1735_v2, %v4419_v9  ;;  %v1738_v7 = vmul.f32 %v1736_v43, %v4423_v1  ;;  %v4474_v16 = vpop.permute.xlu1 %1957 }
 0x23c   : > { %v1501_v27 = vsub.f32 %v4803_v41, %v4802_v12  ;;  %v1638_v53 = vmul.f32 %v4804_v44, %v4798_v56  ;;  %v1719_v42 = vmul.f32 %v1717_v14, %v1595_v55  ;;  %v1709_v25 = vmul.f32 %v4806_v29, %v4805_v47  ;;  %v4809_v55 = vld [vmem:[#allocation43_spill] sm:$0xff]  ;;  %v4815_v12 = vld [vmem:[#allocation42_spill] sm:$0xff] }
 0x23d   : > { %v1502_v34 = vsub.f32 %v4807_v21, %v1484_v24  ;;  %v1720_v33 = vmul.f32 %v1718_v59, %v1596_v4  ;;  %v4455_v30 = vadd.f32 %v1737_v60, %v1729_v11  ;;  %v2025_v6 = vmul.f32 %v2023_v31, %v4796_v5  ;;  %v1902_v24 = vld [vmem:[#allocation16 + $0x10] sm:$0xff] }
 0x23e   : > { %v4458_v15 = vadd.f32 %v1738_v7, %v1730_v32  ;;  %v1711_v36 = vmul.f32 %v1709_v25, %v4369_v10  ;;  %v1710_v49 = vmul.f32 %v4806_v29, %v4179_v40  ;;  %v2414_v52 = vmul.f32 -1.442695, %v4808_v63  ;;  %2420 = vmatmul.msk.f32.vlgmr.msra.gmra.mxu2 %vm930_vm12, %v1902_v24  ;;  %v4812_v59 = vld [vmem:[#allocation47_spill] sm:$0xff]  ;;  %v4813_v7 = vld [vmem:[#allocation41_spill] sm:$0xff]  ;;  %v4816_v25 = vld [vmem:[#allocation34_spill] sm:$0xff] }
 0x23f   : > { %v1631_v46 = vadd.f32 %v4810_v45, %v4809_v55  ;;  %v1647_v54 = vmul.f32 %v1645_v17, %v1501_v27  ;;  %v1648_v26 = vmul.f32 %v1646_v51, %v1502_v34  ;;  %v2026_v4 = vmul.f32 %v2023_v31, %v4798_v56  ;;  %v4811_v51 = vld [vmem:[#allocation45_spill] sm:$0xff] }
 0x240   : > { %v2027_v2 = vmul.f32 %v2025_v6, %v4455_v30  ;;  %v4468_v5 = vadd.f32 %v1719_v42, %v1711_v36  ;;  %v2017_v10 = vmul.f32 %v4340_v61, %v4805_v47  ;;  %v1712_v43 = vmul.f32 %v1710_v49, %v4381_v37  ;;  %v4814_v31 = vld [vmem:[#allocation49_spill] sm:$0xff]  ;;  %v2145_v47 = vpop.permute.xlu2 %2144  ;;  %v4817_v36 = vld [vmem:[#allocation35_spill] sm:$0xff] }
 0x241   : > { %v1745_v17 = vmul.f32 %v4359_v39, %v4193_v62  ;;  %v1746_v56 = vmul.f32 %v4359_v39, %v4197_v19  ;;  %2701 = vpow2.f32 %v2414_v52  ;;  %v2415_v20 = vmul.f32 -1.442695, %v4093_v0  ;;  %2421 = vmatmul.msk.f32.vlgmr.msra.gmra.mxu3 %vm930_vm12, %v1902_v24  ;;  %v2032_v34 = vld [vmem:[#allocation16 + $0x20] sm:$0xff] }
 0x242   : > { %v2028_v14 = vmul.f32 %v2026_v4, %v4458_v15  ;;  %v2019_v11 = vmul.f32 %v2017_v10, %v4468_v5  ;;  %v4483_v32 = vadd.f32 %v1720_v33, %v1712_v43  ;;  %v2018_v37 = vmul.f32 %v4340_v61, %v4179_v40  ;;  %v4501_v33 = vpop.permute.xlu0 %1949 }
 0x243   : > { %v1632_v60 = vadd.f32 %v4812_v59, %v4811_v51  ;;  %v1639_v39 = vmul.f32 %v4814_v31, %v4813_v7  ;;  %v1640_v41 = vmul.f32 %v1638_v53, %v4815_v12  ;;  %2703 = vpow2.f32 %v2415_v20  ;;  %v2153_v10 = vpop.permute.xlu1 %2152 }
 0x244   : > { %v2029_v27 = vadd.f32 %v2027_v2, %v2019_v11  ;;  %v2020_v44 = vmul.f32 %v2018_v37, %v4483_v32  ;;  %v1763_v42 = vmul.f32 %v4415_v50, %v4789_v48  ;;  %v1764_v40 = vmul.f32 %v4415_v50, %v4791_v13 }
 0x245   : > { %v1649_v61 = vadd.f32 %v1647_v54, %v1639_v39  ;;  %v1747_v29 = vmul.f32 %v1745_v17, %v4419_v9  ;;  %v1753_v21 = vmul.f32 %v4386_v22, %v4816_v25  ;;  %v1650_v53 = vadd.f32 %v1648_v26, %v1640_v41 }
 0x246   : > { %v1748_v6 = vmul.f32 %v1746_v56, %v4423_v1  ;;  %v1754_v49 = vmul.f32 %v4386_v22, %v4817_v36  ;;  %2051 = vmatpush.msrb.mxu2 %v2029_v27  ;;  %v2030_v52 = vadd.f32 %v2028_v14, %v2020_v44  ;;  %v1771_v50 = vmul.f32 %v1769_v8, %v4799_v3 }
 0x247   : > { %v2702_v55 = vpop.eup %2701  ;;  %v1772_v45 = vmul.f32 %v1769_v8, %v4141_v28  ;;  %v1755_v9 = vmul.f32 %v1753_v21, %v1631_v46  ;;  %v1765_v4 = vmul.f32 %v1763_v42, %v1631_v46  ;;  %v1766_v24 = vmul.f32 %v1764_v40, %v1632_v60  ;;  %2424 = vmatmul.msk.f32.vlgmr.msrb.gmra.mxu2 %vm930_vm12, %v2032_v34 }
 0x248   : > { %v1756_v54 = vmul.f32 %v1754_v49, %v1632_v60  ;;  %2071 = vmatpush.msrb.mxu3 %v2030_v52  ;;  %v1348_v2 = vadd.f32 1.0, %v2702_v55  ;;  %v1773_v22 = vmul.f32 %v1771_v50, %v1649_v61  ;;  %v2155_v8 = vmul.f32 %v2153_v10, %v4799_v3  ;;  %v2080_v31 = vpop.permute.xlu2 %2079 }
 0x249   : > { %v2704_v26 = vpop.eup %2703  ;;  %v1757_v1 = vadd.f32 %v1755_v9, %v1747_v29  ;;  %2425 = vmatmul.msk.f32.vlgmr.msrb.gmra.mxu3 %vm930_vm12, %v2032_v34  ;;  %v1774_v17 = vmul.f32 %v1772_v45, %v1650_v53  ;;  %v2156_v46 = vmul.f32 %v2153_v10, %v4141_v28  ;;  %v2147_v20 = vmul.f32 %v2145_v47, %v4193_v62  ;;  %v2162_v28 = vld [vmem:[#allocation16 + $0x30] sm:$0xff] }
 0x24a   : > { %v4509_v43 = vadd.f32 %v1756_v54, %v1748_v6  ;;  %2705 = vrcp.f32 %v1348_v2  ;;  %v4512_v56 = vadd.f32 1.0, %v2704_v26  ;;  %v2148_v14 = vmul.f32 %v2145_v47, %v4197_v19  ;;  %v2088_v12 = vpop.permute.xlu0 %2087  ;;  %v1382_v26 = vld [vmem:[#allocation16] sm:$0xff] }
 0x24b   : > { %v1775_v11 = vadd.f32 %v1773_v22, %v1765_v4  ;;  %v1776_v37 = vadd.f32 %v1774_v17, %v1766_v24  ;;  %v2149_v51 = vmul.f32 %v2147_v20, %v1757_v1  ;;  %v2082_v62 = vmul.f32 %v2080_v31, %v4183_v18 }
 0x24c   : > { %2707 = vrcp.f32 %v4512_v56  ;;  %v2150_v59 = vmul.f32 %v2148_v14, %v4509_v43  ;;  %v2090_v44 = vmul.f32 %v2088_v12, %v4816_v25  ;;  %v1960_v40 = vmul.f32 %v4474_v16, %v4789_v48 }
 0x24d   : > { %v2157_v60 = vmul.f32 %v2155_v8, %v1775_v11  ;;  %v2158_v7 = vmul.f32 %v2156_v46, %v1776_v37  ;;  %v2083_v61 = vmul.f32 %v2080_v31, %v4187_v38  ;;  %v1361_v47 = vand.u32 2147483648, %v1348_v2 }
 0x24e   : > { %v2092_v21 = vmul.f32 %v2090_v44, %v1757_v1  ;;  %v1359_v34 = vand.u32 2147483647, %v1348_v2  ;;  %v2084_v53 = vmul.f32 %v2082_v62, %v4455_v30  ;;  %v1952_v6 = vmul.f32 %v4501_v33, %v4167_v58 }
 0x24f   : > { %v2159_v41 = vadd.f32 %v2157_v60, %v2149_v51  ;;  %v2160_v3 = vadd.f32 %v2158_v7, %v2150_v59  ;;  %v1961_v48 = vmul.f32 %v4474_v16, %v4791_v13  ;;  %vm1355_vm3 = vweird.f32 %v1348_v2 }
 0x250   : > { %v2706_v39 = vpop.eup %2705  ;;  %v1376_v38 = vand.u32 2147483648, %v4512_v56  ;;  %v1962_v52 = vmul.f32 %v1960_v40, %v4468_v5  ;;  %v1362_v55 = vor.u32 1.1754944e-38, %v1361_v47  ;;  %v1374_v45 = vand.u32 2147483647, %v4512_v56 }
 0x251   : > { %v1351_v27 = vmul.f32 %v2706_v39, %v1348_v2  ;;  %2181 = vmatpush.msra.mxu2 %v2159_v41  ;;  %2201 = vmatpush.msra.mxu3 %v2160_v3  ;;  %vm1356_vm2 = vweird.f32 %v2706_v39  ;;  %vm1360_vm6 = vcmp.eq.f32.partialorder %v1359_v34, 8.507059e+37  ;;  %v1953_v58 = vmul.f32 %v4501_v33, %v4171_v35 }
 0x252   : > { %v2708_v19 = vpop.eup %2707  ;;  %2428 = vmatmul.msk.f32.vlgmr.msra.gmra.mxu2 %vm930_vm12, %v2162_v28  ;;  %2429 = vmatmul.msk.f32.vlgmr.msra.gmra.mxu3 %vm930_vm12, %v2162_v28  ;;  %vm1357_vm4 = vmor %vm1355_vm3, %vm1356_vm2  ;;  %v1954_v9 = vmul.f32 %v1952_v6, %v4395_v23  ;;  %vm1370_vm7 = vweird.f32 %v4512_v56  ;;  %v1963_v54 = vmul.f32 %v1961_v48, %v4483_v32  ;;  %v2091_v5 = vmul.f32 %v2088_v12, %v4817_v36 }
 0x253   : > { %v1352_v42 = vsub.f32 1.0, %v1351_v27  ;;  %v1366_v29 = vmul.f32 %v2708_v19, %v4512_v56  ;;  %vm1371_vm5 = vweird.f32 %v2708_v19  ;;  %v1377_v24 = vor.u32 1.1754944e-38, %v1376_v38 }
 0x254   : > { %vm1372_vm8 = vmor %vm1370_vm7, %vm1371_vm5  ;;  %v1964_v2 = vadd.f32 %v1962_v52, %v1954_v9  ;;  %vm1375_vm9 = vcmp.eq.f32.partialorder %v1374_v45, 8.507059e+37  ;;  %v1955_v35 = vmul.f32 %v1953_v58, %v4409_v57  ;;  %v2085_v23 = vmul.f32 %v2083_v61, %v4458_v15  ;;  %v1967_v57 = vld [vmem:[#allocation16 + $0x18] sm:$0xff]  ;;  %v2097_v15 = vld [vmem:[#allocation16 + $0x28] sm:$0xff] }
 0x255   : > { %v1353_v18 = vmul.f32 %v2706_v39, %v1352_v42  ;;  %v1367_v25 = vsub.f32 1.0, %v1366_v29  ;;  %v2093_v33 = vmul.f32 %v2091_v5, %v4509_v43  ;;  %v2094_v22 = vadd.f32 %v2092_v21, %v2084_v53 }
 0x256   : > { %v1965_v36 = vadd.f32 %v1963_v54, %v1955_v35 }
 0x257   : > { %v1354_v49 = vadd.f32 %v2706_v39, %v1353_v18  ;;  %v1368_v50 = vmul.f32 %v2708_v19, %v1367_v25 }
 0x259   : > { %v1358_v30 = vsel %vm1357_vm4, %v2706_v39, %v1354_v49  ;;  %v1369_v16 = vadd.f32 %v2708_v19, %v1368_v50 }
 0x25a   : > { %v1363_v13 = vsel %vm1360_vm6, %v1362_v55, %v1358_v30 }
 0x25b   : > { %v1380_v4 = vmul.f32 %v1363_v13, %v4808_v63  ;;  %v1373_v1 = vsel %vm1372_vm8, %v2708_v19, %v1369_v16  ;;  %v2095_v63 = vadd.f32 %v2093_v33, %v2085_v23 }
 0x25c   : > { %v1378_v10 = vsel %vm1375_vm9, %v1377_v24, %v1373_v1 }
 0x25d   : > { %1858 = vmatpush.msra.mxu0 %v1380_v4  ;;  %v1381_v32 = vmul.f32 %v1378_v10, %v4093_v0 }
 0x25e   : > { %2418 = vmatmul.msk.f32.vlgmr.msra.gmra.mxu0 %vm930_vm12, %v1382_v26 }
 0x25f   : > { %1986 = vmatpush.msrb.mxu0 %v1964_v2  ;;  %1878 = vmatpush.msra.mxu1 %v1381_v32 }
 0x260   : > { %2419 = vmatmul.msk.f32.vlgmr.msra.gmra.mxu1 %vm930_vm12, %v1382_v26 }
 0x261   : > { %2116 = vmatpush.msra.mxu0 %v2094_v22  ;;  %2006 = vmatpush.msrb.mxu1 %v1965_v36 }
 0x263   : > { %2136 = vmatpush.msra.mxu1 %v2095_v63 }
 0x266   : > { %2422 = vmatmul.msk.f32.vlgmr.msrb.gmra.mxu0 %vm930_vm12, %v1967_v57 }
 0x268   : > { %2423 = vmatmul.msk.f32.vlgmr.msrb.gmra.mxu1 %vm930_vm12, %v1967_v57 }
 0x26e   : > { %2426 = vmatmul.msk.f32.vlgmr.msra.gmra.mxu0 %vm930_vm12, %v2097_v15 }
 0x270   : > { %2427 = vmatmul.msk.f32.vlgmr.msra.gmra.mxu1 %vm930_vm12, %v2097_v15 }
 0x2b3   : > { %v1817_v0 = vpop.f32.mrf.mxu2 }
 0x2bc   : > { %v1837_v43 = vpop.f32.mrf.mxu3 }
 0x2c1   : > { %v1923_v17 = vpop.f32.mrf.mxu2 }
 0x2c4   : > { %v1943_v8 = vpop.f32.mrf.mxu3 }
 0x2ca   : > { %v2053_v37 = vpop.f32.mrf.mxu2 }
 0x2cc   : > { %v2073_v7 = vpop.f32.mrf.mxu3 }
 0x2d5   : > { %v2183_v3 = vpop.f32.mrf.mxu2  ;;  %v2203_v44 = vpop.f32.mrf.mxu3 }
 0x2db   : > { %v1860_v56 = vpop.f32.mrf.mxu0 }
 0x2dc   : > { %v1861_v20 = vadd.f32 %v1860_v56, %v1817_v0 }
 0x2dd   : > { %v1880_v46 = vpop.f32.mrf.mxu1 }
 0x2de   : > { %v1881_v14 = vadd.f32 %v1880_v46, %v1837_v43  ;;  %v1946_v51 = vadd.f32 %v1923_v17, %v1861_v20 }
 0x2e0   : > { %v1947_v31 = vadd.f32 %v1943_v8, %v1881_v14 }
 0x2e3   : > { %v1988_v11 = vpop.f32.mrf.mxu0 }
 0x2e4   : > { %v2011_v59 = vadd.f32 %v1988_v11, %v1946_v51 }
 0x2e5   : > { %v2008_v60 = vpop.f32.mrf.mxu1 }
 0x2e6   : > { %v2012_v39 = vadd.f32 %v2008_v60, %v1947_v31  ;;  %v2076_v12 = vadd.f32 %v2053_v37, %v2011_v59 }
 0x2e8   : > { %v2077_v28 = vadd.f32 %v2073_v7, %v2012_v39 }
 0x2eb   : > { %v2118_v41 = vpop.f32.mrf.mxu0 }
 0x2ec   : > { %v2141_v27 = vadd.f32 %v2118_v41, %v2076_v12 }
 0x2ed   : > { %v2138_v62 = vpop.f32.mrf.mxu1 }
 0x2ee   : > { %v2206_v19 = vadd.f32 %v2183_v3, %v2141_v27  ;;  %v2142_v42 = vadd.f32 %v2138_v62, %v2077_v28 }
 0x2f0   : > { %2208 = vst [vmem:[%s470_s23] sm:$0xff] %v2206_v19  ;;  %v2207_v40 = vadd.f32 %v2203_v44, %v2142_v42 }
 0x2f2   : > { %2209 = vst [vmem:[%s470_s23 + $0x8] sm:$0xff] %v2207_v40 }
 0x2f3   : > { %3006 = shalt.err (!%p3003_p8)
}
 0x2f4   : > { %2471 = dma.vmem_to_hbm [thread:$0]  (%p3253_p2), %s2225_s24, 256, %s2227_s28, %s2211_s16  }
 0x2f5 PF: > { %p2523_p9 = scmp.ge.s32.totalorder %s3061_s12, 2  ;;  %s2238_s20 = sand.u32 1, %s3049_s30  }
 0x2f6   : > { %s2239_s3 = scalar_lea.sflag [#allocation4], %s2238_s20 }
 0x2f7   : > { %p2503_p10 = pnand %p2523_p9, %p3257_p4 }
 0x2f9   : > { %p2504_p12 = pneg %p2503_p10 }
 0x2fb   : > { %3044 = dma.done.wait (%p2504_p12), %s2239_s3, 256  }
 0x2fc   : > { %3046 = vsyncadd (%p2504_p12), %s2239_s3, 4294967040  ;;  %p26_p13 = scmp.ge.s32.totalorder %s3227_s18, 6   ;;  %s4818_s30 = smov %s3053_s10 }
 0x2fd   : > { %s4819_s10 = smov %s3057_s11  ;;  %s4820_s11 = smov %s3238_s26 }
 0x2fe   : > { %s4821_s12 = smov %s3227_s18  ;;  %28 = sbr.rel (!%p26_p13) target bundleno = 14 (0xe), region = 145 }
 0x303   :  { %2245 = vsyncpa [#allocation3], 1 }
 0x304   :  { %2247 = vsyncpa [#allocation3 + $0x1], 1 }
 0x305   :  { %2248 = vsyncpa [#allocation6], 1 }
 0x306   :  { %2249 = vsyncpa [#allocation9], 1 }
 0x307   :  { %2250 = vsyncpa [#allocation12], 1 }
 0x308   :  { %2251 = vsyncpa [#allocation15], 1 }
 0x309   :  { %2252 = vsyncpa [#allocation4], 1 }
 0x30a   :  { %2254 = vsyncpa [#allocation4 + $0x1], 1 }

</bundles_post_ra>
